<compile_context>
chip_gen: v7x
topology: tpu7x:2x2x1
jax: 0.10.0
libtpu: 0.0.40
codegen_flags: <defaults>
</compile_context>

<pallas_src>
import functools

import jax
import jax.numpy as jnp
from jax import lax
from jax.experimental import pallas as pl
from jax.experimental.pallas import tpu as pltpu


def gru_encoder_kernel(ids_c_ref, ids_t_ref, p_c_ref, p_t_ref, w_h_ref,
                       b_hn_ref, out_ref, *, batch):
    """Fused EncoderRNN forward (embedding gather + GRU, PyTorch gate order r,z,n).

    ids_c_ref, ids_t_ref : (S*B, 1) int32  token ids (time-major flattened)
    p_c_ref              : (3, Vc_pad, H)  emb_ctxt pre-projected per gate
                           (b_ih folded in for all gates, b_hh folded for r,z)
    p_t_ref              : (3, Vt_pad, H)  emb_temp pre-projected per gate
    w_h_ref              : (3, H, H)       hidden weights, gate-split, pre-transposed
    b_hn_ref             : (1, H)          hidden bias of the n gate
    out_ref              : (S*B, H)        hidden state for every timestep
    """
    SB, H = out_ref.shape
    B = batch
    S = SB // B
    VPC = p_c_ref.shape[1]
    VPT = p_t_ref.shape[1]
    f32 = jnp.float32
    hi = lax.Precision.HIGHEST

    # --- In-kernel embedding gather via exact one-hot MXU matmuls -----------
    ids_c = ids_c_ref[...]                                        # (SB, 1)
    ids_t = ids_t_ref[...]
    oh_c = jnp.where(ids_c == lax.broadcasted_iota(jnp.int32, (SB, VPC), 1),
                     1.0, 0.0)                                    # (SB, VPC) f32
    oh_t = jnp.where(ids_t == lax.broadcasted_iota(jnp.int32, (SB, VPT), 1),
                     1.0, 0.0)                                    # (SB, VPT) f32

    def gather(g):
        # (SB, H) per gate, lane-0 aligned; HIGHEST => bit-exact gather.
        return (jnp.dot(oh_c, p_c_ref[g], precision=hi,
                        preferred_element_type=f32) +
                jnp.dot(oh_t, p_t_ref[g], precision=hi,
                        preferred_element_type=f32))

    gi_r, gi_z, gi_n = gather(0), gather(1), gather(2)   # kept in vregs (no scratch)

    # --- Hoisted weight loads / bias broadcast (no per-step broadcast_in_dim)
    w_r = w_h_ref[0]                                      # (H, H)
    w_z = w_h_ref[1]
    w_n = w_h_ref[2]
    b_n = jnp.broadcast_to(b_hn_ref[...], (B, H))         # (B, H)

    def _sigmoid(x):
        # single EUP op on the critical chain (instead of exp + divide)
        return 0.5 * jnp.tanh(0.5 * x) + 0.5

    # --- Serial recurrence: 3 small lane-aligned matmuls + gates per step ----
    h = jnp.zeros((B, H), f32)
    for t in range(S):                                    # static, fully unrolled
        lo = t * B
        gh_r = jnp.dot(h, w_r, precision=hi, preferred_element_type=f32)
        gh_z = jnp.dot(h, w_z, precision=hi, preferred_element_type=f32)
        gh_n = jnp.dot(h, w_n, precision=hi, preferred_element_type=f32) + b_n
        r = _sigmoid(gi_r[lo:lo + B, :] + gh_r)
        z = _sigmoid(gi_z[lo:lo + B, :] + gh_z)
        n = jnp.tanh(gi_n[lo:lo + B, :] + r * gh_n)
        h = (1.0 - z) * n + z * h
        out_ref[lo:lo + B, :] = h


def init_params(key, input_size_ctxt, input_size_temp, hidden_size):
    """Deterministic synthetic parameters mirroring nn.Embedding / nn.GRU shapes."""
    H = hidden_size
    k = jax.random.split(key, 6)
    bound = 1.0 / jnp.sqrt(H)
    return {
        "emb_ctxt": jax.random.normal(k[0], (input_size_ctxt, H), jnp.float32),
        "emb_temp": jax.random.normal(k[1], (input_size_temp, H), jnp.float32),
        # PyTorch layout: weight_ih_l0 (3H, 2H), weight_hh_l0 (3H, H), biases (3H,)
        "w_ih": jax.random.uniform(k[2], (3 * H, 2 * H), jnp.float32, -bound, bound),
        "w_hh": jax.random.uniform(k[3], (3 * H, H), jnp.float32, -bound, bound),
        "b_ih": jax.random.uniform(k[4], (3 * H,), jnp.float32, -bound, bound),
        "b_hh": jax.random.uniform(k[5], (3 * H,), jnp.float32, -bound, bound),
    }


def pack_params(params):
    """One-time (outside the jitted forward) weight packing:
    fold the input projection + biases into per-gate embedding tables and
    split/transpose the hidden weights per gate."""
    H = params["emb_ctxt"].shape[1]
    w_ih, w_hh = params["w_ih"], params["w_hh"]
    b_ih, b_hh = params["b_ih"], params["b_hh"]
    hi = lax.Precision.HIGHEST

    def fold(emb, col0, gate_bias):
        V = emb.shape[0]
        vp = -(-V // 8) * 8                                # pad rows to sublane multiple
        tbls = []
        for g in range(3):
            w_g = w_ih[g * H:(g + 1) * H, col0:col0 + H]   # (H, H)
            t = jnp.dot(emb, w_g.T, precision=hi) + gate_bias[g][None, :]
            tbls.append(jnp.pad(t, ((0, vp - V), (0, 0))))
        return jnp.stack(tbls)                             # (3, vp, H)

    b_i = [b_ih[g * H:(g + 1) * H] for g in range(3)]
    b_h = [b_hh[g * H:(g + 1) * H] for g in range(3)]
    zero = jnp.zeros((H,), jnp.float32)
    # b_ih (all gates) + b_hh (r, z gates) folded into the ctxt table;
    # b_hn must stay inside r * (h @ W_hn.T + b_hn) per GRU semantics.
    p_c = fold(params["emb_ctxt"], 0, [b_i[0] + b_h[0], b_i[1] + b_h[1], b_i[2]])
    p_t = fold(params["emb_temp"], H, [zero, zero, zero])
    w_h = jnp.stack([w_hh[g * H:(g + 1) * H, :].T for g in range(3)])   # (3, H, H)
    b_hn = b_h[2].reshape(1, H)
    return {"p_c": p_c, "p_t": p_t, "w_h": w_h, "b_hn": b_hn}


@jax.jit
def encoder_rnn_forward(past_ctxt, past_temp, packed):
    """past_ctxt, past_temp: int32 (seq_len, batch).  Returns (output, hidden)."""
    S, B = past_ctxt.shape
    H = packed["w_h"].shape[-1]

    ids_c = past_ctxt.reshape(S * B, 1).astype(jnp.int32)
    ids_t = past_temp.reshape(S * B, 1).astype(jnp.int32)

    out_flat = pl.pallas_call(
        functools.partial(gru_encoder_kernel, batch=B),
        out_shape=jax.ShapeDtypeStruct((S * B, H), jnp.float32),
        in_specs=[pl.BlockSpec(memory_space=pltpu.MemorySpace.VMEM)] * 6,
        out_specs=pl.BlockSpec(memory_space=pltpu.MemorySpace.VMEM),
    )(ids_c, ids_t, packed["p_c"], packed["p_t"], packed["w_h"], packed["b_hn"])

    output = out_flat.reshape(S, B, H)
    h_n = output[-1]                       # final hidden state == out[S-1]
    # PyTorch returns hidden with shape (num_layers=1, batch, hidden).
    return output, h_n.reshape(1, B, H)


def encoder_rnn_reference(past_ctxt, past_temp, params):
    """Pure-JAX (f32) reference of the PyTorch forward pass."""
    H = params["emb_ctxt"].shape[1]
    e_c = jnp.take(params["emb_ctxt"], past_ctxt, axis=0)
    e_t = jnp.take(params["emb_temp"], past_temp, axis=0)
    x_seq = jnp.concatenate([e_c, e_t], axis=2)            # (S,B,2H)
    w_ih, w_hh = params["w_ih"], params["w_hh"]
    b_ih, b_hh = params["b_ih"], params["b_hh"]
    hi = lax.Precision.HIGHEST

    def cell(h, x):
        gi = jnp.dot(x, w_ih.T, precision=hi) + b_ih
        gh = jnp.dot(h, w_hh.T, precision=hi) + b_hh
        r = jax.nn.sigmoid(gi[:, 0:H] + gh[:, 0:H])
        z = jax.nn.sigmoid(gi[:, H:2 * H] + gh[:, H:2 * H])
        n = jnp.tanh(gi[:, 2 * H:] + r * gh[:, 2 * H:])
        h_new = (1.0 - z) * n + z * h
        return h_new, h_new

    h0 = jnp.zeros((past_ctxt.shape[1], H), jnp.float32)
    h_last, outs = lax.scan(cell, h0, x_seq)
    return outs, h_last.reshape(1, *h_last.shape)


if __name__ == "__main__":
    SEQ, BATCH, HIDDEN = 8, 8, 32          # batch=8: sublane-aligned row tiles
    VOCAB_CTXT, VOCAB_TEMP = 10, 12

    key = jax.random.PRNGKey(0)
    k_params, k_ctxt, k_temp = jax.random.split(key, 3)

    params = init_params(k_params, VOCAB_CTXT, VOCAB_TEMP, HIDDEN)
    packed = pack_params(params)           # one-time packing, outside the jit
    past_ctxt = jax.random.randint(k_ctxt, (SEQ, BATCH), 0, VOCAB_CTXT, jnp.int32)
    past_temp = jax.random.randint(k_temp, (SEQ, BATCH), 0, VOCAB_TEMP, jnp.int32)

    output, hidden = encoder_rnn_forward(past_ctxt, past_temp, packed)
    jax.block_until_ready((output, hidden))

    ref_out, ref_hidden = encoder_rnn_reference(past_ctxt, past_temp, params)
    assert output.shape == (SEQ, BATCH, HIDDEN)
    assert hidden.shape == (1, BATCH, HIDDEN)
    # HIGHEST-precision matmuls + exact one-hot gathers: tolerance tightened
    # from the previous 2e-2 to 1e-3 (covers fp-associativity of the bias/
    # projection folding and the tanh-form sigmoid).
    assert jnp.allclose(output, ref_out, atol=1e-3, rtol=1e-3)
    assert jnp.allclose(hidden, ref_hidden, atol=1e-3, rtol=1e-3)

    print("KERNEL_OK")
</pallas_src>

<mosaic_0001>
module attributes {stable_mosaic.version = 11 : i64} {
  func.func @gru_encoder_kernel(%arg0: memref<64x1xi32, #tpu.memory_space<vmem>>, %arg1: memref<64x1xi32, #tpu.memory_space<vmem>>, %arg2: memref<3x16x32xf32, #tpu.memory_space<vmem>>, %arg3: memref<3x16x32xf32, #tpu.memory_space<vmem>>, %arg4: memref<3x32x32xf32, #tpu.memory_space<vmem>>, %arg5: memref<1x32xf32, #tpu.memory_space<vmem>>, %arg6: memref<64x32xf32, #tpu.memory_space<vmem>>) attributes {dimension_semantics = [], scalar_prefetch = 0 : i64, scratch_operands = 0 : i64, tpu.core_type = #tpu.core_type<tc>} {
    %c0 = arith.constant 0 : index
    %c0_0 = arith.constant 0 : index
    %0 = vector.load %arg0[%c0, %c0_0] : memref<64x1xi32, #tpu.memory_space<vmem>>, vector<64x1xi32>
    %c0_1 = arith.constant 0 : index
    %c0_2 = arith.constant 0 : index
    %1 = vector.load %arg1[%c0_1, %c0_2] : memref<64x1xi32, #tpu.memory_space<vmem>>, vector<64x1xi32>
    %2 = tpu.iota {dimensions = array<i32: 1>} : vector<64x16xi32>
    %3 = vector.broadcast %0 : vector<64x1xi32> to vector<64x16xi32>
    %4 = arith.cmpi eq, %3, %2 : vector<64x16xi32>
    %cst = arith.constant 1.000000e+00 : f32
    %cst_3 = arith.constant 0.000000e+00 : f32
    %5 = vector.broadcast %cst : f32 to vector<64x16xf32>
    %6 = vector.broadcast %cst_3 : f32 to vector<64x16xf32>
    %7 = arith.select %4, %5, %6 : vector<64x16xi1>, vector<64x16xf32>
    %8 = tpu.iota {dimensions = array<i32: 1>} : vector<64x16xi32>
    %9 = vector.broadcast %1 : vector<64x1xi32> to vector<64x16xi32>
    %10 = arith.cmpi eq, %9, %8 : vector<64x16xi32>
    %cst_4 = arith.constant 1.000000e+00 : f32
    %cst_5 = arith.constant 0.000000e+00 : f32
    %11 = vector.broadcast %cst_4 : f32 to vector<64x16xf32>
    %12 = vector.broadcast %cst_5 : f32 to vector<64x16xf32>
    %13 = arith.select %10, %11, %12 : vector<64x16xi1>, vector<64x16xf32>
    %c0_6 = arith.constant 0 : index
    %c0_7 = arith.constant 0 : index
    %c0_8 = arith.constant 0 : index
    %14 = vector.load %arg2[%c0_6, %c0_7, %c0_8] : memref<3x16x32xf32, #tpu.memory_space<vmem>>, vector<1x16x32xf32>
    %15 = vector.shape_cast %14 : vector<1x16x32xf32> to vector<16x32xf32>
    %cst_9 = arith.constant dense<0.000000e+00> : vector<64x32xf32>
    %16 = tpu.matmul %7, %15, %cst_9 {dimension_numbers = #tpu.dot_dimension_numbers<[1], [0], [0], [1], [0, 0, 1, 1], [], []>, precision = #tpu.contract_precision<fp32>} : vector<64x16xf32>, vector<16x32xf32>, vector<64x32xf32> -> vector<64x32xf32>
    %c0_10 = arith.constant 0 : index
    %c0_11 = arith.constant 0 : index
    %c0_12 = arith.constant 0 : index
    %17 = vector.load %arg3[%c0_10, %c0_11, %c0_12] : memref<3x16x32xf32, #tpu.memory_space<vmem>>, vector<1x16x32xf32>
    %18 = vector.shape_cast %17 : vector<1x16x32xf32> to vector<16x32xf32>
    %cst_13 = arith.constant dense<0.000000e+00> : vector<64x32xf32>
    %19 = tpu.matmul %13, %18, %cst_13 {dimension_numbers = #tpu.dot_dimension_numbers<[1], [0], [0], [1], [0, 0, 1, 1], [], []>, precision = #tpu.contract_precision<fp32>} : vector<64x16xf32>, vector<16x32xf32>, vector<64x32xf32> -> vector<64x32xf32>
    %20 = arith.addf %16, %19 : vector<64x32xf32>
    %c1 = arith.constant 1 : index
    %c0_14 = arith.constant 0 : index
    %c0_15 = arith.constant 0 : index
    %21 = vector.load %arg2[%c1, %c0_14, %c0_15] : memref<3x16x32xf32, #tpu.memory_space<vmem>>, vector<1x16x32xf32>
    %22 = vector.shape_cast %21 : vector<1x16x32xf32> to vector<16x32xf32>
    %cst_16 = arith.constant dense<0.000000e+00> : vector<64x32xf32>
    %23 = tpu.matmul %7, %22, %cst_16 {dimension_numbers = #tpu.dot_dimension_numbers<[1], [0], [0], [1], [0, 0, 1, 1], [], []>, precision = #tpu.contract_precision<fp32>} : vector<64x16xf32>, vector<16x32xf32>, vector<64x32xf32> -> vector<64x32xf32>
    %c1_17 = arith.constant 1 : index
    %c0_18 = arith.constant 0 : index
    %c0_19 = arith.constant 0 : index
    %24 = vector.load %arg3[%c1_17, %c0_18, %c0_19] : memref<3x16x32xf32, #tpu.memory_space<vmem>>, vector<1x16x32xf32>
    %25 = vector.shape_cast %24 : vector<1x16x32xf32> to vector<16x32xf32>
    %cst_20 = arith.constant dense<0.000000e+00> : vector<64x32xf32>
    %26 = tpu.matmul %13, %25, %cst_20 {dimension_numbers = #tpu.dot_dimension_numbers<[1], [0], [0], [1], [0, 0, 1, 1], [], []>, precision = #tpu.contract_precision<fp32>} : vector<64x16xf32>, vector<16x32xf32>, vector<64x32xf32> -> vector<64x32xf32>
    %27 = arith.addf %23, %26 : vector<64x32xf32>
    %c2 = arith.constant 2 : index
    %c0_21 = arith.constant 0 : index
    %c0_22 = arith.constant 0 : index
    %28 = vector.load %arg2[%c2, %c0_21, %c0_22] : memref<3x16x32xf32, #tpu.memory_space<vmem>>, vector<1x16x32xf32>
    %29 = vector.shape_cast %28 : vector<1x16x32xf32> to vector<16x32xf32>
    %cst_23 = arith.constant dense<0.000000e+00> : vector<64x32xf32>
    %30 = tpu.matmul %7, %29, %cst_23 {dimension_numbers = #tpu.dot_dimension_numbers<[1], [0], [0], [1], [0, 0, 1, 1], [], []>, precision = #tpu.contract_precision<fp32>} : vector<64x16xf32>, vector<16x32xf32>, vector<64x32xf32> -> vector<64x32xf32>
    %c2_24 = arith.constant 2 : index
    %c0_25 = arith.constant 0 : index
    %c0_26 = arith.constant 0 : index
    %31 = vector.load %arg3[%c2_24, %c0_25, %c0_26] : memref<3x16x32xf32, #tpu.memory_space<vmem>>, vector<1x16x32xf32>
    %32 = vector.shape_cast %31 : vector<1x16x32xf32> to vector<16x32xf32>
    %cst_27 = arith.constant dense<0.000000e+00> : vector<64x32xf32>
    %33 = tpu.matmul %13, %32, %cst_27 {dimension_numbers = #tpu.dot_dimension_numbers<[1], [0], [0], [1], [0, 0, 1, 1], [], []>, precision = #tpu.contract_precision<fp32>} : vector<64x16xf32>, vector<16x32xf32>, vector<64x32xf32> -> vector<64x32xf32>
    %34 = arith.addf %30, %33 : vector<64x32xf32>
    %c0_28 = arith.constant 0 : index
    %c0_29 = arith.constant 0 : index
    %c0_30 = arith.constant 0 : index
    %35 = vector.load %arg4[%c0_28, %c0_29, %c0_30] : memref<3x32x32xf32, #tpu.memory_space<vmem>>, vector<1x32x32xf32>
    %36 = vector.shape_cast %35 : vector<1x32x32xf32> to vector<32x32xf32>
    %c1_31 = arith.constant 1 : index
    %c0_32 = arith.constant 0 : index
    %c0_33 = arith.constant 0 : index
    %37 = vector.load %arg4[%c1_31, %c0_32, %c0_33] : memref<3x32x32xf32, #tpu.memory_space<vmem>>, vector<1x32x32xf32>
    %38 = vector.shape_cast %37 : vector<1x32x32xf32> to vector<32x32xf32>
    %c2_34 = arith.constant 2 : index
    %c0_35 = arith.constant 0 : index
    %c0_36 = arith.constant 0 : index
    %39 = vector.load %arg4[%c2_34, %c0_35, %c0_36] : memref<3x32x32xf32, #tpu.memory_space<vmem>>, vector<1x32x32xf32>
    %40 = vector.shape_cast %39 : vector<1x32x32xf32> to vector<32x32xf32>
    %c0_37 = arith.constant 0 : index
    %c0_38 = arith.constant 0 : index
    %41 = vector.load %arg5[%c0_37, %c0_38] : memref<1x32xf32, #tpu.memory_space<vmem>>, vector<1x32xf32>
    %42 = vector.shape_cast %41 : vector<1x32xf32> to vector<1x32xf32>
    %43 = vector.broadcast %42 : vector<1x32xf32> to vector<8x32xf32>
    %cst_39 = arith.constant 0.000000e+00 : f32
    %44 = vector.broadcast %cst_39 : f32 to vector<8x32xf32>
    %cst_40 = arith.constant dense<0.000000e+00> : vector<8x32xf32>
    %45 = tpu.matmul %44, %36, %cst_40 {dimension_numbers = #tpu.dot_dimension_numbers<[1], [0], [0], [1], [0, 0, 1, 1], [], []>, precision = #tpu.contract_precision<fp32>} : vector<8x32xf32>, vector<32x32xf32>, vector<8x32xf32> -> vector<8x32xf32>
    %cst_41 = arith.constant dense<0.000000e+00> : vector<8x32xf32>
    %46 = tpu.matmul %44, %38, %cst_41 {dimension_numbers = #tpu.dot_dimension_numbers<[1], [0], [0], [1], [0, 0, 1, 1], [], []>, precision = #tpu.contract_precision<fp32>} : vector<8x32xf32>, vector<32x32xf32>, vector<8x32xf32> -> vector<8x32xf32>
    %cst_42 = arith.constant dense<0.000000e+00> : vector<8x32xf32>
    %47 = tpu.matmul %44, %40, %cst_42 {dimension_numbers = #tpu.dot_dimension_numbers<[1], [0], [0], [1], [0, 0, 1, 1], [], []>, precision = #tpu.contract_precision<fp32>} : vector<8x32xf32>, vector<32x32xf32>, vector<8x32xf32> -> vector<8x32xf32>
    %48 = arith.addf %47, %43 : vector<8x32xf32>
    %49 = vector.extract_strided_slice %20 {offsets = [0, 0], sizes = [8, 32], strides = [1, 1]} : vector<64x32xf32> to vector<8x32xf32>
    %50 = arith.addf %49, %45 : vector<8x32xf32>
    %cst_43 = arith.constant 5.000000e-01 : f32
    %51 = vector.broadcast %cst_43 : f32 to vector<8x32xf32>
    %52 = arith.mulf %51, %50 : vector<8x32xf32>
    %53 = math.tanh %52 : vector<8x32xf32>
    %cst_44 = arith.constant 5.000000e-01 : f32
    %54 = vector.broadcast %cst_44 : f32 to vector<8x32xf32>
    %55 = arith.mulf %54, %53 : vector<8x32xf32>
    %cst_45 = arith.constant 5.000000e-01 : f32
    %56 = vector.broadcast %cst_45 : f32 to vector<8x32xf32>
    %57 = arith.addf %55, %56 : vector<8x32xf32>
    %58 = vector.extract_strided_slice %27 {offsets = [0, 0], sizes = [8, 32], strides = [1, 1]} : vector<64x32xf32> to vector<8x32xf32>
    %59 = arith.addf %58, %46 : vector<8x32xf32>
    %cst_46 = arith.constant 5.000000e-01 : f32
    %60 = vector.broadcast %cst_46 : f32 to vector<8x32xf32>
    %61 = arith.mulf %60, %59 : vector<8x32xf32>
    %62 = math.tanh %61 : vector<8x32xf32>
    %cst_47 = arith.constant 5.000000e-01 : f32
    %63 = vector.broadcast %cst_47 : f32 to vector<8x32xf32>
    %64 = arith.mulf %63, %62 : vector<8x32xf32>
    %cst_48 = arith.constant 5.000000e-01 : f32
    %65 = vector.broadcast %cst_48 : f32 to vector<8x32xf32>
    %66 = arith.addf %64, %65 : vector<8x32xf32>
    %67 = vector.extract_strided_slice %34 {offsets = [0, 0], sizes = [8, 32], strides = [1, 1]} : vector<64x32xf32> to vector<8x32xf32>
    %68 = arith.mulf %57, %48 : vector<8x32xf32>
    %69 = arith.addf %67, %68 : vector<8x32xf32>
    %70 = math.tanh %69 : vector<8x32xf32>
    %cst_49 = arith.constant 1.000000e+00 : f32
    %71 = vector.broadcast %cst_49 : f32 to vector<8x32xf32>
    %72 = arith.subf %71, %66 : vector<8x32xf32>
    %73 = arith.mulf %72, %70 : vector<8x32xf32>
    %74 = arith.mulf %66, %44 : vector<8x32xf32>
    %75 = arith.addf %73, %74 : vector<8x32xf32>
    %c0_50 = arith.constant 0 : index
    %c0_51 = arith.constant 0 : index
    %76 = vector.load %arg6[%c0_50, %c0_51] : memref<64x32xf32, #tpu.memory_space<vmem>>, vector<8x32xf32>
    tpu.vector_store %arg6[%c0_50, %c0_51], %75 {strides = array<i32>} : memref<64x32xf32, #tpu.memory_space<vmem>>, vector<8x32xf32>,
    %cst_52 = arith.constant dense<0.000000e+00> : vector<8x32xf32>
    %77 = tpu.matmul %75, %36, %cst_52 {dimension_numbers = #tpu.dot_dimension_numbers<[1], [0], [0], [1], [0, 0, 1, 1], [], []>, precision = #tpu.contract_precision<fp32>} : vector<8x32xf32>, vector<32x32xf32>, vector<8x32xf32> -> vector<8x32xf32>
    %cst_53 = arith.constant dense<0.000000e+00> : vector<8x32xf32>
    %78 = tpu.matmul %75, %38, %cst_53 {dimension_numbers = #tpu.dot_dimension_numbers<[1], [0], [0], [1], [0, 0, 1, 1], [], []>, precision = #tpu.contract_precision<fp32>} : vector<8x32xf32>, vector<32x32xf32>, vector<8x32xf32> -> vector<8x32xf32>
    %cst_54 = arith.constant dense<0.000000e+00> : vector<8x32xf32>
    %79 = tpu.matmul %75, %40, %cst_54 {dimension_numbers = #tpu.dot_dimension_numbers<[1], [0], [0], [1], [0, 0, 1, 1], [], []>, precision = #tpu.contract_precision<fp32>} : vector<8x32xf32>, vector<32x32xf32>, vector<8x32xf32> -> vector<8x32xf32>
    %80 = arith.addf %79, %43 : vector<8x32xf32>
    %81 = vector.extract_strided_slice %20 {offsets = [8, 0], sizes = [8, 32], strides = [1, 1]} : vector<64x32xf32> to vector<8x32xf32>
    %82 = arith.addf %81, %77 : vector<8x32xf32>
    %cst_55 = arith.constant 5.000000e-01 : f32
    %83 = vector.broadcast %cst_55 : f32 to vector<8x32xf32>
    %84 = arith.mulf %83, %82 : vector<8x32xf32>
    %85 = math.tanh %84 : vector<8x32xf32>
    %cst_56 = arith.constant 5.000000e-01 : f32
    %86 = vector.broadcast %cst_56 : f32 to vector<8x32xf32>
    %87 = arith.mulf %86, %85 : vector<8x32xf32>
    %cst_57 = arith.constant 5.000000e-01 : f32
    %88 = vector.broadcast %cst_57 : f32 to vector<8x32xf32>
    %89 = arith.addf %87, %88 : vector<8x32xf32>
    %90 = vector.extract_strided_slice %27 {offsets = [8, 0], sizes = [8, 32], strides = [1, 1]} : vector<64x32xf32> to vector<8x32xf32>
    %91 = arith.addf %90, %78 : vector<8x32xf32>
    %cst_58 = arith.constant 5.000000e-01 : f32
    %92 = vector.broadcast %cst_58 : f32 to vector<8x32xf32>
    %93 = arith.mulf %92, %91 : vector<8x32xf32>
    %94 = math.tanh %93 : vector<8x32xf32>
    %cst_59 = arith.constant 5.000000e-01 : f32
    %95 = vector.broadcast %cst_59 : f32 to vector<8x32xf32>
    %96 = arith.mulf %95, %94 : vector<8x32xf32>
    %cst_60 = arith.constant 5.000000e-01 : f32
    %97 = vector.broadcast %cst_60 : f32 to vector<8x32xf32>
    %98 = arith.addf %96, %97 : vector<8x32xf32>
    %99 = vector.extract_strided_slice %34 {offsets = [8, 0], sizes = [8, 32], strides = [1, 1]} : vector<64x32xf32> to vector<8x32xf32>
    %100 = arith.mulf %89, %80 : vector<8x32xf32>
    %101 = arith.addf %99, %100 : vector<8x32xf32>
    %102 = math.tanh %101 : vector<8x32xf32>
    %cst_61 = arith.constant 1.000000e+00 : f32
    %103 = vector.broadcast %cst_61 : f32 to vector<8x32xf32>
    %104 = arith.subf %103, %98 : vector<8x32xf32>
    %105 = arith.mulf %104, %102 : vector<8x32xf32>
    %106 = arith.mulf %98, %75 : vector<8x32xf32>
    %107 = arith.addf %105, %106 : vector<8x32xf32>
    %c8 = arith.constant 8 : index
    %c0_62 = arith.constant 0 : index
    %108 = vector.load %arg6[%c8, %c0_62] : memref<64x32xf32, #tpu.memory_space<vmem>>, vector<8x32xf32>
    tpu.vector_store %arg6[%c8, %c0_62], %107 {strides = array<i32>} : memref<64x32xf32, #tpu.memory_space<vmem>>, vector<8x32xf32>,
    %cst_63 = arith.constant dense<0.000000e+00> : vector<8x32xf32>
    %109 = tpu.matmul %107, %36, %cst_63 {dimension_numbers = #tpu.dot_dimension_numbers<[1], [0], [0], [1], [0, 0, 1, 1], [], []>, precision = #tpu.contract_precision<fp32>} : vector<8x32xf32>, vector<32x32xf32>, vector<8x32xf32> -> vector<8x32xf32>
    %cst_64 = arith.constant dense<0.000000e+00> : vector<8x32xf32>
    %110 = tpu.matmul %107, %38, %cst_64 {dimension_numbers = #tpu.dot_dimension_numbers<[1], [0], [0], [1], [0, 0, 1, 1], [], []>, precision = #tpu.contract_precision<fp32>} : vector<8x32xf32>, vector<32x32xf32>, vector<8x32xf32> -> vector<8x32xf32>
    %cst_65 = arith.constant dense<0.000000e+00> : vector<8x32xf32>
    %111 = tpu.matmul %107, %40, %cst_65 {dimension_numbers = #tpu.dot_dimension_numbers<[1], [0], [0], [1], [0, 0, 1, 1], [], []>, precision = #tpu.contract_precision<fp32>} : vector<8x32xf32>, vector<32x32xf32>, vector<8x32xf32> -> vector<8x32xf32>
    %112 = arith.addf %111, %43 : vector<8x32xf32>
    %113 = vector.extract_strided_slice %20 {offsets = [16, 0], sizes = [8, 32], strides = [1, 1]} : vector<64x32xf32> to vector<8x32xf32>
    %114 = arith.addf %113, %109 : vector<8x32xf32>
    %cst_66 = arith.constant 5.000000e-01 : f32
    %115 = vector.broadcast %cst_66 : f32 to vector<8x32xf32>
    %116 = arith.mulf %115, %114 : vector<8x32xf32>
    %117 = math.tanh %116 : vector<8x32xf32>
    %cst_67 = arith.constant 5.000000e-01 : f32
    %118 = vector.broadcast %cst_67 : f32 to vector<8x32xf32>
    %119 = arith.mulf %118, %117 : vector<8x32xf32>
    %cst_68 = arith.constant 5.000000e-01 : f32
    %120 = vector.broadcast %cst_68 : f32 to vector<8x32xf32>
    %121 = arith.addf %119, %120 : vector<8x32xf32>
    %122 = vector.extract_strided_slice %27 {offsets = [16, 0], sizes = [8, 32], strides = [1, 1]} : vector<64x32xf32> to vector<8x32xf32>
    %123 = arith.addf %122, %110 : vector<8x32xf32>
    %cst_69 = arith.constant 5.000000e-01 : f32
    %124 = vector.broadcast %cst_69 : f32 to vector<8x32xf32>
    %125 = arith.mulf %124, %123 : vector<8x32xf32>
    %126 = math.tanh %125 : vector<8x32xf32>
    %cst_70 = arith.constant 5.000000e-01 : f32
    %127 = vector.broadcast %cst_70 : f32 to vector<8x32xf32>
    %128 = arith.mulf %127, %126 : vector<8x32xf32>
    %cst_71 = arith.constant 5.000000e-01 : f32
    %129 = vector.broadcast %cst_71 : f32 to vector<8x32xf32>
    %130 = arith.addf %128, %129 : vector<8x32xf32>
    %131 = vector.extract_strided_slice %34 {offsets = [16, 0], sizes = [8, 32], strides = [1, 1]} : vector<64x32xf32> to vector<8x32xf32>
    %132 = arith.mulf %121, %112 : vector<8x32xf32>
    %133 = arith.addf %131, %132 : vector<8x32xf32>
    %134 = math.tanh %133 : vector<8x32xf32>
    %cst_72 = arith.constant 1.000000e+00 : f32
    %135 = vector.broadcast %cst_72 : f32 to vector<8x32xf32>
    %136 = arith.subf %135, %130 : vector<8x32xf32>
    %137 = arith.mulf %136, %134 : vector<8x32xf32>
    %138 = arith.mulf %130, %107 : vector<8x32xf32>
    %139 = arith.addf %137, %138 : vector<8x32xf32>
    %c16 = arith.constant 16 : index
    %c0_73 = arith.constant 0 : index
    %140 = vector.load %arg6[%c16, %c0_73] : memref<64x32xf32, #tpu.memory_space<vmem>>, vector<8x32xf32>
    tpu.vector_store %arg6[%c16, %c0_73], %139 {strides = array<i32>} : memref<64x32xf32, #tpu.memory_space<vmem>>, vector<8x32xf32>,
    %cst_74 = arith.constant dense<0.000000e+00> : vector<8x32xf32>
    %141 = tpu.matmul %139, %36, %cst_74 {dimension_numbers = #tpu.dot_dimension_numbers<[1], [0], [0], [1], [0, 0, 1, 1], [], []>, precision = #tpu.contract_precision<fp32>} : vector<8x32xf32>, vector<32x32xf32>, vector<8x32xf32> -> vector<8x32xf32>
    %cst_75 = arith.constant dense<0.000000e+00> : vector<8x32xf32>
    %142 = tpu.matmul %139, %38, %cst_75 {dimension_numbers = #tpu.dot_dimension_numbers<[1], [0], [0], [1], [0, 0, 1, 1], [], []>, precision = #tpu.contract_precision<fp32>} : vector<8x32xf32>, vector<32x32xf32>, vector<8x32xf32> -> vector<8x32xf32>
    %cst_76 = arith.constant dense<0.000000e+00> : vector<8x32xf32>
    %143 = tpu.matmul %139, %40, %cst_76 {dimension_numbers = #tpu.dot_dimension_numbers<[1], [0], [0], [1], [0, 0, 1, 1], [], []>, precision = #tpu.contract_precision<fp32>} : vector<8x32xf32>, vector<32x32xf32>, vector<8x32xf32> -> vector<8x32xf32>
    %144 = arith.addf %143, %43 : vector<8x32xf32>
    %145 = vector.extract_strided_slice %20 {offsets = [24, 0], sizes = [8, 32], strides = [1, 1]} : vector<64x32xf32> to vector<8x32xf32>
    %146 = arith.addf %145, %141 : vector<8x32xf32>
    %cst_77 = arith.constant 5.000000e-01 : f32
    %147 = vector.broadcast %cst_77 : f32 to vector<8x32xf32>
    %148 = arith.mulf %147, %146 : vector<8x32xf32>
    %149 = math.tanh %148 : vector<8x32xf32>
    %cst_78 = arith.constant 5.000000e-01 : f32
    %150 = vector.broadcast %cst_78 : f32 to vector<8x32xf32>
    %151 = arith.mulf %150, %149 : vector<8x32xf32>
    %cst_79 = arith.constant 5.000000e-01 : f32
    %152 = vector.broadcast %cst_79 : f32 to vector<8x32xf32>
    %153 = arith.addf %151, %152 : vector<8x32xf32>
    %154 = vector.extract_strided_slice %27 {offsets = [24, 0], sizes = [8, 32], strides = [1, 1]} : vector<64x32xf32> to vector<8x32xf32>
    %155 = arith.addf %154, %142 : vector<8x32xf32>
    %cst_80 = arith.constant 5.000000e-01 : f32
    %156 = vector.broadcast %cst_80 : f32 to vector<8x32xf32>
    %157 = arith.mulf %156, %155 : vector<8x32xf32>
    %158 = math.tanh %157 : vector<8x32xf32>
    %cst_81 = arith.constant 5.000000e-01 : f32
    %159 = vector.broadcast %cst_81 : f32 to vector<8x32xf32>
    %160 = arith.mulf %159, %158 : vector<8x32xf32>
    %cst_82 = arith.constant 5.000000e-01 : f32
    %161 = vector.broadcast %cst_82 : f32 to vector<8x32xf32>
    %162 = arith.addf %160, %161 : vector<8x32xf32>
    %163 = vector.extract_strided_slice %34 {offsets = [24, 0], sizes = [8, 32], strides = [1, 1]} : vector<64x32xf32> to vector<8x32xf32>
    %164 = arith.mulf %153, %144 : vector<8x32xf32>
    %165 = arith.addf %163, %164 : vector<8x32xf32>
    %166 = math.tanh %165 : vector<8x32xf32>
    %cst_83 = arith.constant 1.000000e+00 : f32
    %167 = vector.broadcast %cst_83 : f32 to vector<8x32xf32>
    %168 = arith.subf %167, %162 : vector<8x32xf32>
    %169 = arith.mulf %168, %166 : vector<8x32xf32>
    %170 = arith.mulf %162, %139 : vector<8x32xf32>
    %171 = arith.addf %169, %170 : vector<8x32xf32>
    %c24 = arith.constant 24 : index
    %c0_84 = arith.constant 0 : index
    %172 = vector.load %arg6[%c24, %c0_84] : memref<64x32xf32, #tpu.memory_space<vmem>>, vector<8x32xf32>
    tpu.vector_store %arg6[%c24, %c0_84], %171 {strides = array<i32>} : memref<64x32xf32, #tpu.memory_space<vmem>>, vector<8x32xf32>,
    %cst_85 = arith.constant dense<0.000000e+00> : vector<8x32xf32>
    %173 = tpu.matmul %171, %36, %cst_85 {dimension_numbers = #tpu.dot_dimension_numbers<[1], [0], [0], [1], [0, 0, 1, 1], [], []>, precision = #tpu.contract_precision<fp32>} : vector<8x32xf32>, vector<32x32xf32>, vector<8x32xf32> -> vector<8x32xf32>
    %cst_86 = arith.constant dense<0.000000e+00> : vector<8x32xf32>
    %174 = tpu.matmul %171, %38, %cst_86 {dimension_numbers = #tpu.dot_dimension_numbers<[1], [0], [0], [1], [0, 0, 1, 1], [], []>, precision = #tpu.contract_precision<fp32>} : vector<8x32xf32>, vector<32x32xf32>, vector<8x32xf32> -> vector<8x32xf32>
    %cst_87 = arith.constant dense<0.000000e+00> : vector<8x32xf32>
    %175 = tpu.matmul %171, %40, %cst_87 {dimension_numbers = #tpu.dot_dimension_numbers<[1], [0], [0], [1], [0, 0, 1, 1], [], []>, precision = #tpu.contract_precision<fp32>} : vector<8x32xf32>, vector<32x32xf32>, vector<8x32xf32> -> vector<8x32xf32>
    %176 = arith.addf %175, %43 : vector<8x32xf32>
    %177 = vector.extract_strided_slice %20 {offsets = [32, 0], sizes = [8, 32], strides = [1, 1]} : vector<64x32xf32> to vector<8x32xf32>
    %178 = arith.addf %177, %173 : vector<8x32xf32>
    %cst_88 = arith.constant 5.000000e-01 : f32
    %179 = vector.broadcast %cst_88 : f32 to vector<8x32xf32>
    %180 = arith.mulf %179, %178 : vector<8x32xf32>
    %181 = math.tanh %180 : vector<8x32xf32>
    %cst_89 = arith.constant 5.000000e-01 : f32
    %182 = vector.broadcast %cst_89 : f32 to vector<8x32xf32>
    %183 = arith.mulf %182, %181 : vector<8x32xf32>
    %cst_90 = arith.constant 5.000000e-01 : f32
    %184 = vector.broadcast %cst_90 : f32 to vector<8x32xf32>
    %185 = arith.addf %183, %184 : vector<8x32xf32>
    %186 = vector.extract_strided_slice %27 {offsets = [32, 0], sizes = [8, 32], strides = [1, 1]} : vector<64x32xf32> to vector<8x32xf32>
    %187 = arith.addf %186, %174 : vector<8x32xf32>
    %cst_91 = arith.constant 5.000000e-01 : f32
    %188 = vector.broadcast %cst_91 : f32 to vector<8x32xf32>
    %189 = arith.mulf %188, %187 : vector<8x32xf32>
    %190 = math.tanh %189 : vector<8x32xf32>
    %cst_92 = arith.constant 5.000000e-01 : f32
    %191 = vector.broadcast %cst_92 : f32 to vector<8x32xf32>
    %192 = arith.mulf %191, %190 : vector<8x32xf32>
    %cst_93 = arith.constant 5.000000e-01 : f32
    %193 = vector.broadcast %cst_93 : f32 to vector<8x32xf32>
    %194 = arith.addf %192, %193 : vector<8x32xf32>
    %195 = vector.extract_strided_slice %34 {offsets = [32, 0], sizes = [8, 32], strides = [1, 1]} : vector<64x32xf32> to vector<8x32xf32>
    %196 = arith.mulf %185, %176 : vector<8x32xf32>
    %197 = arith.addf %195, %196 : vector<8x32xf32>
    %198 = math.tanh %197 : vector<8x32xf32>
    %cst_94 = arith.constant 1.000000e+00 : f32
    %199 = vector.broadcast %cst_94 : f32 to vector<8x32xf32>
    %200 = arith.subf %199, %194 : vector<8x32xf32>
    %201 = arith.mulf %200, %198 : vector<8x32xf32>
    %202 = arith.mulf %194, %171 : vector<8x32xf32>
    %203 = arith.addf %201, %202 : vector<8x32xf32>
    %c32 = arith.constant 32 : index
    %c0_95 = arith.constant 0 : index
    %204 = vector.load %arg6[%c32, %c0_95] : memref<64x32xf32, #tpu.memory_space<vmem>>, vector<8x32xf32>
    tpu.vector_store %arg6[%c32, %c0_95], %203 {strides = array<i32>} : memref<64x32xf32, #tpu.memory_space<vmem>>, vector<8x32xf32>,
    %cst_96 = arith.constant dense<0.000000e+00> : vector<8x32xf32>
    %205 = tpu.matmul %203, %36, %cst_96 {dimension_numbers = #tpu.dot_dimension_numbers<[1], [0], [0], [1], [0, 0, 1, 1], [], []>, precision = #tpu.contract_precision<fp32>} : vector<8x32xf32>, vector<32x32xf32>, vector<8x32xf32> -> vector<8x32xf32>
    %cst_97 = arith.constant dense<0.000000e+00> : vector<8x32xf32>
    %206 = tpu.matmul %203, %38, %cst_97 {dimension_numbers = #tpu.dot_dimension_numbers<[1], [0], [0], [1], [0, 0, 1, 1], [], []>, precision = #tpu.contract_precision<fp32>} : vector<8x32xf32>, vector<32x32xf32>, vector<8x32xf32> -> vector<8x32xf32>
    %cst_98 = arith.constant dense<0.000000e+00> : vector<8x32xf32>
    %207 = tpu.matmul %203, %40, %cst_98 {dimension_numbers = #tpu.dot_dimension_numbers<[1], [0], [0], [1], [0, 0, 1, 1], [], []>, precision = #tpu.contract_precision<fp32>} : vector<8x32xf32>, vector<32x32xf32>, vector<8x32xf32> -> vector<8x32xf32>
    %208 = arith.addf %207, %43 : vector<8x32xf32>
    %209 = vector.extract_strided_slice %20 {offsets = [40, 0], sizes = [8, 32], strides = [1, 1]} : vector<64x32xf32> to vector<8x32xf32>
    %210 = arith.addf %209, %205 : vector<8x32xf32>
    %cst_99 = arith.constant 5.000000e-01 : f32
    %211 = vector.broadcast %cst_99 : f32 to vector<8x32xf32>
    %212 = arith.mulf %211, %210 : vector<8x32xf32>
    %213 = math.tanh %212 : vector<8x32xf32>
    %cst_100 = arith.constant 5.000000e-01 : f32
    %214 = vector.broadcast %cst_100 : f32 to vector<8x32xf32>
    %215 = arith.mulf %214, %213 : vector<8x32xf32>
    %cst_101 = arith.constant 5.000000e-01 : f32
    %216 = vector.broadcast %cst_101 : f32 to vector<8x32xf32>
    %217 = arith.addf %215, %216 : vector<8x32xf32>
    %218 = vector.extract_strided_slice %27 {offsets = [40, 0], sizes = [8, 32], strides = [1, 1]} : vector<64x32xf32> to vector<8x32xf32>
    %219 = arith.addf %218, %206 : vector<8x32xf32>
    %cst_102 = arith.constant 5.000000e-01 : f32
    %220 = vector.broadcast %cst_102 : f32 to vector<8x32xf32>
    %221 = arith.mulf %220, %219 : vector<8x32xf32>
    %222 = math.tanh %221 : vector<8x32xf32>
    %cst_103 = arith.constant 5.000000e-01 : f32
    %223 = vector.broadcast %cst_103 : f32 to vector<8x32xf32>
    %224 = arith.mulf %223, %222 : vector<8x32xf32>
    %cst_104 = arith.constant 5.000000e-01 : f32
    %225 = vector.broadcast %cst_104 : f32 to vector<8x32xf32>
    %226 = arith.addf %224, %225 : vector<8x32xf32>
    %227 = vector.extract_strided_slice %34 {offsets = [40, 0], sizes = [8, 32], strides = [1, 1]} : vector<64x32xf32> to vector<8x32xf32>
    %228 = arith.mulf %217, %208 : vector<8x32xf32>
    %229 = arith.addf %227, %228 : vector<8x32xf32>
    %230 = math.tanh %229 : vector<8x32xf32>
    %cst_105 = arith.constant 1.000000e+00 : f32
    %231 = vector.broadcast %cst_105 : f32 to vector<8x32xf32>
    %232 = arith.subf %231, %226 : vector<8x32xf32>
    %233 = arith.mulf %232, %230 : vector<8x32xf32>
    %234 = arith.mulf %226, %203 : vector<8x32xf32>
    %235 = arith.addf %233, %234 : vector<8x32xf32>
    %c40 = arith.constant 40 : index
    %c0_106 = arith.constant 0 : index
    %236 = vector.load %arg6[%c40, %c0_106] : memref<64x32xf32, #tpu.memory_space<vmem>>, vector<8x32xf32>
    tpu.vector_store %arg6[%c40, %c0_106], %235 {strides = array<i32>} : memref<64x32xf32, #tpu.memory_space<vmem>>, vector<8x32xf32>,
    %cst_107 = arith.constant dense<0.000000e+00> : vector<8x32xf32>
    %237 = tpu.matmul %235, %36, %cst_107 {dimension_numbers = #tpu.dot_dimension_numbers<[1], [0], [0], [1], [0, 0, 1, 1], [], []>, precision = #tpu.contract_precision<fp32>} : vector<8x32xf32>, vector<32x32xf32>, vector<8x32xf32> -> vector<8x32xf32>
    %cst_108 = arith.constant dense<0.000000e+00> : vector<8x32xf32>
    %238 = tpu.matmul %235, %38, %cst_108 {dimension_numbers = #tpu.dot_dimension_numbers<[1], [0], [0], [1], [0, 0, 1, 1], [], []>, precision = #tpu.contract_precision<fp32>} : vector<8x32xf32>, vector<32x32xf32>, vector<8x32xf32> -> vector<8x32xf32>
    %cst_109 = arith.constant dense<0.000000e+00> : vector<8x32xf32>
    %239 = tpu.matmul %235, %40, %cst_109 {dimension_numbers = #tpu.dot_dimension_numbers<[1], [0], [0], [1], [0, 0, 1, 1], [], []>, precision = #tpu.contract_precision<fp32>} : vector<8x32xf32>, vector<32x32xf32>, vector<8x32xf32> -> vector<8x32xf32>
    %240 = arith.addf %239, %43 : vector<8x32xf32>
    %241 = vector.extract_strided_slice %20 {offsets = [48, 0], sizes = [8, 32], strides = [1, 1]} : vector<64x32xf32> to vector<8x32xf32>
    %242 = arith.addf %241, %237 : vector<8x32xf32>
    %cst_110 = arith.constant 5.000000e-01 : f32
    %243 = vector.broadcast %cst_110 : f32 to vector<8x32xf32>
    %244 = arith.mulf %243, %242 : vector<8x32xf32>
    %245 = math.tanh %244 : vector<8x32xf32>
    %cst_111 = arith.constant 5.000000e-01 : f32
    %246 = vector.broadcast %cst_111 : f32 to vector<8x32xf32>
    %247 = arith.mulf %246, %245 : vector<8x32xf32>
    %cst_112 = arith.constant 5.000000e-01 : f32
    %248 = vector.broadcast %cst_112 : f32 to vector<8x32xf32>
    %249 = arith.addf %247, %248 : vector<8x32xf32>
    %250 = vector.extract_strided_slice %27 {offsets = [48, 0], sizes = [8, 32], strides = [1, 1]} : vector<64x32xf32> to vector<8x32xf32>
    %251 = arith.addf %250, %238 : vector<8x32xf32>
    %cst_113 = arith.constant 5.000000e-01 : f32
    %252 = vector.broadcast %cst_113 : f32 to vector<8x32xf32>
    %253 = arith.mulf %252, %251 : vector<8x32xf32>
    %254 = math.tanh %253 : vector<8x32xf32>
    %cst_114 = arith.constant 5.000000e-01 : f32
    %255 = vector.broadcast %cst_114 : f32 to vector<8x32xf32>
    %256 = arith.mulf %255, %254 : vector<8x32xf32>
    %cst_115 = arith.constant 5.000000e-01 : f32
    %257 = vector.broadcast %cst_115 : f32 to vector<8x32xf32>
    %258 = arith.addf %256, %257 : vector<8x32xf32>
    %259 = vector.extract_strided_slice %34 {offsets = [48, 0], sizes = [8, 32], strides = [1, 1]} : vector<64x32xf32> to vector<8x32xf32>
    %260 = arith.mulf %249, %240 : vector<8x32xf32>
    %261 = arith.addf %259, %260 : vector<8x32xf32>
    %262 = math.tanh %261 : vector<8x32xf32>
    %cst_116 = arith.constant 1.000000e+00 : f32
    %263 = vector.broadcast %cst_116 : f32 to vector<8x32xf32>
    %264 = arith.subf %263, %258 : vector<8x32xf32>
    %265 = arith.mulf %264, %262 : vector<8x32xf32>
    %266 = arith.mulf %258, %235 : vector<8x32xf32>
    %267 = arith.addf %265, %266 : vector<8x32xf32>
    %c48 = arith.constant 48 : index
    %c0_117 = arith.constant 0 : index
    %268 = vector.load %arg6[%c48, %c0_117] : memref<64x32xf32, #tpu.memory_space<vmem>>, vector<8x32xf32>
    tpu.vector_store %arg6[%c48, %c0_117], %267 {strides = array<i32>} : memref<64x32xf32, #tpu.memory_space<vmem>>, vector<8x32xf32>,
    %cst_118 = arith.constant dense<0.000000e+00> : vector<8x32xf32>
    %269 = tpu.matmul %267, %36, %cst_118 {dimension_numbers = #tpu.dot_dimension_numbers<[1], [0], [0], [1], [0, 0, 1, 1], [], []>, precision = #tpu.contract_precision<fp32>} : vector<8x32xf32>, vector<32x32xf32>, vector<8x32xf32> -> vector<8x32xf32>
    %cst_119 = arith.constant dense<0.000000e+00> : vector<8x32xf32>
    %270 = tpu.matmul %267, %38, %cst_119 {dimension_numbers = #tpu.dot_dimension_numbers<[1], [0], [0], [1], [0, 0, 1, 1], [], []>, precision = #tpu.contract_precision<fp32>} : vector<8x32xf32>, vector<32x32xf32>, vector<8x32xf32> -> vector<8x32xf32>
    %cst_120 = arith.constant dense<0.000000e+00> : vector<8x32xf32>
    %271 = tpu.matmul %267, %40, %cst_120 {dimension_numbers = #tpu.dot_dimension_numbers<[1], [0], [0], [1], [0, 0, 1, 1], [], []>, precision = #tpu.contract_precision<fp32>} : vector<8x32xf32>, vector<32x32xf32>, vector<8x32xf32> -> vector<8x32xf32>
    %272 = arith.addf %271, %43 : vector<8x32xf32>
    %273 = vector.extract_strided_slice %20 {offsets = [56, 0], sizes = [8, 32], strides = [1, 1]} : vector<64x32xf32> to vector<8x32xf32>
    %274 = arith.addf %273, %269 : vector<8x32xf32>
    %cst_121 = arith.constant 5.000000e-01 : f32
    %275 = vector.broadcast %cst_121 : f32 to vector<8x32xf32>
    %276 = arith.mulf %275, %274 : vector<8x32xf32>
    %277 = math.tanh %276 : vector<8x32xf32>
    %cst_122 = arith.constant 5.000000e-01 : f32
    %278 = vector.broadcast %cst_122 : f32 to vector<8x32xf32>
    %279 = arith.mulf %278, %277 : vector<8x32xf32>
    %cst_123 = arith.constant 5.000000e-01 : f32
    %280 = vector.broadcast %cst_123 : f32 to vector<8x32xf32>
    %281 = arith.addf %279, %280 : vector<8x32xf32>
    %282 = vector.extract_strided_slice %27 {offsets = [56, 0], sizes = [8, 32], strides = [1, 1]} : vector<64x32xf32> to vector<8x32xf32>
    %283 = arith.addf %282, %270 : vector<8x32xf32>
    %cst_124 = arith.constant 5.000000e-01 : f32
    %284 = vector.broadcast %cst_124 : f32 to vector<8x32xf32>
    %285 = arith.mulf %284, %283 : vector<8x32xf32>
    %286 = math.tanh %285 : vector<8x32xf32>
    %cst_125 = arith.constant 5.000000e-01 : f32
    %287 = vector.broadcast %cst_125 : f32 to vector<8x32xf32>
    %288 = arith.mulf %287, %286 : vector<8x32xf32>
    %cst_126 = arith.constant 5.000000e-01 : f32
    %289 = vector.broadcast %cst_126 : f32 to vector<8x32xf32>
    %290 = arith.addf %288, %289 : vector<8x32xf32>
    %291 = vector.extract_strided_slice %34 {offsets = [56, 0], sizes = [8, 32], strides = [1, 1]} : vector<64x32xf32> to vector<8x32xf32>
    %292 = arith.mulf %281, %272 : vector<8x32xf32>
    %293 = arith.addf %291, %292 : vector<8x32xf32>
    %294 = math.tanh %293 : vector<8x32xf32>
    %cst_127 = arith.constant 1.000000e+00 : f32
    %295 = vector.broadcast %cst_127 : f32 to vector<8x32xf32>
    %296 = arith.subf %295, %290 : vector<8x32xf32>
    %297 = arith.mulf %296, %294 : vector<8x32xf32>
    %298 = arith.mulf %290, %267 : vector<8x32xf32>
    %299 = arith.addf %297, %298 : vector<8x32xf32>
    %c56 = arith.constant 56 : index
    %c0_128 = arith.constant 0 : index
    %300 = vector.load %arg6[%c56, %c0_128] : memref<64x32xf32, #tpu.memory_space<vmem>>, vector<8x32xf32>
    tpu.vector_store %arg6[%c56, %c0_128], %299 {strides = array<i32>} : memref<64x32xf32, #tpu.memory_space<vmem>>, vector<8x32xf32>,
    return
  }
}

</mosaic_0001>

<bundles_post_ra>
// kernel: encoder_rnn_forward.1
= control target key start
LH: loop header
LB: loop body
LE: loop exit
PB: predicated region body
PF: predicated region fallthrough
CT: control target
= control target key end

     0   :  { %11 = vsyncpa [#allocation3], 0  ;;  %s21594_s21 = smov [#allocation2]   ;;  %s23979_s0 = inlined_call_operand.vmem [shape: s32[64,1], index: 0, kind: input, shape index: {}]   ;;  %s23980_s1 = inlined_call_operand.vmem [shape: s32[64,1], index: 1, kind: input, shape index: {}]   ;;  %s23981_s2 = inlined_call_operand.vmem [shape: f32[3,16,32], index: 2, kind: input, shape index: {}]   ;;  %s23982_s3 = inlined_call_operand.hbm [shape: f32[3,16,32], index: 3, kind: input, shape index: {}]   ;;  %s23983_s4 = inlined_call_operand.vmem [shape: f32[3,32,32], index: 4, kind: input, shape index: {}]   ;;  %s23984_s5 = inlined_call_operand.vmem [shape: f32[1,32], index: 5, kind: input, shape index: {}]   ;;  %s23985_s6 = inlined_call_operand.vmem [shape: f32[64,32], index: 6, kind: output, shape index: {}]  }
   0x1   :  { %s23_s22 = sshll.u32 %s21594_s21, 4  ;;  %s21570_s25 = scalar_lea.hbm %s23982_s3, 768  ;;  %s24_s22 = int_to_ptr.vmem [resolvable:$true] %s23_s22 }
   0x2   :  { %p21571_p0 = scmp.ne.s32.totalorder %s23982_s3, %s21570_s25  ;;  %p21574_p1 = scmp.lt.u32.totalorder %s21570_s25, %s23982_s3 }
   0x4   :  { %p21576_p2 = pnand %p21574_p1, %p21571_p0 }
   0x6   :  { %21579 = shalt.err (!%p21576_p2)
}
   0x7   :  { %s21580_s30 = scalar_lea.vmem %s24_s22, 768  ;;  %p21585_p4 = scmp.lt.s32.totalorder %s24_s22, %s24_s22 }
   0x8   :  { %p21581_p3 = scmp.ne.s32.totalorder %s24_s22, %s21580_s30  ;;  %p21586_p5 = scmp.lt.s32.totalorder %s21580_s30, %s21580_s30 }
   0xa   :  { %p21587_p6 = por %p21586_p5, %p21585_p4 }
   0xc   :  { %p21588_p7 = pnand %p21587_p6, %p21581_p3 }
   0xe   :  { %21591 = shalt.err (!%p21588_p7)
}
   0xf   :  { %s21595_s7 = smov 128   ;;  %s21596_s8 = smov 8  }
  0x10   :  { %29 = dma.hbm_to_vmem [thread:$0]  %s23982_s3, 768, %s24_s22, [#allocation3], %s21595_s7, %s21595_s7, %s21596_s8  }
  0x11   :  { %21592 = dma.done.wait [#allocation3], 768  }
  0x12   :  { %21593 = vsyncadd [#allocation3], 4294966528  ;;  %v21597_v0 = vmov 0   ;;  %v47_v1 = vld [vmem:[%s23980_s1 + $0x10] sm:$0xff]  ;;  %v45_v2 = vld [vmem:[%s23980_s1] sm:$0xff]  ;;  %v53_v49 = vlaneseq  ;;  %vm139_vm0 = vcmask 130048  }
  0x13   :  { %21520 = vset.pattern.permute.xlu1 %v21597_v0  ;;  %21519 = vset.pattern.permute.xlu0 %v21597_v0  ;;  %v48_v3 = vld [vmem:[%s23980_s1 + $0x18] sm:$0xff]  ;;  %v46_v4 = vld [vmem:[%s23980_s1 + $0x8] sm:$0xff]  ;;  %v49_v6 = vld [vmem:[%s23980_s1 + $0x20] sm:$0xff]  ;;  %v23987_v53 = vmov 0.0  }
  0x14   :  { %102 = vperm.xlu1 %21520, %v47_v1   ;;  %96 = vperm.xlu0 %21519, %v45_v2   ;;  %v50_v5 = vld [vmem:[%s23980_s1 + $0x28] sm:$0xff]  ;;  %v137_v7 = vld [vmem:[#allocation2] sm:$0xff]  ;;  %v1712_v9 = vld [vmem:[#allocation2 + $0x10] sm:$0xff]  ;;  %v21718_v50 = vand.u32 127, %v53_v49 }
  0x15   :  { %v138_v8 = vld [vmem:[#allocation2 + $0x8] sm:$0xff]  ;;  %v165_v10 = vand.u32 4294901760, %v137_v7  ;;  %v1713_v12 = vld [vmem:[#allocation2 + $0x18] sm:$0xff]  ;;  %v1715_v13 = vand.u32 4294901760, %v1712_v9  ;;  %v51_v16 = vld [vmem:[%s23980_s1 + $0x30] sm:$0xff] }
  0x16   :  { %v168_v11 = vand.u32 4294901760, %v138_v8  ;;  %v1718_v14 = vand.u32 4294901760, %v1713_v12  ;;  %v52_v15 = vld [vmem:[%s23980_s1 + $0x38] sm:$0xff]  ;;  %v38_v19 = vld [vmem:[%s23979_s0 + $0x8] sm:$0xff]  ;;  %v37_v20 = vld [vmem:[%s23979_s0] sm:$0xff] }
  0x17   :  { %v313_v21 = vsub.f32 %v137_v7, %v165_v10  ;;  %v40_v23 = vld [vmem:[%s23979_s0 + $0x18] sm:$0xff]  ;;  %v39_v24 = vld [vmem:[%s23979_s0 + $0x10] sm:$0xff]  ;;  %v1863_v27 = vsub.f32 %v1712_v9, %v1715_v13  ;;  %v42_v33 = vld [vmem:[%s23979_s0 + $0x28] sm:$0xff] }
  0x18   :  { %105 = vperm.xlu1 %21520, %v48_v3   ;;  %99 = vperm.xlu0 %21519, %v46_v4   ;;  %v21672_v17 = vpack.c.bf16 %v168_v11, %v165_v10  ;;  %v21674_v18 = vpack.c.bf16 %v1718_v14, %v1715_v13  ;;  %v320_v22 = vsub.f32 %v138_v8, %v168_v11  ;;  %v41_v34 = vld [vmem:[%s23979_s0 + $0x20] sm:$0xff]  ;;  %v44_v42 = vld [vmem:[%s23979_s0 + $0x38] sm:$0xff]  ;;  %v43_v43 = vld [vmem:[%s23979_s0 + $0x30] sm:$0xff] }
  0x19   :  { %v314_v25 = vand.u32 4294901760, %v313_v21  ;;  %v1870_v28 = vsub.f32 %v1713_v12, %v1718_v14  ;;  %v1864_v31 = vand.u32 4294901760, %v1863_v27 }
  0x1a   :  { %19993 = vmatprep.subr.bf16.mxu0 %v21672_v17  ;;  %20041 = vmatprep.subr.bf16.mxu1 %v21674_v18  ;;  %v321_v26 = vand.u32 4294901760, %v320_v22  ;;  %v21710_v45 = vpack.c.bf16 %v320_v22, %v313_v21 }
  0x1b   :  { %19995 = vmatpush3.bf16.msra.mxu0 %v21672_v17  ;;  %20043 = vmatpush3.bf16.msra.mxu1 %v21674_v18  ;;  %v315_v29 = vsub.f32 %v313_v21, %v314_v25  ;;  %v1871_v32 = vand.u32 4294901760, %v1870_v28  ;;  %v1865_v37 = vsub.f32 %v1863_v27, %v1864_v31  ;;  %v21712_v46 = vpack.c.bf16 %v1870_v28, %v1863_v27 }
  0x1c   :  { %111 = vperm.xlu1 %21520, %v50_v5   ;;  %108 = vperm.xlu0 %21519, %v49_v6   ;;  %v322_v30 = vsub.f32 %v320_v22, %v321_v26  ;;  %v21714_v47 = vpack.c.bf16 %v321_v26, %v314_v25 }
  0x1d   :  { %v316_v35 = vand.u32 4294901760, %v315_v29  ;;  %v1872_v38 = vsub.f32 %v1870_v28, %v1871_v32  ;;  %v1866_v40 = vand.u32 4294901760, %v1865_v37  ;;  %v21716_v48 = vpack.c.bf16 %v1871_v32, %v1864_v31 }
  0x1e   :  { %v323_v36 = vand.u32 4294901760, %v322_v30 }
  0x1f   :  { %v1873_v41 = vand.u32 4294901760, %v1872_v38 }
  0x20   :  { %117 = vperm.xlu1 %21520, %v52_v15   ;;  %114 = vperm.xlu0 %21519, %v51_v16   ;;  %v21698_v39 = vpack.c.bf16 %v323_v36, %v316_v35 }
  0x21   :  { %v21707_v44 = vpack.c.bf16 %v1873_v41, %v1866_v40 }
  0x22   :  { %19997 = vmatprep.subr.bf16.mxu0 %v21698_v39 }
  0x23   :  { %20045 = vmatprep.subr.bf16.mxu1 %v21707_v44 }
  0x24   :  { %59 = vperm.xlu1 %21520, %v38_v19   ;;  %56 = vperm.xlu0 %21519, %v37_v20  }
  0x28   :  { %65 = vperm.xlu1 %21520, %v40_v23   ;;  %62 = vperm.xlu0 %21519, %v39_v24  }
  0x2c   :  { %71 = vperm.xlu1 %21520, %v42_v33   ;;  %68 = vperm.xlu0 %21519, %v41_v34  }
  0x30   :  { %77 = vperm.xlu1 %21520, %v44_v42   ;;  %74 = vperm.xlu0 %21519, %v43_v43  }
  0x93   :  { %v103_v51 = vpop.permute.xlu1 %102  ;;  %v97_v52 = vpop.permute.xlu0 %96 }
  0x94   :  { %vm121_vm1 = vcmp.eq.s32.totalorder %v103_v51, %v21718_v50  ;;  %vm119_vm2 = vcmp.eq.s32.totalorder %v97_v52, %v21718_v50 }
  0x95   :  { %v21723_v54 = vsel %vm121_vm1, 1.0, %v23987_v53  ;;  %v21726_v55 = vsel %vm119_vm2, 1.0, %v23987_v53  ;;  %vm21600_vm2 = vmmov 0  }
  0x96   :  { %v141_v56 = vsel %vm139_vm0, %v21726_v55, 0  ;;  %v147_v57 = vsel %vm139_vm0, %v21723_v54, 0 }
  0x97   :  { %v106_v58 = vpop.permute.xlu1 %105  ;;  %v100_v59 = vpop.permute.xlu0 %99  ;;  %v21732_v60 = vsub.f32 %v141_v56, %v141_v56  ;;  %v21734_v61 = vsub.f32 %v147_v57, %v147_v57 }
  0x98   :  { %vm122_vm3 = vcmp.eq.s32.totalorder %v106_v58, %v21718_v50  ;;  %vm120_vm4 = vcmp.eq.s32.totalorder %v100_v59, %v21718_v50 }
  0x99   :  { %v21739_v62 = vsel %vm122_vm3, 1.0, %v23987_v53  ;;  %v21742_v63 = vsel %vm120_vm4, 1.0, %v23987_v53  ;;  %v21745_v0 = vand.u32 4294901760, %v21732_v60  ;;  %v21750_v2 = vand.u32 4294901760, %v21734_v61 }
  0x9a   :  { %v144_v1 = vsel %vm139_vm0, %v21742_v63, 0  ;;  %v150_v3 = vsel %vm139_vm0, %v21739_v62, 0 }
  0x9b   :  { %24022 = vst [vmem:[#allocation5_spill] sm:$0xff] %v21745_v0  ;;  %24023 = vst [vmem:[#allocation6_spill] sm:$0xff] %v21750_v2  ;;  %v112_v4 = vpop.permute.xlu1 %111  ;;  %v109_v5 = vpop.permute.xlu0 %108  ;;  %v234_v6 = vsub.f32 %v21732_v60, %v21745_v0  ;;  %v21756_v7 = vsub.f32 %v144_v1, %v144_v1  ;;  %v21758_v8 = vsub.f32 %v150_v3, %v150_v3 }
  0x9c   :  { %vm124_vm5 = vcmp.eq.s32.totalorder %v112_v4, %v21718_v50  ;;  %vm123_vm6 = vcmp.eq.s32.totalorder %v109_v5, %v21718_v50  ;;  %v254_v13 = vsub.f32 %v21734_v61, %v21750_v2 }
  0x9d   :  { %v21763_v9 = vsel %vm124_vm5, 1.0, %v23987_v53  ;;  %v21766_v10 = vsel %vm123_vm6, 1.0, %v23987_v53  ;;  %v21768_v11 = vand.u32 4294901760, %v234_v6  ;;  %v21771_v12 = vand.u32 4294901760, %v21756_v7 }
  0x9e   :  { %v21776_v14 = vand.u32 4294901760, %v21758_v8  ;;  %v153_v15 = vsel %vm139_vm0, %v21766_v10, 0  ;;  %v156_v16 = vsel %vm139_vm0, %v21763_v9, 0  ;;  %v21805_v29 = vand.u32 4294901760, %v254_v13 }
  0x9f   :  { %24024 = vst [vmem:[#allocation7_spill] sm:$0xff] %v21771_v12  ;;  %v118_v19 = vpop.permute.xlu1 %117  ;;  %17836 = vmatprep.mubr.f32.mxu0 %v21768_v11  ;;  %18028 = vmatprep.mubr.f32.mxu1 %v21768_v11  ;;  %v115_v20 = vpop.permute.xlu0 %114  ;;  %v244_v21 = vsub.f32 %v21756_v7, %v21771_v12  ;;  %v21786_v22 = vsub.f32 %v153_v15, %v153_v15 }
  0xa0   :  { %24025 = vst [vmem:[#allocation8_spill] sm:$0xff] %v21776_v14  ;;  %v21788_v23 = vsub.f32 %v156_v16, %v156_v16  ;;  %vm126_vm7 = vcmp.eq.s32.totalorder %v118_v19, %v21718_v50  ;;  %vm125_vm8 = vcmp.eq.s32.totalorder %v115_v20, %v21718_v50  ;;  %v264_v24 = vsub.f32 %v21758_v8, %v21776_v14 }
  0xa1   :  { %v21795_v25 = vsel %vm126_vm7, 1.0, %v23987_v53  ;;  %v21798_v26 = vsel %vm125_vm8, 1.0, %v23987_v53  ;;  %v21800_v27 = vand.u32 4294901760, %v244_v21  ;;  %v21803_v28 = vand.u32 4294901760, %v21786_v22 }
  0xa2   :  { %v21808_v30 = vand.u32 4294901760, %v21788_v23  ;;  %v159_v31 = vsel %vm139_vm0, %v21798_v26, 0  ;;  %v162_v32 = vsel %vm139_vm0, %v21795_v25, 0  ;;  %v21825_v36 = vand.u32 4294901760, %v264_v24 }
  0xa3   :  { %24026 = vst [vmem:[#allocation9_spill] sm:$0xff] %v21803_v28  ;;  %17837 = vmatmul.mubr.f32.vlgmr.msra.gmra.mrb[0].mxu0 %v21800_v27  ;;  %18029 = vmatmul.mubr.f32.vlgmr.msra.gmra.mrb[0].mxu1 %v21800_v27  ;;  %v274_v33 = vsub.f32 %v21786_v22, %v21803_v28  ;;  %v21818_v34 = vsub.f32 %v159_v31, %v159_v31  ;;  %v57_v58 = vpop.permute.xlu0 %56  ;;  %v60_v13 = vpop.permute.xlu1 %59 }
  0xa4   :  { %24027 = vst [vmem:[#allocation10_spill] sm:$0xff] %v21808_v30  ;;  %v21820_v35 = vsub.f32 %v162_v32, %v162_v32  ;;  %17839 = vmatprep.mubr.f32.mxu0 %v21805_v29  ;;  %19999 = vmatpush3.bf16.msra.mxu0 %v21698_v39  ;;  %v284_v38 = vsub.f32 %v21788_v23, %v21808_v30 }
  0xa5   :  { %18031 = vmatprep.mubr.f32.mxu1 %v21805_v29  ;;  %v21827_v37 = vand.u32 4294901760, %v274_v33  ;;  %v21832_v40 = vand.u32 4294901760, %v21818_v34  ;;  %20047 = vmatpush3.bf16.msra.mxu1 %v21707_v44  ;;  %vm79_vm9 = vcmp.eq.s32.totalorder %v57_v58, %v21718_v50  ;;  %vm80_vm10 = vcmp.eq.s32.totalorder %v60_v13, %v21718_v50 }
  0xa6   :  { %24028 = vst [vmem:[#allocation11_spill] sm:$0xff] %v21820_v35  ;;  %v21836_v41 = vand.u32 4294901760, %v21820_v35  ;;  %20001 = vmatprep.subr.bf16.mxu0 %v21710_v45  ;;  %20049 = vmatprep.subr.bf16.mxu1 %v21712_v46  ;;  %v21846_v42 = vand.u32 4294901760, %v284_v38  ;;  %v22002_v33 = vsel %vm79_vm9, 1.0, %v23987_v53 }
  0xa7   :  { %24029 = vst [vmem:[#allocation12_spill] sm:$0xff] %v21832_v40  ;;  %17840 = vmatmul.mubr.f32.gmra.mrb[2].mxu0 %v21825_v36  ;;  %18032 = vmatmul.mubr.f32.gmra.mrb[2].mxu1 %v21825_v36  ;;  %v294_v39 = vsub.f32 %v21818_v34, %v21832_v40  ;;  %v63_v16 = vpop.permute.xlu0 %62 }
  0xa8   :  { %24030 = vst [vmem:[#allocation13_spill] sm:$0xff] %v21836_v41  ;;  %17842 = vmatprep.mubr.f32.mxu0 %v21827_v37  ;;  %18034 = vmatprep.mubr.f32.mxu1 %v21827_v37  ;;  %v304_v44 = vsub.f32 %v21820_v35, %v21836_v41  ;;  %vm81_vm11 = vcmp.eq.s32.totalorder %v63_v16, %v21718_v50 }
  0xa9   :  { %v21848_v43 = vand.u32 4294901760, %v294_v39 }
  0xaa   :  { %v21856_v49 = vand.u32 4294901760, %v304_v44  ;;  %v925_v44 = vsel %vm139_vm0, %v22002_v33, 0 }
  0xab   :  { %17843 = vmatmul.mubr.f32.gmra.mrb[4].mxu0 %v21846_v42  ;;  %18035 = vmatmul.mubr.f32.gmra.mrb[4].mxu1 %v21846_v42  ;;  %v69_v38 = vpop.permute.xlu0 %68 }
  0xac   :  { %17845 = vmatprep.mubr.f32.mxu0 %v21848_v43  ;;  %18037 = vmatprep.mubr.f32.mxu1 %v21848_v43  ;;  %vm83_vm13 = vcmp.eq.s32.totalorder %v69_v38, %v21718_v50 }
  0xaf   :  { %17846 = vmatmul.mubr.f32.gmra.mrb[6].mxu0 %v21856_v49  ;;  %18038 = vmatmul.mubr.f32.gmra.mrb[6].mxu1 %v21856_v49 }
  0xb0   :  { %17852 = vmatprep.mubr.msk.f32.mxu0 %vm139_vm0, %v21726_v55  ;;  %18044 = vmatprep.mubr.msk.f32.mxu1 %vm139_vm0, %v21726_v55 }
  0xb3   :  { %17853 = vmatmul.mubr.msk.f32.vlgmr.msra.gmra.mrb[0].mxu0 %vm139_vm0, %v21742_v63  ;;  %18045 = vmatmul.mubr.msk.f32.vlgmr.msra.gmra.mrb[0].mxu1 %vm139_vm0, %v21742_v63 }
  0xb4   :  { %17855 = vmatprep.mubr.msk.f32.mxu0 %vm139_vm0, %v21723_v54  ;;  %20003 = vmatpush3.bf16.msra.mxu0 %v21710_v45  ;;  %v135_v45 = vld [vmem:[%s23981_s2] sm:$0xff] }
  0xb5   :  { %18047 = vmatprep.mubr.msk.f32.mxu1 %vm139_vm0, %v21723_v54  ;;  %20051 = vmatpush3.bf16.msra.mxu1 %v21712_v46  ;;  %v136_v46 = vld [vmem:[%s23981_s2 + $0x8] sm:$0xff]  ;;  %v949_v51 = vand.u32 4294901760, %v135_v45 }
  0xb6   :  { %20005 = vmatprep.subr.bf16.mxu0 %v21672_v17  ;;  %20053 = vmatprep.subr.bf16.mxu1 %v21674_v18  ;;  %v952_v52 = vand.u32 4294901760, %v136_v46 }
  0xb7   :  { %17856 = vmatmul.mubr.msk.f32.gmra.mrb[2].mxu0 %vm139_vm0, %v21739_v62  ;;  %18048 = vmatmul.mubr.msk.f32.gmra.mrb[2].mxu1 %vm139_vm0, %v21739_v62  ;;  %v21954_v1 = vsub.f32 %v135_v45, %v949_v51 }
  0xb8   :  { %17858 = vmatprep.mubr.msk.f32.mxu0 %vm139_vm0, %v21766_v10  ;;  %18050 = vmatprep.mubr.msk.f32.mxu1 %vm139_vm0, %v21766_v10  ;;  %v21952_v59 = vpack.c.bf16 %v952_v52, %v949_v51  ;;  %v21958_v4 = vsub.f32 %v136_v46, %v952_v52  ;;  %v22025_v52 = vsel %vm81_vm11, 1.0, %v23987_v53 }
  0xb9   :  { %v23991_v15 = vand.u32 4294901760, %v21954_v1 }
  0xba   :  { %v23990_v19 = vand.u32 4294901760, %v21958_v4 }
  0xbb   :  { %17859 = vmatmul.mubr.msk.f32.gmra.mrb[4].mxu0 %vm139_vm0, %v21763_v9  ;;  %18051 = vmatmul.mubr.msk.f32.gmra.mrb[4].mxu1 %vm139_vm0, %v21763_v9 }
  0xbc   :  { %17861 = vmatprep.mubr.msk.f32.mxu0 %vm139_vm0, %v21798_v26  ;;  %18053 = vmatprep.mubr.msk.f32.mxu1 %vm139_vm0, %v21798_v26  ;;  %v1106_v24 = vsub.f32 %v21958_v4, %v23990_v19 }
  0xbe   :  { %v1107_v45 = vand.u32 4294901760, %v1106_v24  ;;  %v22051_v24 = vsel %vm83_vm13, 1.0, %v23987_v53 }
  0xbf   :  { %17862 = vmatmul.mubr.msk.f32.gmra.mrb[6].mxu0 %vm139_vm0, %v21795_v25  ;;  %18054 = vmatmul.mubr.msk.f32.gmra.mrb[6].mxu1 %vm139_vm0, %v21795_v25 }
  0xc0   :  { %17868 = vmatprep.mubr.f32.mxu0 %v21732_v60  ;;  %18060 = vmatprep.mubr.f32.mxu1 %v21732_v60 }
  0xc3   :  { %17869 = vmatmul.mubr.f32.vlgmr.msra.gmra.mrb[0].mxu0 %v21756_v7  ;;  %18061 = vmatmul.mubr.f32.vlgmr.msra.gmra.mrb[0].mxu1 %v21756_v7 }
  0xc4   :  { %17871 = vmatprep.mubr.f32.mxu0 %v21734_v61  ;;  %20007 = vmatpush3.bf16.msra.mxu0 %v21672_v17 }
  0xc5   :  { %18063 = vmatprep.mubr.f32.mxu1 %v21734_v61  ;;  %20055 = vmatpush3.bf16.msra.mxu1 %v21674_v18 }
  0xc6   :  { %20009 = vmatprep.subr.bf16.mxu0 %v21714_v47  ;;  %20057 = vmatprep.subr.bf16.mxu1 %v21716_v48 }
  0xc7   :  { %17872 = vmatmul.mubr.f32.gmra.mrb[2].mxu0 %v21758_v8  ;;  %18064 = vmatmul.mubr.f32.gmra.mrb[2].mxu1 %v21758_v8 }
  0xc8   :  { %17874 = vmatprep.mubr.f32.mxu0 %v21786_v22  ;;  %18066 = vmatprep.mubr.f32.mxu1 %v21786_v22 }
  0xcb   :  { %17875 = vmatmul.mubr.f32.gmra.mrb[4].mxu0 %v21788_v23  ;;  %18067 = vmatmul.mubr.f32.gmra.mrb[4].mxu1 %v21788_v23 }
  0xcc   :  { %17877 = vmatprep.mubr.f32.mxu0 %v21818_v34  ;;  %18069 = vmatprep.mubr.f32.mxu1 %v21818_v34 }
  0xcf   :  { %17878 = vmatmul.mubr.f32.gmra.mrb[6].mxu0 %v21820_v35  ;;  %18070 = vmatmul.mubr.f32.gmra.mrb[6].mxu1 %v21820_v35 }
  0xd0   :  { %17884 = vmatprep.mubr.f32.mxu0 %v21745_v0  ;;  %18076 = vmatprep.mubr.f32.mxu1 %v21745_v0 }
  0xd3   :  { %17885 = vmatmul.mubr.f32.vlgmr.msra.gmra.mrb[0].mxu0 %v21771_v12  ;;  %18077 = vmatmul.mubr.f32.vlgmr.msra.gmra.mrb[0].mxu1 %v21771_v12 }
  0xd4   :  { %17887 = vmatprep.mubr.f32.mxu0 %v21750_v2  ;;  %20011 = vmatpush3.bf16.msra.mxu0 %v21714_v47  ;;  %v16643_v47 = vld [vmem:[%s23981_s2 + $0x10] sm:$0xff] }
  0xd5   :  { %18079 = vmatprep.mubr.f32.mxu1 %v21750_v2  ;;  %20059 = vmatpush3.bf16.msra.mxu1 %v21716_v48  ;;  %v16644_v48 = vld [vmem:[%s23981_s2 + $0x18] sm:$0xff]  ;;  %v2475_v56 = vand.u32 4294901760, %v16643_v47 }
  0xd6   :  { %20013 = vmatprep.subr.bf16.mxu0 %v21672_v17  ;;  %20061 = vmatprep.subr.bf16.mxu1 %v21674_v18  ;;  %v2478_v57 = vand.u32 4294901760, %v16644_v48 }
  0xd7   :  { %17888 = vmatmul.mubr.f32.gmra.mrb[2].mxu0 %v21776_v14  ;;  %18080 = vmatmul.mubr.f32.gmra.mrb[2].mxu1 %v21776_v14  ;;  %v21960_v5 = vsub.f32 %v16643_v47, %v2475_v56 }
  0xd8   :  { %17890 = vmatprep.mubr.f32.mxu0 %v21803_v28  ;;  %18082 = vmatprep.mubr.f32.mxu1 %v21803_v28  ;;  %v21956_v3 = vpack.c.bf16 %v2478_v57, %v2475_v56  ;;  %v21962_v6 = vsub.f32 %v16644_v48, %v2478_v57  ;;  %v22017_v48 = vsel %vm80_vm10, 1.0, %v23987_v53  ;;  %v22032_v56 = vsub.f32 %v925_v44, %v925_v44  ;;  %v75_v57 = vpop.permute.xlu0 %74 }
  0xd9   :  { %v23989_v20 = vand.u32 4294901760, %v21960_v5  ;;  %v928_v58 = vsel %vm139_vm0, %v22017_v48, 0  ;;  %vm85_vm15 = vcmp.eq.s32.totalorder %v75_v57, %v21718_v50 }
  0xda   :  { %v23986_v21 = vand.u32 4294901760, %v21962_v6  ;;  %v22063_v38 = vsub.f32 %v928_v58, %v928_v58 }
  0xdb   :  { %17891 = vmatmul.mubr.f32.gmra.mrb[4].mxu0 %v21808_v30  ;;  %18083 = vmatmul.mubr.f32.gmra.mrb[4].mxu1 %v21808_v30  ;;  %v2625_v31 = vsub.f32 %v21960_v5, %v23989_v20 }
  0xdc   :  { %17893 = vmatprep.mubr.f32.mxu0 %v21832_v40  ;;  %18085 = vmatprep.mubr.f32.mxu1 %v21832_v40  ;;  %v2632_v32 = vsub.f32 %v21962_v6, %v23986_v21  ;;  %v22091_v57 = vand.u32 4294901760, %v22063_v38 }
  0xdd   :  { %v2626_v46 = vand.u32 4294901760, %v2625_v31 }
  0xde   :  { %v2633_v47 = vand.u32 4294901760, %v2632_v32  ;;  %v22060_v32 = vand.u32 4294901760, %v22032_v56  ;;  %24032 = vst [vmem:[#allocation15_spill] sm:$0xff] %v22091_v57 }
  0xdf   :  { %17894 = vmatmul.mubr.f32.gmra.mrb[6].mxu0 %v21836_v41  ;;  %18086 = vmatmul.mubr.f32.gmra.mrb[6].mxu1 %v21836_v41 }
  0xe0   :  { %17900 = vmatprep.mubr.msk.f32.mxu0 %vm139_vm0, %v21726_v55  ;;  %18092 = vmatprep.mubr.msk.f32.mxu1 %vm139_vm0, %v21726_v55  ;;  %v22038_v16 = vpack.c.bf16 %v2633_v47, %v2626_v46  ;;  %24031 = vst [vmem:[#allocation14_spill] sm:$0xff] %v22060_v32  ;;  %v937_v46 = vsel %vm139_vm0, %v22051_v24, 0  ;;  %v22082_v47 = vsel %vm85_vm15, 1.0, %v23987_v53 }
  0xe3   :  { %17901 = vmatmul.mubr.msk.f32.vlgmr.msra.gmra.mrb[0].mxu0 %vm139_vm0, %v21742_v63  ;;  %18093 = vmatmul.mubr.msk.f32.vlgmr.msra.gmra.mrb[0].mxu1 %vm139_vm0, %v21742_v63 }
  0xe4   :  { %17903 = vmatprep.mubr.msk.f32.mxu0 %vm139_vm0, %v21723_v54  ;;  %20015 = vmatpush3.bf16.msra.mxu0 %v21672_v17  ;;  %v66_v17 = vpop.permute.xlu1 %65 }
  0xe5   :  { %18095 = vmatprep.mubr.msk.f32.mxu1 %vm139_vm0, %v21723_v54  ;;  %20063 = vmatpush3.bf16.msra.mxu1 %v21674_v18  ;;  %v1099_v18 = vsub.f32 %v21954_v1, %v23991_v15  ;;  %vm82_vm12 = vcmp.eq.s32.totalorder %v66_v17, %v21718_v50 }
  0xe6   :  { %20017 = vmatprep.subr.bf16.mxu0 %v21952_v59  ;;  %20065 = vmatprep.subr.bf16.mxu1 %v21956_v3  ;;  %v22041_v17 = vsel %vm82_vm12, 1.0, %v23987_v53 }
  0xe7   :  { %17904 = vmatmul.mubr.msk.f32.gmra.mrb[2].mxu0 %vm139_vm0, %v21739_v62  ;;  %18096 = vmatmul.mubr.msk.f32.gmra.mrb[2].mxu1 %vm139_vm0, %v21739_v62  ;;  %v1100_v39 = vand.u32 4294901760, %v1099_v18  ;;  %v931_v18 = vsel %vm139_vm0, %v22025_v52, 0  ;;  %v934_v44 = vsel %vm139_vm0, %v22041_v17, 0 }
  0xe8   :  { %17906 = vmatprep.mubr.msk.f32.mxu0 %vm139_vm0, %v21766_v10  ;;  %18098 = vmatprep.mubr.msk.f32.mxu1 %vm139_vm0, %v21766_v10  ;;  %v72_v51 = vpop.permute.xlu1 %71  ;;  %v22093_v58 = vsub.f32 %v934_v44, %v934_v44  ;;  %v943_v44 = vsel %vm139_vm0, %v22082_v47, 0 }
  0xe9   :  { %v22036_v13 = vpack.c.bf16 %v1107_v45, %v1100_v39  ;;  %vm84_vm14 = vcmp.eq.s32.totalorder %v72_v51, %v21718_v50  ;;  %v22066_v39 = vsub.f32 %v931_v18, %v931_v18  ;;  %v1018_v51 = vsub.f32 %v22032_v56, %v22060_v32 }
  0xea   :  { %v22072_v45 = vsel %vm84_vm14, 1.0, %v23987_v53  ;;  %v22120_v20 = vand.u32 4294901760, %v22093_v58  ;;  %v22129_v40 = vsub.f32 %v943_v44, %v943_v44 }
  0xeb   :  { %17907 = vmatmul.mubr.msk.f32.gmra.mrb[4].mxu0 %vm139_vm0, %v21763_v9  ;;  %18099 = vmatmul.mubr.msk.f32.gmra.mrb[4].mxu1 %vm139_vm0, %v21763_v9  ;;  %v22096_v18 = vand.u32 4294901760, %v22066_v39 }
  0xec   :  { %17909 = vmatprep.mubr.msk.f32.mxu0 %vm139_vm0, %v21798_v26  ;;  %18101 = vmatprep.mubr.msk.f32.mxu1 %vm139_vm0, %v21798_v26  ;;  %v78_v31 = vpop.permute.xlu1 %77  ;;  %24035 = vst [vmem:[#allocation18_spill] sm:$0xff] %v22120_v20  ;;  %v1048_v44 = vsub.f32 %v22093_v58, %v22120_v20 }
  0xed   :  { %vm86_vm1 = vcmp.eq.s32.totalorder %v78_v31, %v21718_v50  ;;  %24033 = vst [vmem:[#allocation16_spill] sm:$0xff] %v22096_v18  ;;  %v22098_v50 = vsub.f32 %v937_v46, %v937_v46  ;;  %v940_v31 = vsel %vm139_vm0, %v22072_v45, 0  ;;  %v22115_v46 = vand.u32 4294901760, %v1018_v51 }
  0xee   :  { %v22103_v21 = vsel %vm86_vm1, 1.0, %v23987_v53  ;;  %v1028_v53 = vsub.f32 %v22063_v38, %v22091_v57  ;;  %v22122_v19 = vsub.f32 %v940_v31, %v940_v31  ;;  %v1038_v15 = vsub.f32 %v22066_v39, %v22096_v18 }
  0xef   :  { %17910 = vmatmul.mubr.msk.f32.gmra.mrb[6].mxu0 %vm139_vm0, %v21795_v25  ;;  %18102 = vmatmul.mubr.msk.f32.gmra.mrb[6].mxu1 %vm139_vm0, %v21795_v25  ;;  %24034 = vst [vmem:[#allocation17_spill] sm:$0xff] %v22115_v46  ;;  %v22127_v41 = vand.u32 4294901760, %v22098_v50  ;;  %v946_v51 = vsel %vm139_vm0, %v22103_v21, 0  ;;  %v20024_v31 = vpack.c.bf16 %v21958_v4, %v21954_v1 }
  0xf0   :  { %17916 = vmatprep.mubr.msk.f32.mxu0 %vm139_vm0, %v21726_v55  ;;  %18108 = vmatprep.mubr.msk.f32.mxu1 %vm139_vm0, %v21726_v55  ;;  %v22141_v30 = vand.u32 4294901760, %v1028_v53  ;;  %v22146_v28 = vand.u32 4294901760, %v22122_v19  ;;  %v22148_v14 = vsub.f32 %v946_v51, %v946_v51  ;;  %v22150_v2 = vand.u32 4294901760, %v1038_v15 }
  0xf1   :  { %24036 = vst [vmem:[#allocation19_spill] sm:$0xff] %v22127_v41  ;;  %v1058_v12 = vsub.f32 %v22098_v50, %v22127_v41  ;;  %v20072_v53 = vpack.c.bf16 %v21962_v6, %v21960_v5  ;;  %v22164_v15 = vand.u32 4294901760, %v1048_v44 }
  0xf2   :  { %24037 = vst [vmem:[#allocation20_spill] sm:$0xff] %v22141_v30  ;;  %24038 = vst [vmem:[#allocation21_spill] sm:$0xff] %v22146_v28  ;;  %v1068_v51 = vsub.f32 %v22122_v19, %v22146_v28  ;;  %v22169_v0 = vand.u32 4294901760, %v22148_v14 }
  0xf3   :  { %17917 = vmatmul.mubr.msk.f32.vlgmr.msra.gmra.mrb[0].mxu0 %vm139_vm0, %v21742_v63  ;;  %18109 = vmatmul.mubr.msk.f32.vlgmr.msra.gmra.mrb[0].mxu1 %vm139_vm0, %v21742_v63  ;;  %24039 = vst [vmem:[#allocation22_spill] sm:$0xff] %v22148_v14  ;;  %v22172_v35 = vand.u32 4294901760, %v1058_v12 }
  0xf4   :  { %17919 = vmatprep.mubr.msk.f32.mxu0 %vm139_vm0, %v21723_v54  ;;  %20019 = vmatpush3.bf16.msra.mxu0 %v21952_v59  ;;  %24041 = vst [vmem:[#allocation24_spill] sm:$0xff] %v22169_v0 }
  0xf5   :  { %18111 = vmatprep.mubr.msk.f32.mxu1 %vm139_vm0, %v21723_v54  ;;  %20067 = vmatpush3.bf16.msra.mxu1 %v21956_v3 }
  0xf6   :  { %20021 = vmatprep.subr.bf16.mxu0 %v22036_v13  ;;  %20069 = vmatprep.subr.bf16.mxu1 %v22038_v16 }
  0xf7   :  { %17920 = vmatmul.mubr.msk.f32.gmra.mrb[2].mxu0 %vm139_vm0, %v21739_v62  ;;  %18112 = vmatmul.mubr.msk.f32.gmra.mrb[2].mxu1 %vm139_vm0, %v21739_v62 }
  0xf8   :  { %17922 = vmatprep.mubr.msk.f32.mxu0 %vm139_vm0, %v21766_v10  ;;  %18114 = vmatprep.mubr.msk.f32.mxu1 %vm139_vm0, %v21766_v10 }
  0xfb   :  { %17923 = vmatmul.mubr.msk.f32.gmra.mrb[4].mxu0 %vm139_vm0, %v21763_v9  ;;  %18115 = vmatmul.mubr.msk.f32.gmra.mrb[4].mxu1 %vm139_vm0, %v21763_v9 }
  0xfc   :  { %17925 = vmatprep.mubr.msk.f32.mxu0 %vm139_vm0, %v21798_v26  ;;  %18117 = vmatprep.mubr.msk.f32.mxu1 %vm139_vm0, %v21798_v26 }
  0xff   :  { %17926 = vmatmul.mubr.msk.f32.gmra.mrb[6].mxu0 %vm139_vm0, %v21795_v25  ;;  %18118 = vmatmul.mubr.msk.f32.gmra.mrb[6].mxu1 %vm139_vm0, %v21795_v25 }
 0x100   :  { %17932 = vmatprep.mubr.f32.mxu0 %v22115_v46  ;;  %18124 = vmatprep.mubr.f32.mxu1 %v22115_v46  ;;  %v22155_v46 = vand.u32 4294901760, %v22129_v40 }
 0x102   :  { %24040 = vst [vmem:[#allocation23_spill] sm:$0xff] %v22155_v46 }
 0x103   :  { %17933 = vmatmul.mubr.f32.vlgmr.msra.gmra.mrb[0].mxu0 %v22141_v30  ;;  %18125 = vmatmul.mubr.f32.vlgmr.msra.gmra.mrb[0].mxu1 %v22141_v30  ;;  %v1078_v30 = vsub.f32 %v22129_v40, %v22155_v46 }
 0x104   :  { %17935 = vmatprep.mubr.f32.mxu0 %v22150_v2  ;;  %20023 = vmatpush3.bf16.msra.mxu0 %v22036_v13  ;;  %v22180_v13 = vand.u32 4294901760, %v1068_v51  ;;  %v24045_v51 = vand.u32 4294901760, %v21960_v5 }
 0x105   :  { %18127 = vmatprep.mubr.f32.mxu1 %v22150_v2  ;;  %20071 = vmatpush3.bf16.msra.mxu1 %v22038_v16  ;;  %v1088_v16 = vsub.f32 %v22148_v14, %v22169_v0  ;;  %v22184_v12 = vand.u32 4294901760, %v1078_v30  ;;  %v24043_v30 = vand.u32 4294901760, %v21954_v1  ;;  %v3238_v1 = vld [vmem:[#allocation2 + $0x20] sm:$0xff] }
 0x106   :  { %20025 = vmatprep.subr.bf16.mxu0 %v20024_v31  ;;  %20073 = vmatprep.subr.bf16.mxu1 %v20072_v53  ;;  %v3241_v5 = vand.u32 4294901760, %v3238_v1 }
 0x107   :  { %17936 = vmatmul.mubr.f32.gmra.mrb[2].mxu0 %v22164_v15  ;;  %18128 = vmatmul.mubr.f32.gmra.mrb[2].mxu1 %v22164_v15  ;;  %v22190_v44 = vand.u32 4294901760, %v1088_v16  ;;  %v24046_v16 = vand.u32 4294901760, %v21962_v6 }
 0x108   :  { %17938 = vmatprep.mubr.f32.mxu0 %v22172_v35  ;;  %18130 = vmatprep.mubr.f32.mxu1 %v22172_v35 }
 0x109   :  { %24042 = vst [vmem:[#allocation25_spill] sm:$0xff] %v22190_v44 }
 0x10b   :  { %17939 = vmatmul.mubr.f32.gmra.mrb[4].mxu0 %v22180_v13  ;;  %18131 = vmatmul.mubr.f32.gmra.mrb[4].mxu1 %v22180_v13 }
 0x10c   :  { %17941 = vmatprep.mubr.f32.mxu0 %v22184_v12  ;;  %18133 = vmatprep.mubr.f32.mxu1 %v22184_v12 }
 0x10f   :  { %17942 = vmatmul.mubr.f32.gmra.mrb[6].mxu0 %v22190_v44  ;;  %18134 = vmatmul.mubr.f32.gmra.mrb[6].mxu1 %v22190_v44  ;;  %v20080_v44 = vpack.c.bf16 %v24046_v16, %v24045_v51 }
 0x110   :  { %17948 = vmatprep.mubr.msk.f32.mxu0 %vm139_vm0, %v22002_v33  ;;  %18140 = vmatprep.mubr.msk.f32.mxu1 %vm139_vm0, %v22002_v33 }
 0x113   :  { %17949 = vmatmul.mubr.msk.f32.vlgmr.msra.gmra.mrb[0].mxu0 %vm139_vm0, %v22017_v48  ;;  %18141 = vmatmul.mubr.msk.f32.vlgmr.msra.gmra.mrb[0].mxu1 %vm139_vm0, %v22017_v48 }
 0x114   :  { %17951 = vmatprep.mubr.msk.f32.mxu0 %vm139_vm0, %v22025_v52  ;;  %20027 = vmatpush3.bf16.msra.mxu0 %v20024_v31  ;;  %v24044_v31 = vand.u32 4294901760, %v21958_v4  ;;  %v3239_v4 = vld [vmem:[#allocation2 + $0x28] sm:$0xff] }
 0x115   :  { %18143 = vmatprep.mubr.msk.f32.mxu1 %vm139_vm0, %v22025_v52  ;;  %20075 = vmatpush3.bf16.msra.mxu1 %v20072_v53  ;;  %v3244_v6 = vand.u32 4294901760, %v3239_v4 }
 0x116   :  { %20029 = vmatprep.subr.bf16.mxu0 %v21952_v59  ;;  %20077 = vmatprep.subr.bf16.mxu1 %v21956_v3  ;;  %v20032_v53 = vpack.c.bf16 %v24044_v31, %v24043_v30  ;;  %v22278_v30 = vsub.f32 %v3238_v1, %v3241_v5 }
 0x117   :  { %17952 = vmatmul.mubr.msk.f32.gmra.mrb[2].mxu0 %vm139_vm0, %v22041_v17  ;;  %18144 = vmatmul.mubr.msk.f32.gmra.mrb[2].mxu1 %vm139_vm0, %v22041_v17  ;;  %v22280_v31 = vsub.f32 %v3239_v4, %v3244_v6 }
 0x118   :  { %17954 = vmatprep.mubr.msk.f32.mxu0 %vm139_vm0, %v22051_v24  ;;  %18146 = vmatprep.mubr.msk.f32.mxu1 %vm139_vm0, %v22051_v24  ;;  %v24004_v51 = vand.u32 4294901760, %v22278_v30 }
 0x119   :  { %v24005_v16 = vand.u32 4294901760, %v22280_v31 }
 0x11a   :  { %v3391_v1 = vsub.f32 %v22278_v30, %v24004_v51  ;;  %v4762_v51 = vld [vmem:[%s23983_s4 + $0x10] sm:$0xff] }
 0x11b   :  { %17955 = vmatmul.mubr.msk.f32.gmra.mrb[4].mxu0 %vm139_vm0, %v22072_v45  ;;  %18147 = vmatmul.mubr.msk.f32.gmra.mrb[4].mxu1 %vm139_vm0, %v22072_v45  ;;  %v3398_v4 = vsub.f32 %v22280_v31, %v24005_v16  ;;  %v4763_v16 = vld [vmem:[%s23983_s4 + $0x18] sm:$0xff] }
 0x11c   :  { %17957 = vmatprep.mubr.msk.f32.mxu0 %vm139_vm0, %v22082_v47  ;;  %18149 = vmatprep.mubr.msk.f32.mxu1 %vm139_vm0, %v22082_v47 }
 0x11f   :  { %17958 = vmatmul.mubr.msk.f32.gmra.mrb[6].mxu0 %vm139_vm0, %v22103_v21  ;;  %18150 = vmatmul.mubr.msk.f32.gmra.mrb[6].mxu1 %vm139_vm0, %v22103_v21 }
 0x120   :  { %17964 = vmatprep.mubr.f32.mxu0 %v22032_v56  ;;  %18156 = vmatprep.mubr.f32.mxu1 %v22032_v56 }
 0x123   :  { %17965 = vmatmul.mubr.f32.vlgmr.msra.gmra.mrb[0].mxu0 %v22063_v38  ;;  %18157 = vmatmul.mubr.f32.vlgmr.msra.gmra.mrb[0].mxu1 %v22063_v38 }
 0x124   :  { %17967 = vmatprep.mubr.f32.mxu0 %v22066_v39  ;;  %20031 = vmatpush3.bf16.msra.mxu0 %v21952_v59 }
 0x125   :  { %18159 = vmatprep.mubr.f32.mxu1 %v22066_v39  ;;  %20079 = vmatpush3.bf16.msra.mxu1 %v21956_v3 }
 0x126   :  { %20033 = vmatprep.subr.bf16.mxu0 %v20032_v53  ;;  %20081 = vmatprep.subr.bf16.mxu1 %v20080_v44 }
 0x127   :  { %17968 = vmatmul.mubr.f32.gmra.mrb[2].mxu0 %v22093_v58  ;;  %18160 = vmatmul.mubr.f32.gmra.mrb[2].mxu1 %v22093_v58 }
 0x128   :  { %17970 = vmatprep.mubr.f32.mxu0 %v22098_v50  ;;  %18162 = vmatprep.mubr.f32.mxu1 %v22098_v50 }
 0x12b   :  { %17971 = vmatmul.mubr.f32.gmra.mrb[4].mxu0 %v22122_v19  ;;  %18163 = vmatmul.mubr.f32.gmra.mrb[4].mxu1 %v22122_v19 }
 0x12c   :  { %17973 = vmatprep.mubr.f32.mxu0 %v22129_v40  ;;  %18165 = vmatprep.mubr.f32.mxu1 %v22129_v40 }
 0x12f   :  { %17974 = vmatmul.mubr.f32.gmra.mrb[6].mxu0 %v22148_v14  ;;  %18166 = vmatmul.mubr.f32.gmra.mrb[6].mxu1 %v22148_v14  ;;  %v20096_v14 = vpack.c.bf16 %v22280_v31, %v22278_v30 }
 0x130   :  { %17980 = vmatprep.mubr.f32.mxu0 %v22060_v32  ;;  %18172 = vmatprep.mubr.f32.mxu1 %v22060_v32  ;;  %v24048_v32 = vmov 0.0  }
 0x133   :  { %17981 = vmatmul.mubr.f32.vlgmr.msra.gmra.mrb[0].mxu0 %v22091_v57  ;;  %18173 = vmatmul.mubr.f32.vlgmr.msra.gmra.mrb[0].mxu1 %v22091_v57 }
 0x134   :  { %17983 = vmatprep.mubr.f32.mxu0 %v22096_v18  ;;  %20035 = vmatpush3.bf16.msra.mxu0 %v20032_v53  ;;  %v24006_v53 = vmov 0.0|0.0  }
 0x135   :  { %18175 = vmatprep.mubr.f32.mxu1 %v22096_v18  ;;  %20083 = vmatpush3.bf16.msra.mxu1 %v20080_v44  ;;  %v22276_v44 = vpack.c.bf16 %v3244_v6, %v3241_v5 }
 0x136   :  { %20037 = vmatprep.subr.bf16.mxu0 %v21952_v59  ;;  %20085 = vmatprep.subr.bf16.mxu1 %v21956_v3 }
 0x137   :  { %17984 = vmatmul.mubr.f32.gmra.mrb[2].mxu0 %v22120_v20  ;;  %18176 = vmatmul.mubr.f32.gmra.mrb[2].mxu1 %v22120_v20 }
 0x138   :  { %17986 = vmatprep.mubr.f32.mxu0 %v22127_v41  ;;  %18178 = vmatprep.mubr.f32.mxu1 %v22127_v41 }
 0x13b   :  { %17987 = vmatmul.mubr.f32.gmra.mrb[4].mxu0 %v22146_v28  ;;  %18179 = vmatmul.mubr.f32.gmra.mrb[4].mxu1 %v22146_v28  ;;  %v4795_v28 = vand.u32 4294901760, %v4763_v16 }
 0x13c   :  { %17989 = vmatprep.mubr.f32.mxu0 %v22155_v46  ;;  %18181 = vmatprep.mubr.f32.mxu1 %v22155_v46  ;;  %v4792_v46 = vand.u32 4294901760, %v4762_v51 }
 0x13e   :  { %v22354_v18 = vsub.f32 %v4762_v51, %v4792_v46 }
 0x13f   :  { %17990 = vmatmul.mubr.f32.gmra.mrb[6].mxu0 %v22169_v0  ;;  %18182 = vmatmul.mubr.f32.gmra.mrb[6].mxu1 %v22169_v0  ;;  %v3399_v0 = vand.u32 4294901760, %v3398_v4 }
 0x140   :  { %17996 = vmatprep.mubr.msk.f32.mxu0 %vm139_vm0, %v22002_v33  ;;  %18188 = vmatprep.mubr.msk.f32.mxu1 %vm139_vm0, %v22002_v33  ;;  %v24018_v51 = vand.u32 4294901760, %v22354_v18 }
 0x143   :  { %17997 = vmatmul.mubr.msk.f32.vlgmr.msra.gmra.mrb[0].mxu0 %vm139_vm0, %v22017_v48  ;;  %18189 = vmatmul.mubr.msk.f32.vlgmr.msra.gmra.mrb[0].mxu1 %vm139_vm0, %v22017_v48 }
 0x144   :  { %17999 = vmatprep.mubr.msk.f32.mxu0 %vm139_vm0, %v22025_v52  ;;  %20039 = vmatpush3.bf16.msra.mxu0 %v21952_v59  ;;  %v4760_v59 = vld [vmem:[%s23983_s4] sm:$0xff] }
 0x145   :  { %18191 = vmatprep.mubr.msk.f32.mxu1 %vm139_vm0, %v22025_v52  ;;  %20087 = vmatpush3.bf16.msra.mxu1 %v21956_v3  ;;  %v4761_v3 = vld [vmem:[%s23983_s4 + $0x8] sm:$0xff]  ;;  %v4786_v5 = vand.u32 4294901760, %v4760_v59 }
 0x146   :  { %20089 = vmatprep.subr.bf16.mxu0 %v22276_v44  ;;  %20136 = vmatprep.subr.bf16.mxu1 %v24006_v53  ;;  %v4789_v6 = vand.u32 4294901760, %v4761_v3  ;;  %v3392_v53 = vand.u32 4294901760, %v3391_v1 }
 0x147   :  { %18000 = vmatmul.mubr.msk.f32.gmra.mrb[2].mxu0 %vm139_vm0, %v22041_v17  ;;  %18192 = vmatmul.mubr.msk.f32.gmra.mrb[2].mxu1 %vm139_vm0, %v22041_v17  ;;  %v22338_v41 = vsub.f32 %v4760_v59, %v4786_v5 }
 0x148   :  { %18002 = vmatprep.mubr.msk.f32.mxu0 %vm139_vm0, %v22051_v24  ;;  %18194 = vmatprep.mubr.msk.f32.mxu1 %vm139_vm0, %v22051_v24  ;;  %v22340_v20 = vsub.f32 %v4761_v3, %v4789_v6  ;;  %v22342_v1 = vpack.c.bf16 %v4789_v6, %v4786_v5  ;;  %v20092_v4 = vpack.c.bf16 %v3399_v0, %v3392_v53  ;;  %v24047_v53 = vmov 0.0|0.0  }
 0x149   :  { %v24015_v59 = vand.u32 4294901760, %v22338_v41  ;;  %v22356_v5 = vsub.f32 %v4763_v16, %v4795_v28  ;;  %v22360_v0 = vpack.c.bf16 %v4795_v28, %v4792_v46 }
 0x14a   :  { %v24014_v3 = vand.u32 4294901760, %v22340_v20 }
 0x14b   :  { %18003 = vmatmul.mubr.msk.f32.gmra.mrb[4].mxu0 %vm139_vm0, %v22072_v45  ;;  %18195 = vmatmul.mubr.msk.f32.gmra.mrb[4].mxu1 %vm139_vm0, %v22072_v45  ;;  %v4868_v28 = vsub.f32 %v22338_v41, %v24015_v59  ;;  %v4888_v16 = vand.u32 4294901760, %v22356_v5  ;;  %v4882_v59 = vsub.f32 %v22354_v18, %v24018_v51 }
 0x14c   :  { %18005 = vmatprep.mubr.msk.f32.mxu0 %vm139_vm0, %v22082_v47  ;;  %18197 = vmatprep.mubr.msk.f32.mxu1 %vm139_vm0, %v22082_v47  ;;  %v4875_v46 = vsub.f32 %v22340_v20, %v24014_v3 }
 0x14d   :  { %v4869_v6 = vand.u32 4294901760, %v4868_v28  ;;  %v4889_v57 = vsub.f32 %v22356_v5, %v4888_v16 }
 0x14e   :  { %v4876_v3 = vand.u32 4294901760, %v4875_v46  ;;  %v4883_v46 = vand.u32 4294901760, %v4882_v59  ;;  %v16746_v59 = vld [vmem:[%s23983_s4 + $0x38] sm:$0xff] }
 0x14f   :  { %18006 = vmatmul.mubr.msk.f32.gmra.mrb[6].mxu0 %vm139_vm0, %v22103_v21  ;;  %18198 = vmatmul.mubr.msk.f32.gmra.mrb[6].mxu1 %vm139_vm0, %v22103_v21  ;;  %v4890_v51 = vand.u32 4294901760, %v4889_v57 }
 0x150   :  { %18012 = vmatprep.mubr.msk.f32.mxu0 %vm139_vm0, %v22002_v33  ;;  %18204 = vmatprep.mubr.msk.f32.mxu1 %vm139_vm0, %v22002_v33  ;;  %v22402_v28 = vpack.c.bf16 %v4876_v3, %v4869_v6  ;;  %v5280_v3 = vand.u32 4294901760, %v16746_v59  ;;  %v24053_v6 = vand.u32 4294901760, %v22280_v31 }
 0x153   :  { %18013 = vmatmul.mubr.msk.f32.vlgmr.msra.gmra.mrb[0].mxu0 %vm139_vm0, %v22017_v48  ;;  %18205 = vmatmul.mubr.msk.f32.vlgmr.msra.gmra.mrb[0].mxu1 %vm139_vm0, %v22017_v48 }
 0x154   :  { %18015 = vmatprep.mubr.msk.f32.mxu0 %vm139_vm0, %v22025_v52  ;;  %18207 = vmatprep.mubr.msk.f32.mxu1 %vm139_vm0, %v22025_v52 }
 0x155   :  { %20091 = vmatpush3.bf16.msra.mxu0 %v22276_v44  ;;  %20138 = vmatpush3.bf16.msra.mxu1 %v22342_v1 }
 0x156   :  { %20139 = vmatprep.subr.bf16.mxu1 %v24047_v53  ;;  %20093 = vmatprep.subr.bf16.mxu0 %v20092_v4 }
 0x157   :  { %18016 = vmatmul.mubr.msk.f32.gmra.mrb[2].mxu0 %vm139_vm0, %v22041_v17  ;;  %18208 = vmatmul.mubr.msk.f32.gmra.mrb[2].mxu1 %vm139_vm0, %v22041_v17 }
 0x158   :  { %18018 = vmatprep.mubr.msk.f32.mxu0 %vm139_vm0, %v22051_v24  ;;  %18210 = vmatprep.mubr.msk.f32.mxu1 %vm139_vm0, %v22051_v24 }
 0x159   :  { %20141 = vmatpush3.bf16.msra.mxu1 %v22360_v0 }
 0x15a   :  { %20142 = vmatprep.subr.bf16.mxu1 %v24047_v53 }
 0x15b   :  { %18019 = vmatmul.mubr.msk.f32.gmra.mrb[4].mxu0 %vm139_vm0, %v22072_v45  ;;  %18211 = vmatmul.mubr.msk.f32.gmra.mrb[4].mxu1 %vm139_vm0, %v22072_v45 }
 0x15c   :  { %18021 = vmatprep.mubr.msk.f32.mxu0 %vm139_vm0, %v22082_v47  ;;  %18213 = vmatprep.mubr.msk.f32.mxu1 %vm139_vm0, %v22082_v47 }
 0x15f   :  { %18022 = vmatmul.mubr.msk.f32.gmra.mrb[6].mxu0 %vm139_vm0, %v22103_v21  ;;  %18214 = vmatmul.mubr.msk.f32.gmra.mrb[6].mxu1 %vm139_vm0, %v22103_v21 }
 0x160   :  { %18220 = vmatprep.mubr.f32.mxu0 %v21768_v11  ;;  %18416 = vmatprep.mubr.msk.f32.mxu1 %vm21600_vm2, %v24048_v32  ;;  %v22410_v11 = vpack.c.bf16 %v4890_v51, %v4883_v46 }
 0x163   :  { %18221 = vmatmul.mubr.f32.vlgmr.msra.gmra.mrb[8].mxu0 %v21800_v27  ;;  %18417 = vmatmul.mubr.f32.vlgmr.msra.gmra.mrb[8].mxu1 %v24048_v32  ;;  %v22420_v27 = vpack.c.bf16 %v22340_v20, %v22338_v41 }
 0x164   :  { %20144 = vmatpush3.bf16.msra.mxu1 %v22402_v28  ;;  %18223 = vmatprep.mubr.f32.mxu0 %v21805_v29  ;;  %v22429_v29 = vpack.c.bf16 %v22356_v5, %v22354_v18 }
 0x165   :  { %20095 = vmatpush3.bf16.msra.mxu0 %v20092_v4  ;;  %20145 = vmatprep.subr.bf16.mxu1 %v24047_v53  ;;  %v16745_v4 = vld [vmem:[%s23983_s4 + $0x30] sm:$0xff] }
 0x166   :  { %18427 = vmatprep.mubr.msk.f32.mxu1 %vm21600_vm2, %v24048_v32  ;;  %20097 = vmatprep.subr.bf16.mxu0 %v20096_v14 }
 0x167   :  { %18224 = vmatmul.mubr.f32.gmra.mrb[10].mxu0 %v21825_v36  ;;  %v24049_v36 = vand.u32 4294901760, %v22338_v41  ;;  %v24051_v41 = vand.u32 4294901760, %v22354_v18  ;;  %v5277_v18 = vand.u32 4294901760, %v16745_v4 }
 0x168   :  { %20147 = vmatpush3.bf16.msra.mxu1 %v22410_v11  ;;  %18226 = vmatprep.mubr.f32.mxu0 %v21827_v37  ;;  %v24050_v37 = vand.u32 4294901760, %v22340_v20 }
 0x169   :  { %20148 = vmatprep.subr.bf16.mxu1 %v24047_v53 }
 0x16b   :  { %18227 = vmatmul.mubr.f32.gmra.mrb[12].mxu0 %v21846_v42  ;;  %18428 = vmatmul.mubr.f32.vlgmr.msra.gmra.mrb[8].mxu1 %v24048_v32  ;;  %v16743_v42 = vld [vmem:[%s23983_s4 + $0x20] sm:$0xff] }
 0x16c   :  { %20150 = vmatpush3.bf16.msra.mxu1 %v22420_v27  ;;  %18229 = vmatprep.mubr.f32.mxu0 %v21848_v43  ;;  %v16744_v43 = vld [vmem:[%s23983_s4 + $0x28] sm:$0xff]  ;;  %v5271_v20 = vand.u32 4294901760, %v16743_v42 }
 0x16d   :  { %20151 = vmatprep.subr.bf16.mxu1 %v24047_v53  ;;  %18438 = vmatprep.mubr.msk.f32.mxu1 %vm21600_vm2, %v24048_v32  ;;  %v5274_v57 = vand.u32 4294901760, %v16744_v43 }
 0x16e   :  { %v22492_v5 = vsub.f32 %v16743_v42, %v5271_v20  ;;  %v22509_v42 = vsub.f32 %v16746_v59, %v5280_v3 }
 0x16f   :  { %18230 = vmatmul.mubr.f32.gmra.mrb[14].mxu0 %v21856_v49  ;;  %v22477_v49 = vpack.c.bf16 %v4888_v16, %v24051_v41  ;;  %v22494_v51 = vsub.f32 %v16744_v43, %v5274_v57  ;;  %v24052_v16 = vand.u32 4294901760, %v22278_v30 }
 0x170   :  { %20153 = vmatpush3.bf16.msra.mxu1 %v22429_v29  ;;  %18236 = vmatprep.mubr.msk.f32.mxu0 %vm139_vm0, %v21726_v55  ;;  %v5373_v43 = vand.u32 4294901760, %v22509_v42 }
 0x171   :  { %20154 = vmatprep.subr.bf16.mxu1 %v24047_v53  ;;  %v20104_v46 = vpack.c.bf16 %v24053_v6, %v24052_v16  ;;  %v24057_v16 = vld [vmem:[#allocation6_spill] sm:$0xff] }
 0x173   :  { %18237 = vmatmul.mubr.msk.f32.vlgmr.msra.gmra.mrb[8].mxu0 %vm139_vm0, %v21742_v63  ;;  %18439 = vmatmul.mubr.f32.vlgmr.msra.gmra.mrb[8].mxu1 %v24048_v32 }
 0x174   :  { %20156 = vmatpush3.bf16.msra.mxu1 %v22342_v1  ;;  %18239 = vmatprep.mubr.msk.f32.mxu0 %vm139_vm0, %v21723_v54 }
 0x175   :  { %20099 = vmatpush3.bf16.msra.mxu0 %v20096_v14  ;;  %20157 = vmatprep.subr.bf16.mxu1 %v24047_v53  ;;  %v22458_v14 = vpack.c.bf16 %v24050_v37, %v24049_v36  ;;  %v5359_v36 = vand.u32 4294901760, %v22494_v51  ;;  %v22507_v37 = vsub.f32 %v16745_v4, %v5277_v18 }
 0x176   :  { %18449 = vmatprep.mubr.msk.f32.mxu1 %vm21600_vm2, %v24048_v32  ;;  %20101 = vmatprep.subr.bf16.mxu0 %v22276_v44 }
 0x177   :  { %18240 = vmatmul.mubr.msk.f32.gmra.mrb[10].mxu0 %vm139_vm0, %v21739_v62  ;;  %v5360_v30 = vsub.f32 %v22494_v51, %v5359_v36  ;;  %v5366_v31 = vand.u32 4294901760, %v22507_v37 }
 0x178   :  { %20159 = vmatpush3.bf16.msra.mxu1 %v22360_v0  ;;  %18242 = vmatprep.mubr.msk.f32.mxu0 %vm139_vm0, %v21766_v10 }
 0x179   :  { %20160 = vmatprep.subr.bf16.mxu1 %v24047_v53  ;;  %v5361_v41 = vand.u32 4294901760, %v5360_v30  ;;  %v24059_v30 = vld [vmem:[#allocation9_spill] sm:$0xff] }
 0x17b   :  { %18243 = vmatmul.mubr.msk.f32.gmra.mrb[12].mxu0 %vm139_vm0, %v21763_v9  ;;  %18450 = vmatmul.mubr.f32.vlgmr.msra.gmra.mrb[8].mxu1 %v24048_v32 }
 0x17c   :  { %20162 = vmatpush3.bf16.msra.mxu1 %v22458_v14  ;;  %18245 = vmatprep.mubr.msk.f32.mxu0 %vm139_vm0, %v21798_v26 }
 0x17d   :  { %20163 = vmatprep.subr.bf16.mxu1 %v24047_v53  ;;  %18460 = vmatprep.mubr.msk.f32.mxu1 %vm21600_vm2, %v24048_v32 }
 0x17f   :  { %18246 = vmatmul.mubr.msk.f32.gmra.mrb[14].mxu0 %vm139_vm0, %v21795_v25 }
 0x180   :  { %20165 = vmatpush3.bf16.msra.mxu1 %v22477_v49  ;;  %18252 = vmatprep.mubr.f32.mxu0 %v21732_v60  ;;  %v5352_v60 = vand.u32 4294901760, %v22492_v5 }
 0x181   :  { %20166 = vmatprep.subr.bf16.mxu1 %v24047_v53 }
 0x183   :  { %18253 = vmatmul.mubr.f32.vlgmr.msra.gmra.mrb[8].mxu0 %v21756_v7  ;;  %18461 = vmatmul.mubr.f32.vlgmr.msra.gmra.mrb[8].mxu1 %v24048_v32  ;;  %v22516_v7 = vpack.c.bf16 %v5274_v57, %v5271_v20  ;;  %v5367_v20 = vsub.f32 %v22507_v37, %v5366_v31  ;;  %v5374_v57 = vsub.f32 %v22509_v42, %v5373_v43 }
 0x184   :  { %20168 = vmatpush3.bf16.msra.mxu1 %v22342_v1  ;;  %18255 = vmatprep.mubr.f32.mxu0 %v21734_v61  ;;  %v5353_v61 = vsub.f32 %v22492_v5, %v5352_v60 }
 0x185   :  { %20103 = vmatpush3.bf16.msra.mxu0 %v22276_v44  ;;  %20169 = vmatprep.subr.bf16.mxu1 %v24047_v53  ;;  %v5368_v59 = vand.u32 4294901760, %v5367_v20  ;;  %v16694_v20 = vld [vmem:[%s23981_s2 + $0x28] sm:$0xff] }
 0x186   :  { %18471 = vmatprep.mubr.msk.f32.mxu1 %vm21600_vm2, %v24048_v32  ;;  %20105 = vmatprep.subr.bf16.mxu0 %v20104_v46 }
 0x187   :  { %18256 = vmatmul.mubr.f32.gmra.mrb[10].mxu0 %v21758_v8  ;;  %v22531_v8 = vpack.c.bf16 %v5280_v3, %v5277_v18  ;;  %v5375_v18 = vand.u32 4294901760, %v5374_v57  ;;  %v24056_v3 = vld [vmem:[#allocation7_spill] sm:$0xff]  ;;  %v24061_v57 = vld [vmem:[#allocation12_spill] sm:$0xff] }
 0x188   :  { %20171 = vmatpush3.bf16.msra.mxu1 %v22360_v0  ;;  %18258 = vmatprep.mubr.f32.mxu0 %v21786_v22  ;;  %v5354_v22 = vand.u32 4294901760, %v5353_v61  ;;  %v24058_v61 = vld [vmem:[#allocation8_spill] sm:$0xff] }
 0x189   :  { %20172 = vmatprep.subr.bf16.mxu1 %v24047_v53  ;;  %v22554_v6 = vpack.c.bf16 %v5375_v18, %v5368_v59  ;;  %v4004_v59 = vand.u32 4294901760, %v16694_v20  ;;  %v24062_v18 = vld [vmem:[#allocation13_spill] sm:$0xff] }
 0x18a   :  { %v22547_v4 = vpack.c.bf16 %v5361_v41, %v5354_v22  ;;  %v22565_v22 = vpack.c.bf16 %v22494_v51, %v22492_v5  ;;  %v16693_v41 = vld [vmem:[%s23981_s2 + $0x20] sm:$0xff]  ;;  %v22643_v51 = vpack.c.bf16 %v5373_v43, %v5366_v31 }
 0x18b   :  { %18259 = vmatmul.mubr.f32.gmra.mrb[12].mxu0 %v21788_v23  ;;  %18472 = vmatmul.mubr.f32.vlgmr.msra.gmra.mrb[8].mxu1 %v24048_v32  ;;  %v24054_v23 = vld [vmem:[#allocation11_spill] sm:$0xff] }
 0x18c   :  { %20174 = vmatpush3.bf16.msra.mxu1 %v22516_v7  ;;  %18261 = vmatprep.mubr.f32.mxu0 %v21818_v34  ;;  %v24055_v34 = vld [vmem:[#allocation5_spill] sm:$0xff] }
 0x18d   :  { %20175 = vmatprep.subr.bf16.mxu1 %v24047_v53  ;;  %18482 = vmatprep.mubr.msk.f32.mxu1 %vm21600_vm2, %v24048_v32 }
 0x18f   :  { %18262 = vmatmul.mubr.f32.gmra.mrb[14].mxu0 %v24054_v23  ;;  %v22580_v23 = vpack.c.bf16 %v22509_v42, %v22507_v37 }
 0x190   :  { %20177 = vmatpush3.bf16.msra.mxu1 %v22531_v8  ;;  %18268 = vmatprep.mubr.f32.mxu0 %v24055_v34  ;;  %v4001_v34 = vand.u32 4294901760, %v16693_v41 }
 0x191   :  { %20178 = vmatprep.subr.bf16.mxu1 %v24047_v53 }
 0x193   :  { %18483 = vmatmul.mubr.f32.vlgmr.msra.gmra.mrb[10].mxu1 %v24048_v32  ;;  %18269 = vmatmul.mubr.f32.vlgmr.msra.gmra.mrb[8].mxu0 %v24056_v3  ;;  %v22590_v3 = vpack.c.bf16 %v4004_v59, %v4001_v34 }
 0x194   :  { %20180 = vmatpush3.bf16.msra.mxu1 %v22547_v4  ;;  %18271 = vmatprep.mubr.f32.mxu0 %v24057_v16  ;;  %v22592_v16 = vsub.f32 %v16693_v41, %v4001_v34  ;;  %v16747_v41 = vld [vmem:[%s23983_s4 + $0x40] sm:$0xff]  ;;  %v16749_v34 = vld [vmem:[%s23983_s4 + $0x50] sm:$0xff] }
 0x195   :  { %20107 = vmatpush3.bf16.msra.mxu0 %v20104_v46  ;;  %20181 = vmatprep.subr.bf16.mxu1 %v24047_v53  ;;  %v24060_v46 = vld [vmem:[#allocation10_spill] sm:$0xff]  ;;  %v5762_v42 = vand.u32 4294901760, %v16749_v34 }
 0x196   :  { %18493 = vmatprep.mubr.msk.f32.mxu1 %vm21600_vm2, %v24048_v32  ;;  %20109 = vmatprep.subr.bf16.mxu0 %v22276_v44 }
 0x197   :  { %18272 = vmatmul.mubr.f32.gmra.mrb[10].mxu0 %v24058_v61  ;;  %v22594_v61 = vsub.f32 %v16694_v20, %v4004_v59  ;;  %v16748_v20 = vld [vmem:[%s23983_s4 + $0x48] sm:$0xff]  ;;  %v16750_v59 = vld [vmem:[%s23983_s4 + $0x58] sm:$0xff] }
 0x198   :  { %20183 = vmatpush3.bf16.msra.mxu1 %v22554_v6  ;;  %18274 = vmatprep.mubr.f32.mxu0 %v24059_v30  ;;  %v24021_v30 = vand.u32 4294901760, %v22592_v16  ;;  %v5765_v31 = vand.u32 4294901760, %v16750_v59 }
 0x199   :  { %20184 = vmatprep.subr.bf16.mxu1 %v24047_v53 }
 0x19b   :  { %18494 = vmatmul.mubr.f32.vlgmr.msra.gmra.mrb[10].mxu1 %v24048_v32  ;;  %18275 = vmatmul.mubr.f32.gmra.mrb[12].mxu0 %v24060_v46  ;;  %v24020_v46 = vand.u32 4294901760, %v22594_v61 }
 0x19c   :  { %20186 = vmatpush3.bf16.msra.mxu1 %v22565_v22  ;;  %18277 = vmatprep.mubr.f32.mxu0 %v24061_v57  ;;  %v4151_v57 = vsub.f32 %v22592_v16, %v24021_v30 }
 0x19d   :  { %20187 = vmatprep.subr.bf16.mxu1 %v24047_v53  ;;  %18504 = vmatprep.mubr.msk.f32.mxu1 %vm21600_vm2, %v24048_v32  ;;  %v4158_v5 = vsub.f32 %v22594_v61, %v24020_v46 }
 0x19e   :  { %v4152_v37 = vand.u32 4294901760, %v4151_v57  ;;  %v22672_v57 = vsub.f32 %v16749_v34, %v5762_v42 }
 0x19f   :  { %18278 = vmatmul.mubr.f32.gmra.mrb[14].mxu0 %v24062_v18  ;;  %v4159_v18 = vand.u32 4294901760, %v4158_v5 }
 0x1a0   :  { %20189 = vmatpush3.bf16.msra.mxu1 %v22580_v23  ;;  %18284 = vmatprep.mubr.msk.f32.mxu0 %vm139_vm0, %v21726_v55  ;;  %v5851_v34 = vand.u32 4294901760, %v22672_v57 }
 0x1a1   :  { %20190 = vmatprep.subr.bf16.mxu1 %v24047_v53  ;;  %v20116_v30 = vpack.c.bf16 %v4159_v18, %v4152_v37 }
 0x1a3   :  { %18505 = vmatmul.mubr.f32.vlgmr.msra.gmra.mrb[10].mxu1 %v24048_v32  ;;  %18285 = vmatmul.mubr.msk.f32.vlgmr.msra.gmra.mrb[8].mxu0 %vm139_vm0, %v21742_v63 }
 0x1a4   :  { %20192 = vmatpush3.bf16.msra.mxu1 %v22516_v7  ;;  %18287 = vmatprep.mubr.msk.f32.mxu0 %vm139_vm0, %v21723_v54 }
 0x1a5   :  { %20111 = vmatpush3.bf16.msra.mxu0 %v22276_v44  ;;  %20193 = vmatprep.subr.bf16.mxu1 %v24047_v53  ;;  %v22618_v44 = vpack.c.bf16 %v5359_v36, %v5352_v60  ;;  %v5756_v60 = vand.u32 4294901760, %v16747_v41  ;;  %v5759_v36 = vand.u32 4294901760, %v16748_v20 }
 0x1a6   :  { %18515 = vmatprep.mubr.msk.f32.mxu1 %vm21600_vm2, %v24048_v32  ;;  %20113 = vmatprep.subr.bf16.mxu0 %v22590_v3 }
 0x1a7   :  { %18288 = vmatmul.mubr.msk.f32.gmra.mrb[10].mxu0 %vm139_vm0, %v21739_v62  ;;  %v22659_v43 = vsub.f32 %v16747_v41, %v5756_v60  ;;  %v22661_v46 = vsub.f32 %v16748_v20, %v5759_v36  ;;  %v22674_v20 = vsub.f32 %v16750_v59, %v5765_v31 }
 0x1a8   :  { %20195 = vmatpush3.bf16.msra.mxu1 %v22531_v8  ;;  %18290 = vmatprep.mubr.msk.f32.mxu0 %vm139_vm0, %v21766_v10 }
 0x1a9   :  { %20196 = vmatprep.subr.bf16.mxu1 %v24047_v53  ;;  %v5844_v41 = vand.u32 4294901760, %v22661_v46  ;;  %v5858_v59 = vand.u32 4294901760, %v22674_v20 }
 0x1ab   :  { %18516 = vmatmul.mubr.f32.vlgmr.msra.gmra.mrb[10].mxu1 %v24048_v32  ;;  %18291 = vmatmul.mubr.msk.f32.gmra.mrb[12].mxu0 %vm139_vm0, %v21763_v9  ;;  %v5845_v5 = vsub.f32 %v22661_v46, %v5844_v41  ;;  %v5859_v37 = vsub.f32 %v22674_v20, %v5858_v59 }
 0x1ac   :  { %20198 = vmatpush3.bf16.msra.mxu1 %v22618_v44  ;;  %18293 = vmatprep.mubr.msk.f32.mxu0 %vm139_vm0, %v21798_v26 }
 0x1ad   :  { %20199 = vmatprep.subr.bf16.mxu1 %v24047_v53  ;;  %18526 = vmatprep.mubr.msk.f32.mxu1 %vm21600_vm2, %v24048_v32 }
 0x1af   :  { %18294 = vmatmul.mubr.msk.f32.gmra.mrb[14].mxu0 %vm139_vm0, %v21795_v25 }
 0x1b0   :  { %20201 = vmatpush3.bf16.msra.mxu1 %v22643_v51  ;;  %18300 = vmatprep.mubr.msk.f32.mxu0 %vm139_vm0, %v21726_v55  ;;  %v5837_v55 = vand.u32 4294901760, %v22659_v43 }
 0x1b1   :  { %20202 = vmatprep.subr.bf16.mxu1 %v24047_v53 }
 0x1b3   :  { %18527 = vmatmul.mubr.f32.vlgmr.msra.gmra.mrb[10].mxu1 %v24048_v32  ;;  %18301 = vmatmul.mubr.msk.f32.vlgmr.msra.gmra.mrb[8].mxu0 %vm139_vm0, %v21742_v63  ;;  %v5838_v63 = vsub.f32 %v22659_v43, %v5837_v55 }
 0x1b4   :  { %20204 = vmatpush3.bf16.msra.mxu1 %v22516_v7  ;;  %18303 = vmatprep.mubr.msk.f32.mxu0 %vm139_vm0, %v21723_v54  ;;  %v22682_v54 = vpack.c.bf16 %v5759_v36, %v5756_v60  ;;  %v5846_v60 = vand.u32 4294901760, %v5845_v5  ;;  %v5852_v36 = vsub.f32 %v22672_v57, %v5851_v34  ;;  %v22736_v5 = vpack.c.bf16 %v22661_v46, %v22659_v43 }
 0x1b5   :  { %20115 = vmatpush3.bf16.msra.mxu0 %v22590_v3  ;;  %20205 = vmatprep.subr.bf16.mxu1 %v24047_v53 }
 0x1b6   :  { %18537 = vmatprep.mubr.msk.f32.mxu1 %vm21600_vm2, %v24048_v32  ;;  %20117 = vmatprep.subr.bf16.mxu0 %v20116_v30  ;;  %v5853_v18 = vand.u32 4294901760, %v5852_v36 }
 0x1b7   :  { %18304 = vmatmul.mubr.msk.f32.gmra.mrb[10].mxu0 %vm139_vm0, %v21739_v62  ;;  %v22699_v62 = vpack.c.bf16 %v5765_v31, %v5762_v42  ;;  %v5860_v42 = vand.u32 4294901760, %v5859_v37  ;;  %v20120_v31 = vpack.c.bf16 %v22594_v61, %v22592_v16 }
 0x1b8   :  { %20207 = vmatpush3.bf16.msra.mxu1 %v22531_v8  ;;  %18306 = vmatprep.mubr.msk.f32.mxu0 %vm139_vm0, %v21766_v10  ;;  %v5839_v10 = vand.u32 4294901760, %v5838_v63  ;;  %v24064_v63 = vld [vmem:[#allocation20_spill] sm:$0xff] }
 0x1b9   :  { %20208 = vmatprep.subr.bf16.mxu1 %v24047_v53 }
 0x1bb   :  { %18538 = vmatmul.mubr.f32.vlgmr.msra.gmra.mrb[10].mxu1 %v24048_v32  ;;  %18307 = vmatmul.mubr.msk.f32.gmra.mrb[12].mxu0 %vm139_vm0, %v21763_v9  ;;  %v24063_v9 = vld [vmem:[#allocation17_spill] sm:$0xff] }
 0x1bc   :  { %20210 = vmatpush3.bf16.msra.mxu1 %v22682_v54  ;;  %18309 = vmatprep.mubr.msk.f32.mxu0 %vm139_vm0, %v21798_v26  ;;  %v22717_v26 = vpack.c.bf16 %v5846_v60, %v5839_v10 }
 0x1bd   :  { %20211 = vmatprep.subr.bf16.mxu1 %v24047_v53  ;;  %18548 = vmatprep.mubr.msk.f32.mxu1 %vm21600_vm2, %v24048_v32 }
 0x1bf   :  { %18310 = vmatmul.mubr.msk.f32.gmra.mrb[14].mxu0 %vm139_vm0, %v21795_v25  ;;  %v22726_v25 = vpack.c.bf16 %v5860_v42, %v5853_v18 }
 0x1c0   :  { %20213 = vmatpush3.bf16.msra.mxu1 %v22699_v62  ;;  %18316 = vmatprep.mubr.f32.mxu0 %v24063_v9 }
 0x1c1   :  { %20214 = vmatprep.subr.bf16.mxu1 %v24047_v53 }
 0x1c3   :  { %18549 = vmatmul.mubr.f32.vlgmr.msra.gmra.mrb[12].mxu1 %v24048_v32  ;;  %18317 = vmatmul.mubr.f32.vlgmr.msra.gmra.mrb[8].mxu0 %v24064_v63 }
 0x1c4   :  { %20216 = vmatpush3.bf16.msra.mxu1 %v22717_v26  ;;  %18319 = vmatprep.mubr.f32.mxu0 %v22150_v2  ;;  %v22745_v2 = vpack.c.bf16 %v22674_v20, %v22672_v57 }
 0x1c5   :  { %20119 = vmatpush3.bf16.msra.mxu0 %v20116_v30  ;;  %20217 = vmatprep.subr.bf16.mxu1 %v24047_v53  ;;  %v24067_v30 = vand.u32 4294901760, %v22594_v61  ;;  %v24076_v61 = vld [vmem:[#allocation24_spill] sm:$0xff] }
 0x1c6   :  { %18559 = vmatprep.mubr.msk.f32.mxu1 %vm21600_vm2, %v24048_v32  ;;  %20121 = vmatprep.subr.bf16.mxu0 %v20120_v31 }
 0x1c7   :  { %18320 = vmatmul.mubr.f32.gmra.mrb[10].mxu0 %v22164_v15  ;;  %v22774_v15 = vpack.c.bf16 %v5844_v41, %v5837_v55 }
 0x1c8   :  { %20219 = vmatpush3.bf16.msra.mxu1 %v22726_v25  ;;  %18322 = vmatprep.mubr.f32.mxu0 %v22172_v35  ;;  %v24065_v35 = vld [vmem:[#allocation25_spill] sm:$0xff] }
 0x1c9   :  { %20220 = vmatprep.subr.bf16.mxu1 %v24047_v53 }
 0x1cb   :  { %18560 = vmatmul.mubr.f32.vlgmr.msra.gmra.mrb[12].mxu1 %v24048_v32  ;;  %18323 = vmatmul.mubr.f32.gmra.mrb[12].mxu0 %v22180_v13  ;;  %v22787_v13 = vpack.c.bf16 %v5858_v59, %v5851_v34 }
 0x1cc   :  { %20222 = vmatpush3.bf16.msra.mxu1 %v22736_v5  ;;  %18325 = vmatprep.mubr.f32.mxu0 %v22184_v12  ;;  %v24066_v12 = vand.u32 4294901760, %v22592_v16  ;;  %v24075_v16 = vld [vmem:[#allocation23_spill] sm:$0xff] }
 0x1cd   :  { %20223 = vmatprep.subr.bf16.mxu1 %v24047_v53  ;;  %18570 = vmatprep.mubr.msk.f32.mxu1 %vm21600_vm2, %v24048_v32 }
 0x1ce   :  { %v20128_v46 = vpack.c.bf16 %v24067_v30, %v24066_v12 }
 0x1cf   :  { %18326 = vmatmul.mubr.f32.gmra.mrb[14].mxu0 %v24065_v35  ;;  %v22903_v35 = vld [vmem:[%s23984_s5] ss:$0 sm:$0xff] }
 0x1d0   :  { %20225 = vmatpush3.bf16.msra.mxu1 %v22745_v2  ;;  %18332 = vmatprep.mubr.msk.f32.mxu0 %vm139_vm0, %v22002_v33 }
 0x1d1   :  { %20226 = vmatprep.subr.bf16.mxu1 %v24047_v53 }
 0x1d3   :  { %18571 = vmatmul.mubr.f32.vlgmr.msra.gmra.mrb[12].mxu1 %v24048_v32  ;;  %18333 = vmatmul.mubr.msk.f32.vlgmr.msra.gmra.mrb[8].mxu0 %vm139_vm0, %v22017_v48 }
 0x1d4   :  { %20228 = vmatpush3.bf16.msra.mxu1 %v22682_v54  ;;  %18335 = vmatprep.mubr.msk.f32.mxu0 %vm139_vm0, %v22025_v52 }
 0x1d5   :  { %20123 = vmatpush3.bf16.msra.mxu0 %v20120_v31  ;;  %20229 = vmatprep.subr.bf16.mxu1 %v24047_v53 }
 0x1d6   :  { %18581 = vmatprep.mubr.msk.f32.mxu1 %vm21600_vm2, %v24048_v32  ;;  %20125 = vmatprep.subr.bf16.mxu0 %v22590_v3 }
 0x1d7   :  { %18336 = vmatmul.mubr.msk.f32.gmra.mrb[10].mxu0 %vm139_vm0, %v22041_v17 }
 0x1d8   :  { %20231 = vmatpush3.bf16.msra.mxu1 %v22699_v62  ;;  %18338 = vmatprep.mubr.msk.f32.mxu0 %vm139_vm0, %v22051_v24 }
 0x1d9   :  { %20232 = vmatprep.subr.bf16.mxu1 %v24047_v53 }
 0x1db   :  { %18582 = vmatmul.mubr.f32.vlgmr.msra.gmra.mrb[12].mxu1 %v24048_v32  ;;  %18339 = vmatmul.mubr.msk.f32.gmra.mrb[12].mxu0 %vm139_vm0, %v22072_v45 }
 0x1dc   :  { %20234 = vmatpush3.bf16.msra.mxu1 %v22774_v15  ;;  %18341 = vmatprep.mubr.msk.f32.mxu0 %vm139_vm0, %v22082_v47 }
 0x1dd   :  { %20235 = vmatprep.subr.bf16.mxu1 %v24047_v53  ;;  %18592 = vmatprep.mubr.msk.f32.mxu1 %vm21600_vm2, %v24048_v32 }
 0x1df   :  { %18342 = vmatmul.mubr.msk.f32.gmra.mrb[14].mxu0 %vm139_vm0, %v22103_v21 }
 0x1e0   :  { %20237 = vmatpush3.bf16.msra.mxu1 %v22787_v13  ;;  %18348 = vmatprep.mubr.f32.mxu0 %v22032_v56  ;;  %v24068_v56 = vld [vmem:[#allocation22_spill] sm:$0xff] }
 0x1e1   :  { %20238 = vmatprep.subr.bf16.mxu1 %v24047_v53 }
 0x1e3   :  { %18593 = vmatmul.mubr.f32.vlgmr.msra.gmra.mrb[12].mxu1 %v24048_v32  ;;  %18349 = vmatmul.mubr.f32.vlgmr.msra.gmra.mrb[8].mxu0 %v22063_v38  ;;  %v24069_v38 = vld [vmem:[#allocation14_spill] sm:$0xff] }
 0x1e4   :  { %20240 = vmatpush3.bf16.msra.mxu1 %v22682_v54  ;;  %18351 = vmatprep.mubr.f32.mxu0 %v22066_v39  ;;  %v24070_v39 = vld [vmem:[#allocation15_spill] sm:$0xff] }
 0x1e5   :  { %20127 = vmatpush3.bf16.msra.mxu0 %v22590_v3  ;;  %20241 = vmatprep.subr.bf16.mxu1 %v24047_v53 }
 0x1e6   :  { %18603 = vmatprep.mubr.msk.f32.mxu1 %vm21600_vm2, %v24048_v32  ;;  %20129 = vmatprep.subr.bf16.mxu0 %v20128_v46 }
 0x1e7   :  { %18352 = vmatmul.mubr.f32.gmra.mrb[10].mxu0 %v22093_v58  ;;  %v24073_v58 = vld [vmem:[#allocation19_spill] sm:$0xff] }
 0x1e8   :  { %20243 = vmatpush3.bf16.msra.mxu1 %v22699_v62  ;;  %18354 = vmatprep.mubr.f32.mxu0 %v22098_v50  ;;  %v24074_v50 = vld [vmem:[#allocation21_spill] sm:$0xff] }
 0x1e9   :  { %20244 = vmatprep.subr.bf16.mxu1 %v24047_v53 }
 0x1eb   :  { %18604 = vmatmul.mubr.f32.vlgmr.msra.gmra.mrb[12].mxu1 %v24048_v32  ;;  %18355 = vmatmul.mubr.f32.gmra.mrb[12].mxu0 %v22122_v19  ;;  %v24071_v19 = vld [vmem:[#allocation16_spill] sm:$0xff] }
 0x1ec   :  { %18357 = vmatprep.mubr.f32.mxu0 %v22129_v40  ;;  %20246 = vmatpush3.bf16.msra.mxu1 %v22342_v1  ;;  %v24072_v40 = vld [vmem:[#allocation18_spill] sm:$0xff] }
 0x1ed   :  { %20247 = vmatprep.subr.bf16.mxu1 %v24047_v53  ;;  %18614 = vmatprep.mubr.msk.f32.mxu1 %vm21600_vm2, %v24048_v32 }
 0x1ef   :  { %18358 = vmatmul.mubr.f32.gmra.mrb[14].mxu0 %v24068_v56 }
 0x1f0   :  { %18364 = vmatprep.mubr.f32.mxu0 %v24069_v38  ;;  %20249 = vmatpush3.bf16.msra.mxu1 %v22360_v0 }
 0x1f1   :  { %20250 = vmatprep.subr.bf16.mxu1 %v24047_v53 }
 0x1f3   :  { %18365 = vmatmul.mubr.f32.vlgmr.msra.gmra.mrb[8].mxu0 %v24070_v39 }
 0x1f4   :  { %18367 = vmatprep.mubr.f32.mxu0 %v24071_v19  ;;  %20131 = vmatpush3.bf16.msra.mxu0 %v20128_v46 }
 0x1f5   :  { %20133 = vmatprep.subr.bf16.mxu0 %v22590_v3 }
 0x1f7   :  { %18368 = vmatmul.mubr.f32.gmra.mrb[10].mxu0 %v24072_v40 }
 0x1f8   :  { %18370 = vmatprep.mubr.f32.mxu0 %v24073_v58 }
 0x1fb   :  { %18371 = vmatmul.mubr.f32.gmra.mrb[12].mxu0 %v24074_v50 }
 0x1fc   :  { %18373 = vmatprep.mubr.f32.mxu0 %v24075_v16 }
 0x1ff   :  { %18374 = vmatmul.mubr.f32.gmra.mrb[14].mxu0 %v24076_v61 }
 0x200   :  { %18380 = vmatprep.mubr.msk.f32.mxu0 %vm139_vm0, %v22002_v33 }
 0x203   :  { %18381 = vmatmul.mubr.msk.f32.vlgmr.msra.gmra.mrb[8].mxu0 %vm139_vm0, %v22017_v48 }
 0x204   :  { %18383 = vmatprep.mubr.msk.f32.mxu0 %vm139_vm0, %v22025_v52  ;;  %20135 = vmatpush3.bf16.msra.mxu0 %v22590_v3 }
 0x205   :  { %20280 = vmatprep.subr.bf16.mxu0 %v24047_v53 }
 0x207   :  { %18384 = vmatmul.mubr.msk.f32.gmra.mrb[10].mxu0 %vm139_vm0, %v22041_v17 }
 0x208   :  { %18386 = vmatprep.mubr.msk.f32.mxu0 %vm139_vm0, %v22051_v24 }
 0x20b   :  { %18387 = vmatmul.mubr.msk.f32.gmra.mrb[12].mxu0 %vm139_vm0, %v22072_v45 }
 0x20c   :  { %18389 = vmatprep.mubr.msk.f32.mxu0 %vm139_vm0, %v22082_v47 }
 0x20f   :  { %18390 = vmatmul.mubr.msk.f32.gmra.mrb[14].mxu0 %vm139_vm0, %v22103_v21 }
 0x210   :  { %18396 = vmatprep.mubr.msk.f32.mxu0 %vm139_vm0, %v22002_v33 }
 0x213   :  { %18397 = vmatmul.mubr.msk.f32.vlgmr.msra.gmra.mrb[8].mxu0 %vm139_vm0, %v22017_v48 }
 0x214   :  { %18399 = vmatprep.mubr.msk.f32.mxu0 %vm139_vm0, %v22025_v52  ;;  %20282 = vmatpush3.bf16.msra.mxu0 %v22516_v7 }
 0x215   :  { %20283 = vmatprep.subr.bf16.mxu0 %v24047_v53 }
 0x217   :  { %18400 = vmatmul.mubr.msk.f32.gmra.mrb[10].mxu0 %vm139_vm0, %v22041_v17 }
 0x218   :  { %18402 = vmatprep.mubr.msk.f32.mxu0 %vm139_vm0, %v22051_v24  ;;  %20285 = vmatpush3.bf16.msra.mxu0 %v22531_v8 }
 0x219   :  { %20286 = vmatprep.subr.bf16.mxu0 %v24047_v53 }
 0x21b   :  { %18403 = vmatmul.mubr.msk.f32.gmra.mrb[12].mxu0 %vm139_vm0, %v22072_v45 }
 0x21c   :  { %18405 = vmatprep.mubr.msk.f32.mxu0 %vm139_vm0, %v22082_v47 }
 0x21f   :  { %18406 = vmatmul.mubr.msk.f32.gmra.mrb[14].mxu0 %vm139_vm0, %v22103_v21  ;;  %vm4781_vm0 = vcmask 261120  }
 0x220   :  { %18680 = vmatprep.mubr.msk.f32.mxu0 %vm21600_vm2, %v24048_v32 }
 0x226   :  { %v22872_v33 = vpop.f32.mrb[0].mxu0  ;;  %v22874_v48 = vpop.f32.mrb[0].mxu1 }
 0x227   :  { %v1662_v52 = vpop.f32.mrb[1].mxu0  ;;  %v3188_v17 = vpop.f32.mrb[1].mxu1 }
 0x22a   :  { %v22876_v24 = vpop.f32.mrb[2].mxu0  ;;  %v22878_v3 = vpop.f32.mrb[2].mxu1 }
 0x22b   :  { %v22880_v45 = vpop.f32.mrb[3].mxu0  ;;  %v22882_v43 = vpop.f32.mrb[3].mxu1 }
 0x22e   :  { %v22884_v47 = vpop.f32.mrb[4].mxu0  ;;  %v22886_v21 = vpop.f32.mrb[4].mxu1 }
 0x22f   :  { %v22888_v55 = vpop.f32.mrb[5].mxu0  ;;  %v22890_v41 = vpop.f32.mrb[5].mxu1 }
 0x232   :  { %v22892_v57 = vpop.f32.mrb[6].mxu0  ;;  %v22894_v20 = vpop.f32.mrb[6].mxu1 }
 0x233   :  { %24077 = vst [vmem:[#allocation11_spill] sm:$0xff] %v22894_v20  ;;  %v22896_v34 = vpop.f32.mrb[7].mxu0  ;;  %v22898_v59 = vpop.f32.mrb[7].mxu1 }
 0x25e   :  { %v5266_v10 = vpop.f32.mrb[8].mxu1 }
 0x25f   :  { %v6240_v60 = vadd.f32 %v5266_v10, %v1662_v52  ;;  %v18473_v36 = vpop.f32.mrb[9].mxu1 }
 0x261   :  { %v6241_v42 = vmul.f32 0.5, %v6240_v60 }
 0x263   :  { %21521 = vtanh.f32 %v6241_v42 }
 0x26d   :  { %v21522_v31 = vpop.eup %21521 }
 0x26e   :  { %v6243_v63 = vmul.f32 0.5, %v21522_v31 }
 0x270   :  { %v6244_v56 = vadd.f32 0.5, %v6243_v63 }
 0x28e   :  { %v5751_v37 = vpop.f32.mrb[10].mxu1 }
 0x28f   :  { %v6245_v9 = vadd.f32 %v5751_v37, %v3188_v17  ;;  %v18539_v18 = vpop.f32.mrb[11].mxu1 }
 0x291   :  { %v6246_v39 = vmul.f32 0.5, %v6245_v9 }
 0x293   :  { %21523 = vtanh.f32 %v6246_v39 }
 0x29d   :  { %v21524_v58 = vpop.eup %21523 }
 0x29e   :  { %v6248_v61 = vmul.f32 0.5, %v21524_v58 }
 0x2a0   :  { %v6249_v10 = vadd.f32 0.5, %v6248_v61 }
 0x2a2   :  { %v6253_v37 = vsub.f32 1.0, %v6249_v10  ;;  %v6255_v42 = vmul.f32 0.0, %v6249_v10 }
 0x2be   :  { %v6236_v12 = vpop.f32.mrb[12].mxu1 }
 0x2bf   :  { %v21000_v30 = vadd.f32 %v22903_v35, %v6236_v12  ;;  %v18605_v46 = vpop.f32.mrb[13].mxu1 }
 0x2c1   :  { %v6250_v38 = vmul.f32 %v21000_v30, %v6244_v56 }
 0x2e6   :  { %v22906_v19 = vpop.f32.mrb[8].mxu0 }
 0x2e7   :  { %v4714_v40 = vpop.f32.mrb[9].mxu0 }
 0x2e8   :  { %v6251_v50 = vadd.f32 %v6250_v38, %v4714_v40 }
 0x2ea   :  { %21525 = vtanh.f32 %v6251_v50  ;;  %v22908_v16 = vpop.f32.mrb[10].mxu0 }
 0x2eb   :  { %v22910_v52 = vpop.f32.mrb[11].mxu0 }
 0x2ee   :  { %v22912_v17 = vpop.f32.mrb[12].mxu0 }
 0x2ef   :  { %v22914_v60 = vpop.f32.mrb[13].mxu0 }
 0x2f2   :  { %v22916_v36 = vpop.f32.mrb[14].mxu0 }
 0x2f3   :  { %24078 = vst [vmem:[#allocation5_spill] sm:$0xff] %v22916_v36  ;;  %v22918_v9 = vpop.f32.mrb[15].mxu0 }
 0x2f4   :  { %v21526_v18 = vpop.eup %21525 }
 0x2f5   :  { %v6254_v31 = vmul.f32 %v21526_v18, %v6253_v37 }
 0x2f7   :  { %v22920_v63 = vadd.f32 %v6255_v42, %v6254_v31 }
 0x2f9   :  { %6257 = vst.msk [vmem:[%s23985_s6] sm:$0xff] %vm4781_vm0, %v22920_v63  ;;  %v6259_v12 = vsel %vm4781_vm0, %v22920_v63, 0 }
 0x2fa   :  { %v22929_v30 = vand.u32 4294901760, %v6259_v12 }
 0x2fc   :  { %v22932_v46 = vsub.f32 %v6259_v12, %v22929_v30 }
 0x2fe   :  { %v22935_v56 = vand.u32 4294901760, %v22932_v46 }
 0x300   :  { %v6333_v38 = vsub.f32 %v22932_v46, %v22935_v56 }
 0x302   :  { %v22939_v39 = vand.u32 4294901760, %v6333_v38 }
 0x304   :  { %18615 = vmatmul.mubr.f32.vlgmr.msra.gmra.mrb[14].mxu1 %v22939_v39  ;;  %18681 = vmatmul.mubr.f32.vlgmr.msra.gmra.mrb[16].mxu0 %v22939_v39 }
 0x305   :  { %20252 = vmatpush3.bf16.msra.mxu1 %v22402_v28  ;;  %20288 = vmatpush3.bf16.msra.mxu0 %v22547_v4 }
 0x306   :  { %20253 = vmatprep.subr.bf16.mxu1 %v24047_v53  ;;  %20289 = vmatprep.subr.bf16.mxu0 %v24047_v53 }
 0x307   :  { %18625 = vmatprep.mubr.msk.f32.mxu1 %vm21600_vm2, %v24048_v32  ;;  %18691 = vmatprep.mubr.msk.f32.mxu0 %vm21600_vm2, %v24048_v32 }
 0x309   :  { %20255 = vmatpush3.bf16.msra.mxu1 %v22410_v11  ;;  %20291 = vmatpush3.bf16.msra.mxu0 %v22554_v6 }
 0x30a   :  { %20256 = vmatprep.subr.bf16.mxu1 %v24047_v53  ;;  %20292 = vmatprep.subr.bf16.mxu0 %v24047_v53 }
 0x30c   :  { %18626 = vmatmul.mubr.f32.vlgmr.msra.gmra.mrb[14].mxu1 %v22929_v30  ;;  %18692 = vmatmul.mubr.f32.vlgmr.msra.gmra.mrb[16].mxu0 %v22929_v30 }
 0x30d   :  { %20258 = vmatpush3.bf16.msra.mxu1 %v22420_v27  ;;  %20294 = vmatpush3.bf16.msra.mxu0 %v22565_v22 }
 0x30e   :  { %20259 = vmatprep.subr.bf16.mxu1 %v24047_v53  ;;  %20295 = vmatprep.subr.bf16.mxu0 %v24047_v53 }
 0x30f   :  { %18636 = vmatprep.mubr.msk.f32.mxu1 %vm21600_vm2, %v24048_v32  ;;  %18702 = vmatprep.mubr.msk.f32.mxu0 %vm21600_vm2, %v24048_v32 }
 0x311   :  { %20261 = vmatpush3.bf16.msra.mxu1 %v22429_v29  ;;  %20297 = vmatpush3.bf16.msra.mxu0 %v22580_v23 }
 0x312   :  { %20262 = vmatprep.subr.bf16.mxu1 %v24047_v53  ;;  %20298 = vmatprep.subr.bf16.mxu0 %v24047_v53 }
 0x314   :  { %18637 = vmatmul.mubr.f32.vlgmr.msra.gmra.mrb[14].mxu1 %v22932_v46  ;;  %18703 = vmatmul.mubr.f32.vlgmr.msra.gmra.mrb[16].mxu0 %v22932_v46 }
 0x315   :  { %20264 = vmatpush3.bf16.msra.mxu1 %v22342_v1  ;;  %20300 = vmatpush3.bf16.msra.mxu0 %v22516_v7 }
 0x316   :  { %20265 = vmatprep.subr.bf16.mxu1 %v24047_v53  ;;  %20301 = vmatprep.subr.bf16.mxu0 %v24047_v53 }
 0x317   :  { %18647 = vmatprep.mubr.msk.f32.mxu1 %vm21600_vm2, %v24048_v32  ;;  %18713 = vmatprep.mubr.msk.f32.mxu0 %vm21600_vm2, %v24048_v32 }
 0x319   :  { %20267 = vmatpush3.bf16.msra.mxu1 %v22360_v0  ;;  %20303 = vmatpush3.bf16.msra.mxu0 %v22531_v8 }
 0x31a   :  { %20268 = vmatprep.subr.bf16.mxu1 %v24047_v53  ;;  %20304 = vmatprep.subr.bf16.mxu0 %v24047_v53 }
 0x31c   :  { %18648 = vmatmul.mubr.f32.vlgmr.msra.gmra.mrb[14].mxu1 %v22935_v56  ;;  %18714 = vmatmul.mubr.f32.vlgmr.msra.gmra.mrb[16].mxu0 %v22935_v56 }
 0x31d   :  { %20270 = vmatpush3.bf16.msra.mxu1 %v22458_v14  ;;  %20306 = vmatpush3.bf16.msra.mxu0 %v22618_v44 }
 0x31e   :  { %20271 = vmatprep.subr.bf16.mxu1 %v24047_v53  ;;  %20307 = vmatprep.subr.bf16.mxu0 %v24047_v53 }
 0x31f   :  { %18658 = vmatprep.mubr.msk.f32.mxu1 %vm21600_vm2, %v24048_v32  ;;  %18724 = vmatprep.mubr.msk.f32.mxu0 %vm21600_vm2, %v24048_v32 }
 0x321   :  { %20273 = vmatpush3.bf16.msra.mxu1 %v22477_v49  ;;  %20309 = vmatpush3.bf16.msra.mxu0 %v22643_v51 }
 0x322   :  { %20274 = vmatprep.subr.bf16.mxu1 %v24047_v53  ;;  %20310 = vmatprep.subr.bf16.mxu0 %v24047_v53 }
 0x324   :  { %18659 = vmatmul.mubr.f32.vlgmr.msra.gmra.mrb[14].mxu1 %v22929_v30  ;;  %18725 = vmatmul.mubr.f32.vlgmr.msra.gmra.mrb[16].mxu0 %v22929_v30 }
 0x325   :  { %20276 = vmatpush3.bf16.msra.mxu1 %v22342_v1  ;;  %20312 = vmatpush3.bf16.msra.mxu0 %v22516_v7 }
 0x326   :  { %20277 = vmatprep.subr.bf16.mxu1 %v24047_v53  ;;  %20313 = vmatprep.subr.bf16.mxu0 %v24047_v53 }
 0x327   :  { %18669 = vmatprep.mubr.msk.f32.mxu1 %vm21600_vm2, %v24048_v32  ;;  %18735 = vmatprep.mubr.msk.f32.mxu0 %vm21600_vm2, %v24048_v32 }
 0x329   :  { %20279 = vmatpush3.bf16.msra.mxu1 %v22360_v0  ;;  %20315 = vmatpush3.bf16.msra.mxu0 %v22531_v8 }
 0x32a   :  { %20316 = vmatprep.subr.bf16.mxu1 %v24047_v53  ;;  %20352 = vmatprep.subr.bf16.mxu0 %v24047_v53 }
 0x32c   :  { %18670 = vmatmul.mubr.f32.vlgmr.msra.gmra.mrb[14].mxu1 %v22929_v30  ;;  %18736 = vmatmul.mubr.f32.vlgmr.msra.gmra.mrb[16].mxu0 %v22929_v30 }
 0x32d   :  { %20318 = vmatpush3.bf16.msra.mxu1 %v22682_v54  ;;  %18746 = vmatprep.mubr.msk.f32.mxu1 %vm21600_vm2, %v24048_v32 }
 0x32e   :  { %20319 = vmatprep.subr.bf16.mxu1 %v24047_v53  ;;  %20354 = vmatpush3.bf16.msra.mxu0 %v22342_v1 }
 0x32f   :  { %20355 = vmatprep.subr.bf16.mxu0 %v24047_v53  ;;  %18812 = vmatprep.mubr.msk.f32.mxu0 %vm21600_vm2, %v24048_v32 }
 0x331   :  { %20321 = vmatpush3.bf16.msra.mxu1 %v22699_v62 }
 0x332   :  { %20322 = vmatprep.subr.bf16.mxu1 %v24047_v53  ;;  %20357 = vmatpush3.bf16.msra.mxu0 %v22360_v0 }
 0x333   :  { %20358 = vmatprep.subr.bf16.mxu0 %v24047_v53 }
 0x334   :  { %18747 = vmatmul.mubr.f32.vlgmr.msra.gmra.mrb[16].mxu1 %v22939_v39 }
 0x335   :  { %20324 = vmatpush3.bf16.msra.mxu1 %v22717_v26  ;;  %18757 = vmatprep.mubr.msk.f32.mxu1 %vm21600_vm2, %v24048_v32 }
 0x336   :  { %20325 = vmatprep.subr.bf16.mxu1 %v24047_v53 }
 0x339   :  { %20327 = vmatpush3.bf16.msra.mxu1 %v22726_v25 }
 0x33a   :  { %20328 = vmatprep.subr.bf16.mxu1 %v24047_v53 }
 0x33c   :  { %18758 = vmatmul.mubr.f32.vlgmr.msra.gmra.mrb[16].mxu1 %v22929_v30 }
 0x33d   :  { %20330 = vmatpush3.bf16.msra.mxu1 %v22736_v5  ;;  %18768 = vmatprep.mubr.msk.f32.mxu1 %vm21600_vm2, %v24048_v32 }
 0x33e   :  { %20331 = vmatprep.subr.bf16.mxu1 %v24047_v53 }
 0x341   :  { %20333 = vmatpush3.bf16.msra.mxu1 %v22745_v2 }
 0x342   :  { %20334 = vmatprep.subr.bf16.mxu1 %v24047_v53 }
 0x344   :  { %18769 = vmatmul.mubr.f32.vlgmr.msra.gmra.mrb[16].mxu1 %v22932_v46 }
 0x345   :  { %20336 = vmatpush3.bf16.msra.mxu1 %v22682_v54  ;;  %18779 = vmatprep.mubr.msk.f32.mxu1 %vm21600_vm2, %v24048_v32 }
 0x346   :  { %20337 = vmatprep.subr.bf16.mxu1 %v24047_v53 }
 0x349   :  { %20339 = vmatpush3.bf16.msra.mxu1 %v22699_v62 }
 0x34a   :  { %20340 = vmatprep.subr.bf16.mxu1 %v24047_v53 }
 0x34c   :  { %18780 = vmatmul.mubr.f32.vlgmr.msra.gmra.mrb[16].mxu1 %v22935_v56 }
 0x34d   :  { %20342 = vmatpush3.bf16.msra.mxu1 %v22774_v15  ;;  %18790 = vmatprep.mubr.msk.f32.mxu1 %vm21600_vm2, %v24048_v32 }
 0x34e   :  { %20343 = vmatprep.subr.bf16.mxu1 %v24047_v53 }
 0x351   :  { %20345 = vmatpush3.bf16.msra.mxu1 %v22787_v13 }
 0x352   :  { %20346 = vmatprep.subr.bf16.mxu1 %v24047_v53 }
 0x354   :  { %18791 = vmatmul.mubr.f32.vlgmr.msra.gmra.mrb[16].mxu1 %v22929_v30 }
 0x355   :  { %20348 = vmatpush3.bf16.msra.mxu1 %v22682_v54  ;;  %18801 = vmatprep.mubr.msk.f32.mxu1 %vm21600_vm2, %v24048_v32 }
 0x356   :  { %20349 = vmatprep.subr.bf16.mxu1 %v24047_v53 }
 0x359   :  { %20351 = vmatpush3.bf16.msra.mxu1 %v22699_v62 }
 0x35a   :  { %20388 = vmatprep.subr.bf16.mxu1 %v24047_v53 }
 0x35c   :  { %18802 = vmatmul.mubr.f32.vlgmr.msra.gmra.mrb[16].mxu1 %v22929_v30 }
 0x35d   :  { %20390 = vmatpush3.bf16.msra.mxu1 %v22516_v7  ;;  %18878 = vmatprep.mubr.msk.f32.mxu1 %vm21600_vm2, %v24048_v32 }
 0x35e   :  { %20391 = vmatprep.subr.bf16.mxu1 %v24047_v53 }
 0x361   :  { %20393 = vmatpush3.bf16.msra.mxu1 %v22531_v8 }
 0x362   :  { %20394 = vmatprep.subr.bf16.mxu1 %v24047_v53 }
 0x3ff   :  { %v6742_v40 = vpop.f32.mrb[14].mxu1  ;;  %v7227_v58 = vpop.f32.mrb[16].mxu0 }
 0x400   :  { %v7716_v50 = vadd.f32 %v22872_v33, %v6742_v40  ;;  %v7721_v61 = vadd.f32 %v22874_v48, %v7227_v58  ;;  %v18671_v10 = vpop.f32.mrb[15].mxu1  ;;  %v18737_v37 = vpop.f32.mrb[17].mxu0 }
 0x402   :  { %v7717_v18 = vmul.f32 0.5, %v7716_v50  ;;  %v7722_v42 = vmul.f32 0.5, %v7721_v61 }
 0x404   :  { %21527 = vtanh.f32 %v7717_v18 }
 0x405   :  { %21529 = vtanh.f32 %v7722_v42 }
 0x40e   :  { %v21528_v31 = vpop.eup %21527 }
 0x40f   :  { %v7719_v12 = vmul.f32 0.5, %v21528_v31  ;;  %v21530_v36 = vpop.eup %21529 }
 0x410   :  { %v7724_v33 = vmul.f32 0.5, %v21530_v36 }
 0x411   :  { %v7720_v56 = vadd.f32 0.5, %v7719_v12 }
 0x412   :  { %v7725_v48 = vadd.f32 0.5, %v7724_v33 }
 0x414   :  { %v7729_v40 = vsub.f32 1.0, %v7725_v48  ;;  %v7731_v50 = vmul.f32 %v7725_v48, %v22920_v63 }
 0x42f   :  { %v7712_v30 = vpop.f32.mrb[16].mxu1 }
 0x430   :  { %v21001_v46 = vadd.f32 %v22903_v35, %v7712_v30  ;;  %v18803_v38 = vpop.f32.mrb[17].mxu1 }
 0x432   :  { %v7726_v39 = vmul.f32 %v21001_v46, %v7720_v56 }
 0x434   :  { %v7727_v20 = vadd.f32 %v22906_v19, %v7726_v39 }
 0x436   :  { %21531 = vtanh.f32 %v7727_v20 }
 0x440   :  { %v21532_v58 = vpop.eup %21531 }
 0x441   :  { %v7730_v61 = vmul.f32 %v21532_v58, %v7729_v40 }
 0x443   :  { %v23072_v10 = vadd.f32 %v7731_v50, %v7730_v61 }
 0x445   :  { %7733 = vst.msk [vmem:[%s23985_s6 + $0x8] sm:$0xff] %vm4781_vm0, %v23072_v10  ;;  %v7735_v37 = vsel %vm4781_vm0, %v23072_v10, 0 }
 0x446   :  { %v23081_v19 = vand.u32 4294901760, %v7735_v37 }
 0x448   :  { %v23084_v20 = vsub.f32 %v7735_v37, %v23081_v19 }
 0x44a   :  { %v23087_v36 = vand.u32 4294901760, %v23084_v20 }
 0x44c   :  { %v7809_v63 = vsub.f32 %v23084_v20, %v23087_v36 }
 0x44e   :  { %v23091_v18 = vand.u32 4294901760, %v7809_v63 }
 0x450   :  { %18813 = vmatmul.mubr.f32.vlgmr.msra.gmra.mrb[18].mxu0 %v23091_v18  ;;  %18879 = vmatmul.mubr.f32.vlgmr.msra.gmra.mrb[18].mxu1 %v23091_v18 }
 0x451   :  { %20360 = vmatpush3.bf16.msra.mxu0 %v22402_v28  ;;  %20396 = vmatpush3.bf16.msra.mxu1 %v22547_v4 }
 0x452   :  { %20361 = vmatprep.subr.bf16.mxu0 %v24047_v53  ;;  %20397 = vmatprep.subr.bf16.mxu1 %v24047_v53 }
 0x453   :  { %18823 = vmatprep.mubr.msk.f32.mxu0 %vm21600_vm2, %v24048_v32  ;;  %18889 = vmatprep.mubr.msk.f32.mxu1 %vm21600_vm2, %v24048_v32 }
 0x455   :  { %20363 = vmatpush3.bf16.msra.mxu0 %v22410_v11  ;;  %20399 = vmatpush3.bf16.msra.mxu1 %v22554_v6 }
 0x456   :  { %20364 = vmatprep.subr.bf16.mxu0 %v24047_v53  ;;  %20400 = vmatprep.subr.bf16.mxu1 %v24047_v53 }
 0x458   :  { %18824 = vmatmul.mubr.f32.vlgmr.msra.gmra.mrb[18].mxu0 %v23081_v19  ;;  %18890 = vmatmul.mubr.f32.vlgmr.msra.gmra.mrb[18].mxu1 %v23081_v19 }
 0x459   :  { %20366 = vmatpush3.bf16.msra.mxu0 %v22420_v27  ;;  %20402 = vmatpush3.bf16.msra.mxu1 %v22565_v22 }
 0x45a   :  { %20367 = vmatprep.subr.bf16.mxu0 %v24047_v53  ;;  %20403 = vmatprep.subr.bf16.mxu1 %v24047_v53 }
 0x45b   :  { %18834 = vmatprep.mubr.msk.f32.mxu0 %vm21600_vm2, %v24048_v32  ;;  %18900 = vmatprep.mubr.msk.f32.mxu1 %vm21600_vm2, %v24048_v32 }
 0x45d   :  { %20369 = vmatpush3.bf16.msra.mxu0 %v22429_v29  ;;  %20405 = vmatpush3.bf16.msra.mxu1 %v22580_v23 }
 0x45e   :  { %20370 = vmatprep.subr.bf16.mxu0 %v24047_v53  ;;  %20406 = vmatprep.subr.bf16.mxu1 %v24047_v53 }
 0x460   :  { %18835 = vmatmul.mubr.f32.vlgmr.msra.gmra.mrb[18].mxu0 %v23084_v20  ;;  %18901 = vmatmul.mubr.f32.vlgmr.msra.gmra.mrb[18].mxu1 %v23084_v20 }
 0x461   :  { %20372 = vmatpush3.bf16.msra.mxu0 %v22342_v1  ;;  %20408 = vmatpush3.bf16.msra.mxu1 %v22516_v7 }
 0x462   :  { %20373 = vmatprep.subr.bf16.mxu0 %v24047_v53  ;;  %20409 = vmatprep.subr.bf16.mxu1 %v24047_v53 }
 0x463   :  { %18845 = vmatprep.mubr.msk.f32.mxu0 %vm21600_vm2, %v24048_v32  ;;  %18911 = vmatprep.mubr.msk.f32.mxu1 %vm21600_vm2, %v24048_v32 }
 0x465   :  { %20375 = vmatpush3.bf16.msra.mxu0 %v22360_v0  ;;  %20411 = vmatpush3.bf16.msra.mxu1 %v22531_v8 }
 0x466   :  { %20376 = vmatprep.subr.bf16.mxu0 %v24047_v53  ;;  %20412 = vmatprep.subr.bf16.mxu1 %v24047_v53 }
 0x468   :  { %18846 = vmatmul.mubr.f32.vlgmr.msra.gmra.mrb[18].mxu0 %v23087_v36  ;;  %18912 = vmatmul.mubr.f32.vlgmr.msra.gmra.mrb[18].mxu1 %v23087_v36 }
 0x469   :  { %20378 = vmatpush3.bf16.msra.mxu0 %v22458_v14  ;;  %20414 = vmatpush3.bf16.msra.mxu1 %v22618_v44 }
 0x46a   :  { %20379 = vmatprep.subr.bf16.mxu0 %v24047_v53  ;;  %20415 = vmatprep.subr.bf16.mxu1 %v24047_v53 }
 0x46b   :  { %18856 = vmatprep.mubr.msk.f32.mxu0 %vm21600_vm2, %v24048_v32  ;;  %18922 = vmatprep.mubr.msk.f32.mxu1 %vm21600_vm2, %v24048_v32 }
 0x46d   :  { %20381 = vmatpush3.bf16.msra.mxu0 %v22477_v49  ;;  %20417 = vmatpush3.bf16.msra.mxu1 %v22643_v51 }
 0x46e   :  { %20382 = vmatprep.subr.bf16.mxu0 %v24047_v53  ;;  %20418 = vmatprep.subr.bf16.mxu1 %v24047_v53 }
 0x470   :  { %18857 = vmatmul.mubr.f32.vlgmr.msra.gmra.mrb[18].mxu0 %v23081_v19  ;;  %18923 = vmatmul.mubr.f32.vlgmr.msra.gmra.mrb[18].mxu1 %v23081_v19 }
 0x471   :  { %20384 = vmatpush3.bf16.msra.mxu0 %v22342_v1  ;;  %20420 = vmatpush3.bf16.msra.mxu1 %v22516_v7 }
 0x472   :  { %20385 = vmatprep.subr.bf16.mxu0 %v24047_v53  ;;  %20421 = vmatprep.subr.bf16.mxu1 %v24047_v53 }
 0x473   :  { %18867 = vmatprep.mubr.msk.f32.mxu0 %vm21600_vm2, %v24048_v32  ;;  %18933 = vmatprep.mubr.msk.f32.mxu1 %vm21600_vm2, %v24048_v32 }
 0x475   :  { %20387 = vmatpush3.bf16.msra.mxu0 %v22360_v0  ;;  %20423 = vmatpush3.bf16.msra.mxu1 %v22531_v8 }
 0x476   :  { %20424 = vmatprep.subr.bf16.mxu0 %v24047_v53  ;;  %20460 = vmatprep.subr.bf16.mxu1 %v24047_v53 }
 0x478   :  { %18868 = vmatmul.mubr.f32.vlgmr.msra.gmra.mrb[18].mxu0 %v23081_v19  ;;  %18934 = vmatmul.mubr.f32.vlgmr.msra.gmra.mrb[18].mxu1 %v23081_v19 }
 0x479   :  { %20426 = vmatpush3.bf16.msra.mxu0 %v22682_v54  ;;  %18944 = vmatprep.mubr.msk.f32.mxu0 %vm21600_vm2, %v24048_v32 }
 0x47a   :  { %20427 = vmatprep.subr.bf16.mxu0 %v24047_v53  ;;  %20462 = vmatpush3.bf16.msra.mxu1 %v22342_v1 }
 0x47b   :  { %20463 = vmatprep.subr.bf16.mxu1 %v24047_v53  ;;  %19010 = vmatprep.mubr.msk.f32.mxu1 %vm21600_vm2, %v24048_v32 }
 0x47d   :  { %20429 = vmatpush3.bf16.msra.mxu0 %v22699_v62 }
 0x47e   :  { %20430 = vmatprep.subr.bf16.mxu0 %v24047_v53  ;;  %20465 = vmatpush3.bf16.msra.mxu1 %v22360_v0 }
 0x47f   :  { %20466 = vmatprep.subr.bf16.mxu1 %v24047_v53 }
 0x480   :  { %18945 = vmatmul.mubr.f32.vlgmr.msra.gmra.mrb[20].mxu0 %v23091_v18 }
 0x481   :  { %20432 = vmatpush3.bf16.msra.mxu0 %v22717_v26  ;;  %18955 = vmatprep.mubr.msk.f32.mxu0 %vm21600_vm2, %v24048_v32 }
 0x482   :  { %20433 = vmatprep.subr.bf16.mxu0 %v24047_v53 }
 0x485   :  { %20435 = vmatpush3.bf16.msra.mxu0 %v22726_v25 }
 0x486   :  { %20436 = vmatprep.subr.bf16.mxu0 %v24047_v53 }
 0x488   :  { %18956 = vmatmul.mubr.f32.vlgmr.msra.gmra.mrb[20].mxu0 %v23081_v19 }
 0x489   :  { %20438 = vmatpush3.bf16.msra.mxu0 %v22736_v5  ;;  %18966 = vmatprep.mubr.msk.f32.mxu0 %vm21600_vm2, %v24048_v32 }
 0x48a   :  { %20439 = vmatprep.subr.bf16.mxu0 %v24047_v53 }
 0x48d   :  { %20441 = vmatpush3.bf16.msra.mxu0 %v22745_v2 }
 0x48e   :  { %20442 = vmatprep.subr.bf16.mxu0 %v24047_v53 }
 0x490   :  { %18967 = vmatmul.mubr.f32.vlgmr.msra.gmra.mrb[20].mxu0 %v23084_v20 }
 0x491   :  { %20444 = vmatpush3.bf16.msra.mxu0 %v22682_v54  ;;  %18977 = vmatprep.mubr.msk.f32.mxu0 %vm21600_vm2, %v24048_v32 }
 0x492   :  { %20445 = vmatprep.subr.bf16.mxu0 %v24047_v53 }
 0x495   :  { %20447 = vmatpush3.bf16.msra.mxu0 %v22699_v62 }
 0x496   :  { %20448 = vmatprep.subr.bf16.mxu0 %v24047_v53 }
 0x498   :  { %18978 = vmatmul.mubr.f32.vlgmr.msra.gmra.mrb[20].mxu0 %v23087_v36 }
 0x499   :  { %20450 = vmatpush3.bf16.msra.mxu0 %v22774_v15  ;;  %18988 = vmatprep.mubr.msk.f32.mxu0 %vm21600_vm2, %v24048_v32 }
 0x49a   :  { %20451 = vmatprep.subr.bf16.mxu0 %v24047_v53 }
 0x49d   :  { %20453 = vmatpush3.bf16.msra.mxu0 %v22787_v13 }
 0x49e   :  { %20454 = vmatprep.subr.bf16.mxu0 %v24047_v53 }
 0x4a0   :  { %18989 = vmatmul.mubr.f32.vlgmr.msra.gmra.mrb[20].mxu0 %v23081_v19 }
 0x4a1   :  { %20456 = vmatpush3.bf16.msra.mxu0 %v22682_v54  ;;  %18999 = vmatprep.mubr.msk.f32.mxu0 %vm21600_vm2, %v24048_v32 }
 0x4a2   :  { %20457 = vmatprep.subr.bf16.mxu0 %v24047_v53 }
 0x4a5   :  { %20459 = vmatpush3.bf16.msra.mxu0 %v22699_v62 }
 0x4a6   :  { %20496 = vmatprep.subr.bf16.mxu0 %v24047_v53 }
 0x4a8   :  { %19000 = vmatmul.mubr.f32.vlgmr.msra.gmra.mrb[20].mxu0 %v23081_v19 }
 0x4a9   :  { %20498 = vmatpush3.bf16.msra.mxu0 %v22516_v7  ;;  %19076 = vmatprep.mubr.msk.f32.mxu0 %vm21600_vm2, %v24048_v32 }
 0x4aa   :  { %20499 = vmatprep.subr.bf16.mxu0 %v24047_v53 }
 0x4ad   :  { %20501 = vmatpush3.bf16.msra.mxu0 %v22531_v8 }
 0x4ae   :  { %20502 = vmatprep.subr.bf16.mxu0 %v24047_v53 }
 0x54b   :  { %v8218_v42 = vpop.f32.mrb[18].mxu0  ;;  %v8703_v31 = vpop.f32.mrb[18].mxu1 }
 0x54c   :  { %v9192_v12 = vadd.f32 %v8218_v42, %v22880_v45  ;;  %v9197_v30 = vadd.f32 %v8703_v31, %v22882_v43  ;;  %v18869_v46 = vpop.f32.mrb[19].mxu0  ;;  %v18935_v56 = vpop.f32.mrb[19].mxu1 }
 0x54e   :  { %v9193_v38 = vmul.f32 0.5, %v9192_v12  ;;  %v9198_v39 = vmul.f32 0.5, %v9197_v30 }
 0x550   :  { %21533 = vtanh.f32 %v9193_v38 }
 0x551   :  { %21535 = vtanh.f32 %v9198_v39 }
 0x55a   :  { %v21534_v33 = vpop.eup %21533 }
 0x55b   :  { %v9195_v48 = vmul.f32 0.5, %v21534_v33  ;;  %v21536_v19 = vpop.eup %21535 }
 0x55c   :  { %v9200_v45 = vmul.f32 0.5, %v21536_v19 }
 0x55d   :  { %v9196_v50 = vadd.f32 0.5, %v9195_v48 }
 0x55e   :  { %v9201_v43 = vadd.f32 0.5, %v9200_v45 }
 0x560   :  { %v9205_v36 = vsub.f32 1.0, %v9201_v43  ;;  %v9207_v18 = vmul.f32 %v9201_v43, %v23072_v10 }
 0x57b   :  { %v9188_v40 = vpop.f32.mrb[20].mxu0 }
 0x57c   :  { %v21002_v58 = vadd.f32 %v22903_v35, %v9188_v40  ;;  %v19001_v61 = vpop.f32.mrb[21].mxu0 }
 0x57e   :  { %v9202_v37 = vmul.f32 %v21002_v58, %v9196_v50 }
 0x580   :  { %v9203_v20 = vadd.f32 %v9202_v37, %v22910_v52 }
 0x582   :  { %21537 = vtanh.f32 %v9203_v20 }
 0x58c   :  { %v21538_v63 = vpop.eup %21537 }
 0x58d   :  { %v9206_v42 = vmul.f32 %v21538_v63, %v9205_v36 }
 0x58f   :  { %v23224_v31 = vadd.f32 %v9207_v18, %v9206_v42 }
 0x591   :  { %9209 = vst.msk [vmem:[%s23985_s6 + $0x10] sm:$0xff] %vm4781_vm0, %v23224_v31  ;;  %v9211_v12 = vsel %vm4781_vm0, %v23224_v31, 0 }
 0x592   :  { %v23233_v52 = vand.u32 4294901760, %v9211_v12 }
 0x594   :  { %v23236_v30 = vsub.f32 %v9211_v12, %v23233_v52 }
 0x596   :  { %v23239_v46 = vand.u32 4294901760, %v23236_v30 }
 0x598   :  { %v9285_v10 = vsub.f32 %v23236_v30, %v23239_v46 }
 0x59a   :  { %v23243_v56 = vand.u32 4294901760, %v9285_v10 }
 0x59c   :  { %19011 = vmatmul.mubr.f32.vlgmr.msra.gmra.mrb[20].mxu1 %v23243_v56  ;;  %19077 = vmatmul.mubr.f32.vlgmr.msra.gmra.mrb[22].mxu0 %v23243_v56 }
 0x59d   :  { %20468 = vmatpush3.bf16.msra.mxu1 %v22402_v28  ;;  %20504 = vmatpush3.bf16.msra.mxu0 %v22547_v4 }
 0x59e   :  { %20469 = vmatprep.subr.bf16.mxu1 %v24047_v53  ;;  %20505 = vmatprep.subr.bf16.mxu0 %v24047_v53 }
 0x59f   :  { %19021 = vmatprep.mubr.msk.f32.mxu1 %vm21600_vm2, %v24048_v32  ;;  %19087 = vmatprep.mubr.msk.f32.mxu0 %vm21600_vm2, %v24048_v32 }
 0x5a1   :  { %20471 = vmatpush3.bf16.msra.mxu1 %v22410_v11  ;;  %20507 = vmatpush3.bf16.msra.mxu0 %v22554_v6 }
 0x5a2   :  { %20472 = vmatprep.subr.bf16.mxu1 %v24047_v53  ;;  %20508 = vmatprep.subr.bf16.mxu0 %v24047_v53 }
 0x5a4   :  { %19022 = vmatmul.mubr.f32.vlgmr.msra.gmra.mrb[20].mxu1 %v23233_v52  ;;  %19088 = vmatmul.mubr.f32.vlgmr.msra.gmra.mrb[22].mxu0 %v23233_v52 }
 0x5a5   :  { %20474 = vmatpush3.bf16.msra.mxu1 %v22420_v27  ;;  %20510 = vmatpush3.bf16.msra.mxu0 %v22565_v22 }
 0x5a6   :  { %20475 = vmatprep.subr.bf16.mxu1 %v24047_v53  ;;  %20511 = vmatprep.subr.bf16.mxu0 %v24047_v53 }
 0x5a7   :  { %19032 = vmatprep.mubr.msk.f32.mxu1 %vm21600_vm2, %v24048_v32  ;;  %19098 = vmatprep.mubr.msk.f32.mxu0 %vm21600_vm2, %v24048_v32 }
 0x5a9   :  { %20477 = vmatpush3.bf16.msra.mxu1 %v22429_v29  ;;  %20513 = vmatpush3.bf16.msra.mxu0 %v22580_v23 }
 0x5aa   :  { %20478 = vmatprep.subr.bf16.mxu1 %v24047_v53  ;;  %20514 = vmatprep.subr.bf16.mxu0 %v24047_v53 }
 0x5ac   :  { %19033 = vmatmul.mubr.f32.vlgmr.msra.gmra.mrb[20].mxu1 %v23236_v30  ;;  %19099 = vmatmul.mubr.f32.vlgmr.msra.gmra.mrb[22].mxu0 %v23236_v30 }
 0x5ad   :  { %20480 = vmatpush3.bf16.msra.mxu1 %v22342_v1  ;;  %20516 = vmatpush3.bf16.msra.mxu0 %v22516_v7 }
 0x5ae   :  { %20481 = vmatprep.subr.bf16.mxu1 %v24047_v53  ;;  %20517 = vmatprep.subr.bf16.mxu0 %v24047_v53 }
 0x5af   :  { %19043 = vmatprep.mubr.msk.f32.mxu1 %vm21600_vm2, %v24048_v32  ;;  %19109 = vmatprep.mubr.msk.f32.mxu0 %vm21600_vm2, %v24048_v32 }
 0x5b1   :  { %20483 = vmatpush3.bf16.msra.mxu1 %v22360_v0  ;;  %20519 = vmatpush3.bf16.msra.mxu0 %v22531_v8 }
 0x5b2   :  { %20484 = vmatprep.subr.bf16.mxu1 %v24047_v53  ;;  %20520 = vmatprep.subr.bf16.mxu0 %v24047_v53 }
 0x5b4   :  { %19044 = vmatmul.mubr.f32.vlgmr.msra.gmra.mrb[20].mxu1 %v23239_v46  ;;  %19110 = vmatmul.mubr.f32.vlgmr.msra.gmra.mrb[22].mxu0 %v23239_v46 }
 0x5b5   :  { %20486 = vmatpush3.bf16.msra.mxu1 %v22458_v14  ;;  %20522 = vmatpush3.bf16.msra.mxu0 %v22618_v44 }
 0x5b6   :  { %20487 = vmatprep.subr.bf16.mxu1 %v24047_v53  ;;  %20523 = vmatprep.subr.bf16.mxu0 %v24047_v53 }
 0x5b7   :  { %19054 = vmatprep.mubr.msk.f32.mxu1 %vm21600_vm2, %v24048_v32  ;;  %19120 = vmatprep.mubr.msk.f32.mxu0 %vm21600_vm2, %v24048_v32 }
 0x5b9   :  { %20489 = vmatpush3.bf16.msra.mxu1 %v22477_v49  ;;  %20525 = vmatpush3.bf16.msra.mxu0 %v22643_v51 }
 0x5ba   :  { %20490 = vmatprep.subr.bf16.mxu1 %v24047_v53  ;;  %20526 = vmatprep.subr.bf16.mxu0 %v24047_v53 }
 0x5bc   :  { %19055 = vmatmul.mubr.f32.vlgmr.msra.gmra.mrb[20].mxu1 %v23233_v52  ;;  %19121 = vmatmul.mubr.f32.vlgmr.msra.gmra.mrb[22].mxu0 %v23233_v52 }
 0x5bd   :  { %20492 = vmatpush3.bf16.msra.mxu1 %v22342_v1  ;;  %20528 = vmatpush3.bf16.msra.mxu0 %v22516_v7 }
 0x5be   :  { %20493 = vmatprep.subr.bf16.mxu1 %v24047_v53  ;;  %20529 = vmatprep.subr.bf16.mxu0 %v24047_v53 }
 0x5bf   :  { %19065 = vmatprep.mubr.msk.f32.mxu1 %vm21600_vm2, %v24048_v32  ;;  %19131 = vmatprep.mubr.msk.f32.mxu0 %vm21600_vm2, %v24048_v32 }
 0x5c1   :  { %20495 = vmatpush3.bf16.msra.mxu1 %v22360_v0  ;;  %20531 = vmatpush3.bf16.msra.mxu0 %v22531_v8 }
 0x5c2   :  { %20532 = vmatprep.subr.bf16.mxu1 %v24047_v53  ;;  %20568 = vmatprep.subr.bf16.mxu0 %v24047_v53 }
 0x5c4   :  { %19066 = vmatmul.mubr.f32.vlgmr.msra.gmra.mrb[20].mxu1 %v23233_v52  ;;  %19132 = vmatmul.mubr.f32.vlgmr.msra.gmra.mrb[22].mxu0 %v23233_v52 }
 0x5c5   :  { %20534 = vmatpush3.bf16.msra.mxu1 %v22682_v54  ;;  %19142 = vmatprep.mubr.msk.f32.mxu1 %vm21600_vm2, %v24048_v32 }
 0x5c6   :  { %20535 = vmatprep.subr.bf16.mxu1 %v24047_v53  ;;  %20570 = vmatpush3.bf16.msra.mxu0 %v22342_v1 }
 0x5c7   :  { %20571 = vmatprep.subr.bf16.mxu0 %v24047_v53  ;;  %19208 = vmatprep.mubr.msk.f32.mxu0 %vm21600_vm2, %v24048_v32 }
 0x5c9   :  { %20537 = vmatpush3.bf16.msra.mxu1 %v22699_v62 }
 0x5ca   :  { %20538 = vmatprep.subr.bf16.mxu1 %v24047_v53  ;;  %20573 = vmatpush3.bf16.msra.mxu0 %v22360_v0 }
 0x5cb   :  { %20574 = vmatprep.subr.bf16.mxu0 %v24047_v53 }
 0x5cc   :  { %19143 = vmatmul.mubr.f32.vlgmr.msra.gmra.mrb[22].mxu1 %v23243_v56 }
 0x5cd   :  { %20540 = vmatpush3.bf16.msra.mxu1 %v22717_v26  ;;  %19153 = vmatprep.mubr.msk.f32.mxu1 %vm21600_vm2, %v24048_v32 }
 0x5ce   :  { %20541 = vmatprep.subr.bf16.mxu1 %v24047_v53 }
 0x5d1   :  { %20543 = vmatpush3.bf16.msra.mxu1 %v22726_v25 }
 0x5d2   :  { %20544 = vmatprep.subr.bf16.mxu1 %v24047_v53 }
 0x5d4   :  { %19154 = vmatmul.mubr.f32.vlgmr.msra.gmra.mrb[22].mxu1 %v23233_v52 }
 0x5d5   :  { %20546 = vmatpush3.bf16.msra.mxu1 %v22736_v5  ;;  %19164 = vmatprep.mubr.msk.f32.mxu1 %vm21600_vm2, %v24048_v32 }
 0x5d6   :  { %20547 = vmatprep.subr.bf16.mxu1 %v24047_v53 }
 0x5d9   :  { %20549 = vmatpush3.bf16.msra.mxu1 %v22745_v2 }
 0x5da   :  { %20550 = vmatprep.subr.bf16.mxu1 %v24047_v53 }
 0x5dc   :  { %19165 = vmatmul.mubr.f32.vlgmr.msra.gmra.mrb[22].mxu1 %v23236_v30 }
 0x5dd   :  { %20552 = vmatpush3.bf16.msra.mxu1 %v22682_v54  ;;  %19175 = vmatprep.mubr.msk.f32.mxu1 %vm21600_vm2, %v24048_v32 }
 0x5de   :  { %20553 = vmatprep.subr.bf16.mxu1 %v24047_v53 }
 0x5e1   :  { %20555 = vmatpush3.bf16.msra.mxu1 %v22699_v62 }
 0x5e2   :  { %20556 = vmatprep.subr.bf16.mxu1 %v24047_v53 }
 0x5e4   :  { %19176 = vmatmul.mubr.f32.vlgmr.msra.gmra.mrb[22].mxu1 %v23239_v46 }
 0x5e5   :  { %20558 = vmatpush3.bf16.msra.mxu1 %v22774_v15  ;;  %19186 = vmatprep.mubr.msk.f32.mxu1 %vm21600_vm2, %v24048_v32 }
 0x5e6   :  { %20559 = vmatprep.subr.bf16.mxu1 %v24047_v53 }
 0x5e9   :  { %20561 = vmatpush3.bf16.msra.mxu1 %v22787_v13 }
 0x5ea   :  { %20562 = vmatprep.subr.bf16.mxu1 %v24047_v53 }
 0x5ec   :  { %19187 = vmatmul.mubr.f32.vlgmr.msra.gmra.mrb[22].mxu1 %v23233_v52 }
 0x5ed   :  { %20564 = vmatpush3.bf16.msra.mxu1 %v22682_v54  ;;  %19197 = vmatprep.mubr.msk.f32.mxu1 %vm21600_vm2, %v24048_v32 }
 0x5ee   :  { %20565 = vmatprep.subr.bf16.mxu1 %v24047_v53 }
 0x5f1   :  { %20567 = vmatpush3.bf16.msra.mxu1 %v22699_v62 }
 0x5f2   :  { %20604 = vmatprep.subr.bf16.mxu1 %v24047_v53 }
 0x5f4   :  { %19198 = vmatmul.mubr.f32.vlgmr.msra.gmra.mrb[22].mxu1 %v23233_v52 }
 0x5f5   :  { %20606 = vmatpush3.bf16.msra.mxu1 %v22516_v7  ;;  %19274 = vmatprep.mubr.msk.f32.mxu1 %vm21600_vm2, %v24048_v32 }
 0x5f6   :  { %20607 = vmatprep.subr.bf16.mxu1 %v24047_v53 }
 0x5f9   :  { %20609 = vmatpush3.bf16.msra.mxu1 %v22531_v8 }
 0x5fa   :  { %20610 = vmatprep.subr.bf16.mxu1 %v24047_v53 }
 0x697   :  { %v9694_v38 = vpop.f32.mrb[20].mxu1  ;;  %v10179_v39 = vpop.f32.mrb[22].mxu0 }
 0x698   :  { %v10668_v33 = vadd.f32 %v22876_v24, %v9694_v38  ;;  %v10673_v48 = vadd.f32 %v22878_v3, %v10179_v39  ;;  %v19067_v40 = vpop.f32.mrb[21].mxu1  ;;  %v19133_v58 = vpop.f32.mrb[23].mxu0 }
 0x69a   :  { %v10669_v50 = vmul.f32 0.5, %v10668_v33  ;;  %v10674_v61 = vmul.f32 0.5, %v10673_v48 }
 0x69c   :  { %21539 = vtanh.f32 %v10669_v50 }
 0x69d   :  { %21541 = vtanh.f32 %v10674_v61 }
 0x6a6   :  { %v21540_v37 = vpop.eup %21539 }
 0x6a7   :  { %v10671_v19 = vmul.f32 0.5, %v21540_v37  ;;  %v21542_v18 = vpop.eup %21541 }
 0x6a8   :  { %v10676_v24 = vmul.f32 0.5, %v21542_v18 }
 0x6a9   :  { %v10672_v43 = vadd.f32 0.5, %v10671_v19 }
 0x6aa   :  { %v10677_v3 = vadd.f32 0.5, %v10676_v24 }
 0x6ac   :  { %v10681_v12 = vsub.f32 1.0, %v10677_v3  ;;  %v10683_v30 = vmul.f32 %v10677_v3, %v23224_v31 }
 0x6c7   :  { %v10664_v20 = vpop.f32.mrb[22].mxu1 }
 0x6c8   :  { %v21003_v45 = vadd.f32 %v22903_v35, %v10664_v20  ;;  %v19199_v36 = vpop.f32.mrb[23].mxu1 }
 0x6c9   :  { %v23528_v36 = vld [vmem:[%s23984_s5] ss:$0 sm:$0xff] }
 0x6ca   :  { %v10678_v63 = vmul.f32 %v21003_v45, %v10672_v43 }
 0x6cc   :  { %v10679_v42 = vadd.f32 %v22908_v16, %v10678_v63 }
 0x6ce   :  { %21543 = vtanh.f32 %v10679_v42 }
 0x6d8   :  { %v21544_v52 = vpop.eup %21543 }
 0x6d9   :  { %v10682_v46 = vmul.f32 %v21544_v52, %v10681_v12 }
 0x6db   :  { %v23376_v10 = vadd.f32 %v10683_v30, %v10682_v46 }
 0x6dd   :  { %10685 = vst.msk [vmem:[%s23985_s6 + $0x18] sm:$0xff] %vm4781_vm0, %v23376_v10  ;;  %v10687_v35 = vsel %vm4781_vm0, %v23376_v10, 0 }
 0x6de   :  { %v23385_v16 = vand.u32 4294901760, %v10687_v35 }
 0x6e0   :  { %v23388_v56 = vsub.f32 %v10687_v35, %v23385_v16 }
 0x6e2   :  { %v23391_v38 = vand.u32 4294901760, %v23388_v56 }
 0x6e4   :  { %v10761_v31 = vsub.f32 %v23388_v56, %v23391_v38 }
 0x6e6   :  { %v23395_v39 = vand.u32 4294901760, %v10761_v31 }
 0x6e8   :  { %19209 = vmatmul.mubr.f32.vlgmr.msra.gmra.mrb[24].mxu0 %v23395_v39  ;;  %19275 = vmatmul.mubr.f32.vlgmr.msra.gmra.mrb[24].mxu1 %v23395_v39 }
 0x6e9   :  { %20576 = vmatpush3.bf16.msra.mxu0 %v22402_v28  ;;  %20612 = vmatpush3.bf16.msra.mxu1 %v22547_v4 }
 0x6ea   :  { %20577 = vmatprep.subr.bf16.mxu0 %v24047_v53  ;;  %20613 = vmatprep.subr.bf16.mxu1 %v24047_v53 }
 0x6eb   :  { %19219 = vmatprep.mubr.msk.f32.mxu0 %vm21600_vm2, %v24048_v32  ;;  %19285 = vmatprep.mubr.msk.f32.mxu1 %vm21600_vm2, %v24048_v32 }
 0x6ed   :  { %20579 = vmatpush3.bf16.msra.mxu0 %v22410_v11  ;;  %20615 = vmatpush3.bf16.msra.mxu1 %v22554_v6 }
 0x6ee   :  { %20580 = vmatprep.subr.bf16.mxu0 %v24047_v53  ;;  %20616 = vmatprep.subr.bf16.mxu1 %v24047_v53 }
 0x6f0   :  { %19220 = vmatmul.mubr.f32.vlgmr.msra.gmra.mrb[24].mxu0 %v23385_v16  ;;  %19286 = vmatmul.mubr.f32.vlgmr.msra.gmra.mrb[24].mxu1 %v23385_v16 }
 0x6f1   :  { %20582 = vmatpush3.bf16.msra.mxu0 %v22420_v27  ;;  %20618 = vmatpush3.bf16.msra.mxu1 %v22565_v22 }
 0x6f2   :  { %20583 = vmatprep.subr.bf16.mxu0 %v24047_v53  ;;  %20619 = vmatprep.subr.bf16.mxu1 %v24047_v53 }
 0x6f3   :  { %19230 = vmatprep.mubr.msk.f32.mxu0 %vm21600_vm2, %v24048_v32  ;;  %19296 = vmatprep.mubr.msk.f32.mxu1 %vm21600_vm2, %v24048_v32 }
 0x6f5   :  { %20585 = vmatpush3.bf16.msra.mxu0 %v22429_v29  ;;  %20621 = vmatpush3.bf16.msra.mxu1 %v22580_v23 }
 0x6f6   :  { %20586 = vmatprep.subr.bf16.mxu0 %v24047_v53  ;;  %20622 = vmatprep.subr.bf16.mxu1 %v24047_v53 }
 0x6f8   :  { %19231 = vmatmul.mubr.f32.vlgmr.msra.gmra.mrb[24].mxu0 %v23388_v56  ;;  %19297 = vmatmul.mubr.f32.vlgmr.msra.gmra.mrb[24].mxu1 %v23388_v56 }
 0x6f9   :  { %20588 = vmatpush3.bf16.msra.mxu0 %v22342_v1  ;;  %20624 = vmatpush3.bf16.msra.mxu1 %v22516_v7 }
 0x6fa   :  { %20589 = vmatprep.subr.bf16.mxu0 %v24047_v53  ;;  %20625 = vmatprep.subr.bf16.mxu1 %v24047_v53 }
 0x6fb   :  { %19241 = vmatprep.mubr.msk.f32.mxu0 %vm21600_vm2, %v24048_v32  ;;  %19307 = vmatprep.mubr.msk.f32.mxu1 %vm21600_vm2, %v24048_v32 }
 0x6fd   :  { %20591 = vmatpush3.bf16.msra.mxu0 %v22360_v0  ;;  %20627 = vmatpush3.bf16.msra.mxu1 %v22531_v8 }
 0x6fe   :  { %20592 = vmatprep.subr.bf16.mxu0 %v24047_v53  ;;  %20628 = vmatprep.subr.bf16.mxu1 %v24047_v53 }
 0x700   :  { %19242 = vmatmul.mubr.f32.vlgmr.msra.gmra.mrb[24].mxu0 %v23391_v38  ;;  %19308 = vmatmul.mubr.f32.vlgmr.msra.gmra.mrb[24].mxu1 %v23391_v38 }
 0x701   :  { %20594 = vmatpush3.bf16.msra.mxu0 %v22458_v14  ;;  %20630 = vmatpush3.bf16.msra.mxu1 %v22618_v44 }
 0x702   :  { %20595 = vmatprep.subr.bf16.mxu0 %v24047_v53  ;;  %20631 = vmatprep.subr.bf16.mxu1 %v24047_v53 }
 0x703   :  { %19252 = vmatprep.mubr.msk.f32.mxu0 %vm21600_vm2, %v24048_v32  ;;  %19318 = vmatprep.mubr.msk.f32.mxu1 %vm21600_vm2, %v24048_v32 }
 0x705   :  { %20597 = vmatpush3.bf16.msra.mxu0 %v22477_v49  ;;  %20633 = vmatpush3.bf16.msra.mxu1 %v22643_v51 }
 0x706   :  { %20598 = vmatprep.subr.bf16.mxu0 %v24047_v53  ;;  %20634 = vmatprep.subr.bf16.mxu1 %v24047_v53 }
 0x708   :  { %19253 = vmatmul.mubr.f32.vlgmr.msra.gmra.mrb[24].mxu0 %v23385_v16  ;;  %19319 = vmatmul.mubr.f32.vlgmr.msra.gmra.mrb[24].mxu1 %v23385_v16 }
 0x709   :  { %20600 = vmatpush3.bf16.msra.mxu0 %v22342_v1  ;;  %20636 = vmatpush3.bf16.msra.mxu1 %v22516_v7 }
 0x70a   :  { %20601 = vmatprep.subr.bf16.mxu0 %v24047_v53  ;;  %20637 = vmatprep.subr.bf16.mxu1 %v24047_v53 }
 0x70b   :  { %19263 = vmatprep.mubr.msk.f32.mxu0 %vm21600_vm2, %v24048_v32  ;;  %19329 = vmatprep.mubr.msk.f32.mxu1 %vm21600_vm2, %v24048_v32 }
 0x70d   :  { %20603 = vmatpush3.bf16.msra.mxu0 %v22360_v0  ;;  %20639 = vmatpush3.bf16.msra.mxu1 %v22531_v8 }
 0x70e   :  { %20640 = vmatprep.subr.bf16.mxu0 %v24047_v53  ;;  %20676 = vmatprep.subr.bf16.mxu1 %v24047_v53 }
 0x710   :  { %19264 = vmatmul.mubr.f32.vlgmr.msra.gmra.mrb[24].mxu0 %v23385_v16  ;;  %19330 = vmatmul.mubr.f32.vlgmr.msra.gmra.mrb[24].mxu1 %v23385_v16 }
 0x711   :  { %20642 = vmatpush3.bf16.msra.mxu0 %v22682_v54  ;;  %19340 = vmatprep.mubr.msk.f32.mxu0 %vm21600_vm2, %v24048_v32 }
 0x712   :  { %20643 = vmatprep.subr.bf16.mxu0 %v24047_v53  ;;  %20678 = vmatpush3.bf16.msra.mxu1 %v22342_v1 }
 0x713   :  { %20679 = vmatprep.subr.bf16.mxu1 %v24047_v53  ;;  %19406 = vmatprep.mubr.msk.f32.mxu1 %vm21600_vm2, %v24048_v32 }
 0x715   :  { %20645 = vmatpush3.bf16.msra.mxu0 %v22699_v62 }
 0x716   :  { %20646 = vmatprep.subr.bf16.mxu0 %v24047_v53  ;;  %20681 = vmatpush3.bf16.msra.mxu1 %v22360_v0 }
 0x717   :  { %20682 = vmatprep.subr.bf16.mxu1 %v24047_v53 }
 0x718   :  { %19341 = vmatmul.mubr.f32.vlgmr.msra.gmra.mrb[26].mxu0 %v23395_v39 }
 0x719   :  { %20648 = vmatpush3.bf16.msra.mxu0 %v22717_v26  ;;  %19351 = vmatprep.mubr.msk.f32.mxu0 %vm21600_vm2, %v24048_v32 }
 0x71a   :  { %20649 = vmatprep.subr.bf16.mxu0 %v24047_v53 }
 0x71d   :  { %20651 = vmatpush3.bf16.msra.mxu0 %v22726_v25 }
 0x71e   :  { %20652 = vmatprep.subr.bf16.mxu0 %v24047_v53 }
 0x720   :  { %19352 = vmatmul.mubr.f32.vlgmr.msra.gmra.mrb[26].mxu0 %v23385_v16 }
 0x721   :  { %20654 = vmatpush3.bf16.msra.mxu0 %v22736_v5  ;;  %19362 = vmatprep.mubr.msk.f32.mxu0 %vm21600_vm2, %v24048_v32 }
 0x722   :  { %20655 = vmatprep.subr.bf16.mxu0 %v24047_v53 }
 0x725   :  { %20657 = vmatpush3.bf16.msra.mxu0 %v22745_v2 }
 0x726   :  { %20658 = vmatprep.subr.bf16.mxu0 %v24047_v53 }
 0x728   :  { %19363 = vmatmul.mubr.f32.vlgmr.msra.gmra.mrb[26].mxu0 %v23388_v56 }
 0x729   :  { %20660 = vmatpush3.bf16.msra.mxu0 %v22682_v54  ;;  %19373 = vmatprep.mubr.msk.f32.mxu0 %vm21600_vm2, %v24048_v32 }
 0x72a   :  { %20661 = vmatprep.subr.bf16.mxu0 %v24047_v53 }
 0x72d   :  { %20663 = vmatpush3.bf16.msra.mxu0 %v22699_v62 }
 0x72e   :  { %20664 = vmatprep.subr.bf16.mxu0 %v24047_v53 }
 0x730   :  { %19374 = vmatmul.mubr.f32.vlgmr.msra.gmra.mrb[26].mxu0 %v23391_v38 }
 0x731   :  { %20666 = vmatpush3.bf16.msra.mxu0 %v22774_v15  ;;  %19384 = vmatprep.mubr.msk.f32.mxu0 %vm21600_vm2, %v24048_v32 }
 0x732   :  { %20667 = vmatprep.subr.bf16.mxu0 %v24047_v53 }
 0x735   :  { %20669 = vmatpush3.bf16.msra.mxu0 %v22787_v13 }
 0x736   :  { %20670 = vmatprep.subr.bf16.mxu0 %v24047_v53 }
 0x738   :  { %19385 = vmatmul.mubr.f32.vlgmr.msra.gmra.mrb[26].mxu0 %v23385_v16 }
 0x739   :  { %20672 = vmatpush3.bf16.msra.mxu0 %v22682_v54  ;;  %19395 = vmatprep.mubr.msk.f32.mxu0 %vm21600_vm2, %v24048_v32 }
 0x73a   :  { %20673 = vmatprep.subr.bf16.mxu0 %v24047_v53 }
 0x73d   :  { %20675 = vmatpush3.bf16.msra.mxu0 %v22699_v62 }
 0x73e   :  { %20712 = vmatprep.subr.bf16.mxu0 %v24047_v53 }
 0x740   :  { %19396 = vmatmul.mubr.f32.vlgmr.msra.gmra.mrb[26].mxu0 %v23385_v16 }
 0x741   :  { %20714 = vmatpush3.bf16.msra.mxu0 %v22516_v7  ;;  %19472 = vmatprep.mubr.msk.f32.mxu0 %vm21600_vm2, %v24048_v32 }
 0x742   :  { %20715 = vmatprep.subr.bf16.mxu0 %v24047_v53 }
 0x745   :  { %20717 = vmatpush3.bf16.msra.mxu0 %v22531_v8 }
 0x746   :  { %20718 = vmatprep.subr.bf16.mxu0 %v24047_v53 }
 0x7e3   :  { %v11170_v33 = vpop.f32.mrb[24].mxu0  ;;  %v11655_v48 = vpop.f32.mrb[24].mxu1 }
 0x7e4   :  { %v12144_v40 = vadd.f32 %v11170_v33, %v22888_v55  ;;  %v12149_v58 = vadd.f32 %v11655_v48, %v22890_v41  ;;  %v19265_v50 = vpop.f32.mrb[25].mxu0  ;;  %v19331_v61 = vpop.f32.mrb[25].mxu1 }
 0x7e6   :  { %v12145_v37 = vmul.f32 0.5, %v12144_v40  ;;  %v12150_v19 = vmul.f32 0.5, %v12149_v58 }
 0x7e8   :  { %21545 = vtanh.f32 %v12145_v37 }
 0x7e9   :  { %21547 = vtanh.f32 %v12150_v19 }
 0x7f2   :  { %v21546_v20 = vpop.eup %21545 }
 0x7f3   :  { %v12147_v45 = vmul.f32 0.5, %v21546_v20  ;;  %v21548_v41 = vpop.eup %21547 }
 0x7f4   :  { %v12152_v3 = vmul.f32 0.5, %v21548_v41 }
 0x7f5   :  { %v12148_v18 = vadd.f32 0.5, %v12147_v45 }
 0x7f6   :  { %v12153_v12 = vadd.f32 0.5, %v12152_v3 }
 0x7f8   :  { %v12157_v52 = vsub.f32 1.0, %v12153_v12  ;;  %v12159_v46 = vmul.f32 %v12153_v12, %v23376_v10 }
 0x813   :  { %v12140_v43 = vpop.f32.mrb[26].mxu0 }
 0x814   :  { %v21004_v63 = vadd.f32 %v23528_v36, %v12140_v43  ;;  %v19397_v55 = vpop.f32.mrb[27].mxu0 }
 0x816   :  { %v12154_v42 = vmul.f32 %v21004_v63, %v12148_v18 }
 0x818   :  { %v12155_v24 = vadd.f32 %v12154_v42, %v22914_v60 }
 0x81a   :  { %21549 = vtanh.f32 %v12155_v24 }
 0x824   :  { %v21550_v30 = vpop.eup %21549 }
 0x825   :  { %v12158_v35 = vmul.f32 %v21550_v30, %v12157_v52 }
 0x827   :  { %v23533_v16 = vadd.f32 %v12159_v46, %v12158_v35 }
 0x829   :  { %12161 = vst.msk [vmem:[%s23985_s6 + $0x20] sm:$0xff] %vm4781_vm0, %v23533_v16  ;;  %v12163_v56 = vsel %vm4781_vm0, %v23533_v16, 0 }
 0x82a   :  { %v23542_v60 = vand.u32 4294901760, %v12163_v56 }
 0x82c   :  { %v23545_v38 = vsub.f32 %v12163_v56, %v23542_v60 }
 0x82e   :  { %v23548_v31 = vand.u32 4294901760, %v23545_v38 }
 0x830   :  { %v12237_v10 = vsub.f32 %v23545_v38, %v23548_v31 }
 0x832   :  { %v23552_v39 = vand.u32 4294901760, %v12237_v10 }
 0x834   :  { %19407 = vmatmul.mubr.f32.vlgmr.msra.gmra.mrb[26].mxu1 %v23552_v39  ;;  %19473 = vmatmul.mubr.f32.vlgmr.msra.gmra.mrb[28].mxu0 %v23552_v39 }
 0x835   :  { %20684 = vmatpush3.bf16.msra.mxu1 %v22402_v28  ;;  %20720 = vmatpush3.bf16.msra.mxu0 %v22547_v4 }
 0x836   :  { %20685 = vmatprep.subr.bf16.mxu1 %v24047_v53  ;;  %20721 = vmatprep.subr.bf16.mxu0 %v24047_v53 }
 0x837   :  { %19417 = vmatprep.mubr.msk.f32.mxu1 %vm21600_vm2, %v24048_v32  ;;  %19483 = vmatprep.mubr.msk.f32.mxu0 %vm21600_vm2, %v24048_v32 }
 0x839   :  { %20687 = vmatpush3.bf16.msra.mxu1 %v22410_v11  ;;  %20723 = vmatpush3.bf16.msra.mxu0 %v22554_v6 }
 0x83a   :  { %20688 = vmatprep.subr.bf16.mxu1 %v24047_v53  ;;  %20724 = vmatprep.subr.bf16.mxu0 %v24047_v53 }
 0x83c   :  { %19418 = vmatmul.mubr.f32.vlgmr.msra.gmra.mrb[26].mxu1 %v23542_v60  ;;  %19484 = vmatmul.mubr.f32.vlgmr.msra.gmra.mrb[28].mxu0 %v23542_v60 }
 0x83d   :  { %20690 = vmatpush3.bf16.msra.mxu1 %v22420_v27  ;;  %20726 = vmatpush3.bf16.msra.mxu0 %v22565_v22 }
 0x83e   :  { %20691 = vmatprep.subr.bf16.mxu1 %v24047_v53  ;;  %20727 = vmatprep.subr.bf16.mxu0 %v24047_v53 }
 0x83f   :  { %19428 = vmatprep.mubr.msk.f32.mxu1 %vm21600_vm2, %v24048_v32  ;;  %19494 = vmatprep.mubr.msk.f32.mxu0 %vm21600_vm2, %v24048_v32 }
 0x841   :  { %20693 = vmatpush3.bf16.msra.mxu1 %v22429_v29  ;;  %20729 = vmatpush3.bf16.msra.mxu0 %v22580_v23 }
 0x842   :  { %20694 = vmatprep.subr.bf16.mxu1 %v24047_v53  ;;  %20730 = vmatprep.subr.bf16.mxu0 %v24047_v53 }
 0x844   :  { %19429 = vmatmul.mubr.f32.vlgmr.msra.gmra.mrb[26].mxu1 %v23545_v38  ;;  %19495 = vmatmul.mubr.f32.vlgmr.msra.gmra.mrb[28].mxu0 %v23545_v38 }
 0x845   :  { %20696 = vmatpush3.bf16.msra.mxu1 %v22342_v1  ;;  %20732 = vmatpush3.bf16.msra.mxu0 %v22516_v7 }
 0x846   :  { %20697 = vmatprep.subr.bf16.mxu1 %v24047_v53  ;;  %20733 = vmatprep.subr.bf16.mxu0 %v24047_v53 }
 0x847   :  { %19439 = vmatprep.mubr.msk.f32.mxu1 %vm21600_vm2, %v24048_v32  ;;  %19505 = vmatprep.mubr.msk.f32.mxu0 %vm21600_vm2, %v24048_v32 }
 0x849   :  { %20699 = vmatpush3.bf16.msra.mxu1 %v22360_v0  ;;  %20735 = vmatpush3.bf16.msra.mxu0 %v22531_v8 }
 0x84a   :  { %20700 = vmatprep.subr.bf16.mxu1 %v24047_v53  ;;  %20736 = vmatprep.subr.bf16.mxu0 %v24047_v53 }
 0x84c   :  { %19440 = vmatmul.mubr.f32.vlgmr.msra.gmra.mrb[26].mxu1 %v23548_v31  ;;  %19506 = vmatmul.mubr.f32.vlgmr.msra.gmra.mrb[28].mxu0 %v23548_v31 }
 0x84d   :  { %20702 = vmatpush3.bf16.msra.mxu1 %v22458_v14  ;;  %20738 = vmatpush3.bf16.msra.mxu0 %v22618_v44 }
 0x84e   :  { %20703 = vmatprep.subr.bf16.mxu1 %v24047_v53  ;;  %20739 = vmatprep.subr.bf16.mxu0 %v24047_v53 }
 0x84f   :  { %19450 = vmatprep.mubr.msk.f32.mxu1 %vm21600_vm2, %v24048_v32  ;;  %19516 = vmatprep.mubr.msk.f32.mxu0 %vm21600_vm2, %v24048_v32 }
 0x851   :  { %20705 = vmatpush3.bf16.msra.mxu1 %v22477_v49  ;;  %20741 = vmatpush3.bf16.msra.mxu0 %v22643_v51 }
 0x852   :  { %20706 = vmatprep.subr.bf16.mxu1 %v24047_v53  ;;  %20742 = vmatprep.subr.bf16.mxu0 %v24047_v53 }
 0x854   :  { %19451 = vmatmul.mubr.f32.vlgmr.msra.gmra.mrb[26].mxu1 %v23542_v60  ;;  %19517 = vmatmul.mubr.f32.vlgmr.msra.gmra.mrb[28].mxu0 %v23542_v60 }
 0x855   :  { %20708 = vmatpush3.bf16.msra.mxu1 %v22342_v1  ;;  %20744 = vmatpush3.bf16.msra.mxu0 %v22516_v7 }
 0x856   :  { %20709 = vmatprep.subr.bf16.mxu1 %v24047_v53  ;;  %20745 = vmatprep.subr.bf16.mxu0 %v24047_v53 }
 0x857   :  { %19461 = vmatprep.mubr.msk.f32.mxu1 %vm21600_vm2, %v24048_v32  ;;  %19527 = vmatprep.mubr.msk.f32.mxu0 %vm21600_vm2, %v24048_v32 }
 0x859   :  { %20711 = vmatpush3.bf16.msra.mxu1 %v22360_v0  ;;  %20747 = vmatpush3.bf16.msra.mxu0 %v22531_v8 }
 0x85a   :  { %20748 = vmatprep.subr.bf16.mxu1 %v24047_v53  ;;  %20784 = vmatprep.subr.bf16.mxu0 %v24047_v53 }
 0x85c   :  { %19462 = vmatmul.mubr.f32.vlgmr.msra.gmra.mrb[26].mxu1 %v23542_v60  ;;  %19528 = vmatmul.mubr.f32.vlgmr.msra.gmra.mrb[28].mxu0 %v23542_v60 }
 0x85d   :  { %20750 = vmatpush3.bf16.msra.mxu1 %v22682_v54  ;;  %19538 = vmatprep.mubr.msk.f32.mxu1 %vm21600_vm2, %v24048_v32 }
 0x85e   :  { %20751 = vmatprep.subr.bf16.mxu1 %v24047_v53  ;;  %20786 = vmatpush3.bf16.msra.mxu0 %v22342_v1 }
 0x85f   :  { %20787 = vmatprep.subr.bf16.mxu0 %v24047_v53  ;;  %19604 = vmatprep.mubr.msk.f32.mxu0 %vm21600_vm2, %v24048_v32 }
 0x861   :  { %20753 = vmatpush3.bf16.msra.mxu1 %v22699_v62 }
 0x862   :  { %20754 = vmatprep.subr.bf16.mxu1 %v24047_v53  ;;  %20789 = vmatpush3.bf16.msra.mxu0 %v22360_v0 }
 0x863   :  { %20790 = vmatprep.subr.bf16.mxu0 %v24047_v53 }
 0x864   :  { %19539 = vmatmul.mubr.f32.vlgmr.msra.gmra.mrb[28].mxu1 %v23552_v39 }
 0x865   :  { %20756 = vmatpush3.bf16.msra.mxu1 %v22717_v26  ;;  %19549 = vmatprep.mubr.msk.f32.mxu1 %vm21600_vm2, %v24048_v32 }
 0x866   :  { %20757 = vmatprep.subr.bf16.mxu1 %v24047_v53 }
 0x869   :  { %20759 = vmatpush3.bf16.msra.mxu1 %v22726_v25 }
 0x86a   :  { %20760 = vmatprep.subr.bf16.mxu1 %v24047_v53 }
 0x86c   :  { %19550 = vmatmul.mubr.f32.vlgmr.msra.gmra.mrb[28].mxu1 %v23542_v60 }
 0x86d   :  { %20762 = vmatpush3.bf16.msra.mxu1 %v22736_v5  ;;  %19560 = vmatprep.mubr.msk.f32.mxu1 %vm21600_vm2, %v24048_v32 }
 0x86e   :  { %20763 = vmatprep.subr.bf16.mxu1 %v24047_v53 }
 0x871   :  { %20765 = vmatpush3.bf16.msra.mxu1 %v22745_v2 }
 0x872   :  { %20766 = vmatprep.subr.bf16.mxu1 %v24047_v53 }
 0x874   :  { %19561 = vmatmul.mubr.f32.vlgmr.msra.gmra.mrb[28].mxu1 %v23545_v38 }
 0x875   :  { %20768 = vmatpush3.bf16.msra.mxu1 %v22682_v54  ;;  %19571 = vmatprep.mubr.msk.f32.mxu1 %vm21600_vm2, %v24048_v32 }
 0x876   :  { %20769 = vmatprep.subr.bf16.mxu1 %v24047_v53 }
 0x879   :  { %20771 = vmatpush3.bf16.msra.mxu1 %v22699_v62 }
 0x87a   :  { %20772 = vmatprep.subr.bf16.mxu1 %v24047_v53 }
 0x87c   :  { %19572 = vmatmul.mubr.f32.vlgmr.msra.gmra.mrb[28].mxu1 %v23548_v31 }
 0x87d   :  { %20774 = vmatpush3.bf16.msra.mxu1 %v22774_v15  ;;  %19582 = vmatprep.mubr.msk.f32.mxu1 %vm21600_vm2, %v24048_v32 }
 0x87e   :  { %20775 = vmatprep.subr.bf16.mxu1 %v24047_v53 }
 0x881   :  { %20777 = vmatpush3.bf16.msra.mxu1 %v22787_v13 }
 0x882   :  { %20778 = vmatprep.subr.bf16.mxu1 %v24047_v53 }
 0x884   :  { %19583 = vmatmul.mubr.f32.vlgmr.msra.gmra.mrb[28].mxu1 %v23542_v60 }
 0x885   :  { %20780 = vmatpush3.bf16.msra.mxu1 %v22682_v54  ;;  %19593 = vmatprep.mubr.msk.f32.mxu1 %vm21600_vm2, %v24048_v32 }
 0x886   :  { %20781 = vmatprep.subr.bf16.mxu1 %v24047_v53 }
 0x889   :  { %20783 = vmatpush3.bf16.msra.mxu1 %v22699_v62 }
 0x88a   :  { %20820 = vmatprep.subr.bf16.mxu1 %v24047_v53 }
 0x88c   :  { %19594 = vmatmul.mubr.f32.vlgmr.msra.gmra.mrb[28].mxu1 %v23542_v60 }
 0x88d   :  { %20822 = vmatpush3.bf16.msra.mxu1 %v22516_v7  ;;  %19670 = vmatprep.mubr.msk.f32.mxu1 %vm21600_vm2, %v24048_v32 }
 0x88e   :  { %20823 = vmatprep.subr.bf16.mxu1 %v24047_v53 }
 0x891   :  { %20825 = vmatpush3.bf16.msra.mxu1 %v22531_v8 }
 0x892   :  { %20826 = vmatprep.subr.bf16.mxu1 %v24047_v53 }
 0x92f   :  { %v12646_v33 = vpop.f32.mrb[26].mxu1  ;;  %v13131_v48 = vpop.f32.mrb[28].mxu0 }
 0x930   :  { %v13620_v40 = vadd.f32 %v22884_v47, %v12646_v33  ;;  %v13625_v58 = vadd.f32 %v22886_v21, %v13131_v48  ;;  %v19463_v50 = vpop.f32.mrb[27].mxu1  ;;  %v19529_v61 = vpop.f32.mrb[29].mxu0 }
 0x932   :  { %v13621_v37 = vmul.f32 0.5, %v13620_v40  ;;  %v13626_v19 = vmul.f32 0.5, %v13625_v58 }
 0x934   :  { %21551 = vtanh.f32 %v13621_v37 }
 0x935   :  { %21553 = vtanh.f32 %v13626_v19 }
 0x93e   :  { %v21552_v20 = vpop.eup %21551 }
 0x93f   :  { %v13623_v45 = vmul.f32 0.5, %v21552_v20  ;;  %v21554_v41 = vpop.eup %21553 }
 0x940   :  { %v13628_v47 = vmul.f32 0.5, %v21554_v41 }
 0x941   :  { %v13624_v18 = vadd.f32 0.5, %v13623_v45 }
 0x942   :  { %v13629_v21 = vadd.f32 0.5, %v13628_v47 }
 0x944   :  { %v13633_v3 = vsub.f32 1.0, %v13629_v21  ;;  %v13635_v52 = vmul.f32 %v13629_v21, %v23533_v16 }
 0x95f   :  { %v13616_v43 = vpop.f32.mrb[28].mxu1 }
 0x960   :  { %v21005_v63 = vadd.f32 %v23528_v36, %v13616_v43  ;;  %v19595_v55 = vpop.f32.mrb[29].mxu1 }
 0x962   :  { %v13630_v42 = vmul.f32 %v21005_v63, %v13624_v18 }
 0x964   :  { %v13631_v24 = vadd.f32 %v22912_v17, %v13630_v42 }
 0x966   :  { %21555 = vtanh.f32 %v13631_v24 }
 0x970   :  { %v21556_v12 = vpop.eup %21555 }
 0x971   :  { %v13634_v30 = vmul.f32 %v21556_v12, %v13633_v3 }
 0x973   :  { %v23685_v46 = vadd.f32 %v13635_v52, %v13634_v30 }
 0x975   :  { %13637 = vst.msk [vmem:[%s23985_s6 + $0x28] sm:$0xff] %vm4781_vm0, %v23685_v46  ;;  %v13639_v35 = vsel %vm4781_vm0, %v23685_v46, 0 }
 0x976   :  { %v23694_v17 = vand.u32 4294901760, %v13639_v35 }
 0x978   :  { %v23697_v56 = vsub.f32 %v13639_v35, %v23694_v17 }
 0x97a   :  { %v23700_v60 = vand.u32 4294901760, %v23697_v56 }
 0x97c   :  { %v13713_v16 = vsub.f32 %v23697_v56, %v23700_v60 }
 0x97e   :  { %v23704_v38 = vand.u32 4294901760, %v13713_v16 }
 0x980   :  { %19605 = vmatmul.mubr.f32.vlgmr.msra.gmra.mrb[30].mxu0 %v23704_v38  ;;  %19671 = vmatmul.mubr.f32.vlgmr.msra.gmra.mrb[30].mxu1 %v23704_v38 }
 0x981   :  { %20792 = vmatpush3.bf16.msra.mxu0 %v22402_v28  ;;  %20828 = vmatpush3.bf16.msra.mxu1 %v22547_v4 }
 0x982   :  { %20793 = vmatprep.subr.bf16.mxu0 %v24047_v53  ;;  %20829 = vmatprep.subr.bf16.mxu1 %v24047_v53 }
 0x983   :  { %19615 = vmatprep.mubr.msk.f32.mxu0 %vm21600_vm2, %v24048_v32  ;;  %19681 = vmatprep.mubr.msk.f32.mxu1 %vm21600_vm2, %v24048_v32 }
 0x985   :  { %20795 = vmatpush3.bf16.msra.mxu0 %v22410_v11  ;;  %20831 = vmatpush3.bf16.msra.mxu1 %v22554_v6 }
 0x986   :  { %20796 = vmatprep.subr.bf16.mxu0 %v24047_v53  ;;  %20832 = vmatprep.subr.bf16.mxu1 %v24047_v53 }
 0x988   :  { %19616 = vmatmul.mubr.f32.vlgmr.msra.gmra.mrb[30].mxu0 %v23694_v17  ;;  %19682 = vmatmul.mubr.f32.vlgmr.msra.gmra.mrb[30].mxu1 %v23694_v17 }
 0x989   :  { %20798 = vmatpush3.bf16.msra.mxu0 %v22420_v27  ;;  %20834 = vmatpush3.bf16.msra.mxu1 %v22565_v22 }
 0x98a   :  { %20799 = vmatprep.subr.bf16.mxu0 %v24047_v53  ;;  %20835 = vmatprep.subr.bf16.mxu1 %v24047_v53 }
 0x98b   :  { %19626 = vmatprep.mubr.msk.f32.mxu0 %vm21600_vm2, %v24048_v32  ;;  %19692 = vmatprep.mubr.msk.f32.mxu1 %vm21600_vm2, %v24048_v32 }
 0x98d   :  { %20801 = vmatpush3.bf16.msra.mxu0 %v22429_v29  ;;  %20837 = vmatpush3.bf16.msra.mxu1 %v22580_v23 }
 0x98e   :  { %20802 = vmatprep.subr.bf16.mxu0 %v24047_v53  ;;  %20838 = vmatprep.subr.bf16.mxu1 %v24047_v53 }
 0x990   :  { %19627 = vmatmul.mubr.f32.vlgmr.msra.gmra.mrb[30].mxu0 %v23697_v56  ;;  %19693 = vmatmul.mubr.f32.vlgmr.msra.gmra.mrb[30].mxu1 %v23697_v56 }
 0x991   :  { %20804 = vmatpush3.bf16.msra.mxu0 %v22342_v1  ;;  %20840 = vmatpush3.bf16.msra.mxu1 %v22516_v7 }
 0x992   :  { %20805 = vmatprep.subr.bf16.mxu0 %v24047_v53  ;;  %20841 = vmatprep.subr.bf16.mxu1 %v24047_v53 }
 0x993   :  { %19637 = vmatprep.mubr.msk.f32.mxu0 %vm21600_vm2, %v24048_v32  ;;  %19703 = vmatprep.mubr.msk.f32.mxu1 %vm21600_vm2, %v24048_v32 }
 0x995   :  { %20807 = vmatpush3.bf16.msra.mxu0 %v22360_v0  ;;  %20843 = vmatpush3.bf16.msra.mxu1 %v22531_v8 }
 0x996   :  { %20808 = vmatprep.subr.bf16.mxu0 %v24047_v53  ;;  %20844 = vmatprep.subr.bf16.mxu1 %v24047_v53 }
 0x998   :  { %19638 = vmatmul.mubr.f32.vlgmr.msra.gmra.mrb[30].mxu0 %v23700_v60  ;;  %19704 = vmatmul.mubr.f32.vlgmr.msra.gmra.mrb[30].mxu1 %v23700_v60 }
 0x999   :  { %20810 = vmatpush3.bf16.msra.mxu0 %v22458_v14  ;;  %20846 = vmatpush3.bf16.msra.mxu1 %v22618_v44 }
 0x99a   :  { %20811 = vmatprep.subr.bf16.mxu0 %v24047_v53  ;;  %20847 = vmatprep.subr.bf16.mxu1 %v24047_v53 }
 0x99b   :  { %19648 = vmatprep.mubr.msk.f32.mxu0 %vm21600_vm2, %v24048_v32  ;;  %19714 = vmatprep.mubr.msk.f32.mxu1 %vm21600_vm2, %v24048_v32 }
 0x99d   :  { %20813 = vmatpush3.bf16.msra.mxu0 %v22477_v49  ;;  %20849 = vmatpush3.bf16.msra.mxu1 %v22643_v51 }
 0x99e   :  { %20814 = vmatprep.subr.bf16.mxu0 %v24047_v53  ;;  %20850 = vmatprep.subr.bf16.mxu1 %v24047_v53 }
 0x9a0   :  { %19649 = vmatmul.mubr.f32.vlgmr.msra.gmra.mrb[30].mxu0 %v23694_v17  ;;  %19715 = vmatmul.mubr.f32.vlgmr.msra.gmra.mrb[30].mxu1 %v23694_v17 }
 0x9a1   :  { %20816 = vmatpush3.bf16.msra.mxu0 %v22342_v1  ;;  %20852 = vmatpush3.bf16.msra.mxu1 %v22516_v7 }
 0x9a2   :  { %20817 = vmatprep.subr.bf16.mxu0 %v24047_v53  ;;  %20853 = vmatprep.subr.bf16.mxu1 %v24047_v53 }
 0x9a3   :  { %19659 = vmatprep.mubr.msk.f32.mxu0 %vm21600_vm2, %v24048_v32  ;;  %19725 = vmatprep.mubr.msk.f32.mxu1 %vm21600_vm2, %v24048_v32 }
 0x9a5   :  { %20819 = vmatpush3.bf16.msra.mxu0 %v22360_v0  ;;  %20855 = vmatpush3.bf16.msra.mxu1 %v22531_v8 }
 0x9a6   :  { %20856 = vmatprep.subr.bf16.mxu0 %v24047_v53  ;;  %20892 = vmatprep.subr.bf16.mxu1 %v24047_v53 }
 0x9a8   :  { %19660 = vmatmul.mubr.f32.vlgmr.msra.gmra.mrb[30].mxu0 %v23694_v17  ;;  %19726 = vmatmul.mubr.f32.vlgmr.msra.gmra.mrb[30].mxu1 %v23694_v17 }
 0x9a9   :  { %20858 = vmatpush3.bf16.msra.mxu0 %v22682_v54  ;;  %19736 = vmatprep.mubr.msk.f32.mxu0 %vm21600_vm2, %v24048_v32 }
 0x9aa   :  { %20859 = vmatprep.subr.bf16.mxu0 %v24047_v53  ;;  %20894 = vmatpush3.bf16.msra.mxu1 %v22342_v1 }
 0x9ab   :  { %20895 = vmatprep.subr.bf16.mxu1 %v24047_v53  ;;  %19802 = vmatprep.mubr.msk.f32.mxu1 %vm21600_vm2, %v24048_v32 }
 0x9ad   :  { %20861 = vmatpush3.bf16.msra.mxu0 %v22699_v62 }
 0x9ae   :  { %20862 = vmatprep.subr.bf16.mxu0 %v24047_v53  ;;  %20897 = vmatpush3.bf16.msra.mxu1 %v22360_v0 }
 0x9af   :  { %20898 = vmatprep.subr.bf16.mxu1 %v24047_v53 }
 0x9b0   :  { %19737 = vmatmul.mubr.f32.vlgmr.msra.gmra.mrb[32].mxu0 %v23704_v38 }
 0x9b1   :  { %20864 = vmatpush3.bf16.msra.mxu0 %v22717_v26  ;;  %19747 = vmatprep.mubr.msk.f32.mxu0 %vm21600_vm2, %v24048_v32 }
 0x9b2   :  { %20865 = vmatprep.subr.bf16.mxu0 %v24047_v53 }
 0x9b5   :  { %20867 = vmatpush3.bf16.msra.mxu0 %v22726_v25 }
 0x9b6   :  { %20868 = vmatprep.subr.bf16.mxu0 %v24047_v53 }
 0x9b8   :  { %19748 = vmatmul.mubr.f32.vlgmr.msra.gmra.mrb[32].mxu0 %v23694_v17 }
 0x9b9   :  { %20870 = vmatpush3.bf16.msra.mxu0 %v22736_v5  ;;  %19758 = vmatprep.mubr.msk.f32.mxu0 %vm21600_vm2, %v24048_v32 }
 0x9ba   :  { %20871 = vmatprep.subr.bf16.mxu0 %v24047_v53 }
 0x9bd   :  { %20873 = vmatpush3.bf16.msra.mxu0 %v22745_v2 }
 0x9be   :  { %20874 = vmatprep.subr.bf16.mxu0 %v24047_v53 }
 0x9c0   :  { %19759 = vmatmul.mubr.f32.vlgmr.msra.gmra.mrb[32].mxu0 %v23697_v56 }
 0x9c1   :  { %20876 = vmatpush3.bf16.msra.mxu0 %v22682_v54  ;;  %19769 = vmatprep.mubr.msk.f32.mxu0 %vm21600_vm2, %v24048_v32 }
 0x9c2   :  { %20877 = vmatprep.subr.bf16.mxu0 %v24047_v53 }
 0x9c5   :  { %20879 = vmatpush3.bf16.msra.mxu0 %v22699_v62 }
 0x9c6   :  { %20880 = vmatprep.subr.bf16.mxu0 %v24047_v53 }
 0x9c8   :  { %19770 = vmatmul.mubr.f32.vlgmr.msra.gmra.mrb[32].mxu0 %v23700_v60 }
 0x9c9   :  { %20882 = vmatpush3.bf16.msra.mxu0 %v22774_v15  ;;  %19780 = vmatprep.mubr.msk.f32.mxu0 %vm21600_vm2, %v24048_v32 }
 0x9ca   :  { %20883 = vmatprep.subr.bf16.mxu0 %v24047_v53 }
 0x9cd   :  { %20885 = vmatpush3.bf16.msra.mxu0 %v22787_v13 }
 0x9ce   :  { %20886 = vmatprep.subr.bf16.mxu0 %v24047_v53 }
 0x9d0   :  { %19781 = vmatmul.mubr.f32.vlgmr.msra.gmra.mrb[32].mxu0 %v23694_v17 }
 0x9d1   :  { %20888 = vmatpush3.bf16.msra.mxu0 %v22682_v54  ;;  %19791 = vmatprep.mubr.msk.f32.mxu0 %vm21600_vm2, %v24048_v32 }
 0x9d2   :  { %20889 = vmatprep.subr.bf16.mxu0 %v24047_v53 }
 0x9d5   :  { %20891 = vmatpush3.bf16.msra.mxu0 %v22699_v62 }
 0x9d6   :  { %20928 = vmatprep.subr.bf16.mxu0 %v24047_v53 }
 0x9d8   :  { %19792 = vmatmul.mubr.f32.vlgmr.msra.gmra.mrb[32].mxu0 %v23694_v17 }
 0x9d9   :  { %20930 = vmatpush3.bf16.msra.mxu0 %v22516_v7  ;;  %19868 = vmatprep.mubr.msk.f32.mxu0 %vm21600_vm2, %v24048_v32 }
 0x9da   :  { %20931 = vmatprep.subr.bf16.mxu0 %v24047_v53 }
 0x9dd   :  { %20933 = vmatpush3.bf16.msra.mxu0 %v22531_v8 }
 0x9de   :  { %20934 = vmatprep.subr.bf16.mxu0 %v24047_v53 }
 0xa7b   :  { %v14122_v31 = vpop.f32.mrb[30].mxu0  ;;  %v14607_v10 = vpop.f32.mrb[30].mxu1 }
 0xa7c   :  { %v15096_v39 = vadd.f32 %v14122_v31, %v22896_v34  ;;  %v15101_v33 = vadd.f32 %v14607_v10, %v22898_v59  ;;  %v19661_v48 = vpop.f32.mrb[31].mxu0  ;;  %v19727_v40 = vpop.f32.mrb[31].mxu1 }
 0xa7e   :  { %v15097_v58 = vmul.f32 0.5, %v15096_v39  ;;  %v15102_v50 = vmul.f32 0.5, %v15101_v33 }
 0xa80   :  { %21557 = vtanh.f32 %v15097_v58 }
 0xa81   :  { %21559 = vtanh.f32 %v15102_v50 }
 0xa8a   :  { %v21558_v61 = vpop.eup %21557 }
 0xa8b   :  { %v15099_v37 = vmul.f32 0.5, %v21558_v61  ;;  %v21560_v18 = vpop.eup %21559 }
 0xa8c   :  { %v15104_v34 = vmul.f32 0.5, %v21560_v18 }
 0xa8d   :  { %v15100_v45 = vadd.f32 0.5, %v15099_v37 }
 0xa8e   :  { %v15105_v59 = vadd.f32 0.5, %v15104_v34 }
 0xa90   :  { %v15109_v42 = vsub.f32 1.0, %v15105_v59  ;;  %v15111_v24 = vmul.f32 %v15105_v59, %v23685_v46 }
 0xaab   :  { %v15092_v19 = vpop.f32.mrb[32].mxu0 }
 0xaac   :  { %v21006_v20 = vadd.f32 %v23528_v36, %v15092_v19  ;;  %v19793_v43 = vpop.f32.mrb[33].mxu0 }
 0xaae   :  { %v15106_v63 = vmul.f32 %v21006_v20, %v15100_v45 }
 0xab0   :  { %v15107_v55 = vadd.f32 %v15106_v63, %v22918_v9 }
 0xab2   :  { %21561 = vtanh.f32 %v15107_v55 }
 0xabc   :  { %v21562_v41 = vpop.eup %21561 }
 0xabd   :  { %v15110_v47 = vmul.f32 %v21562_v41, %v15109_v42 }
 0xabf   :  { %v23837_v21 = vadd.f32 %v15111_v24, %v15110_v47 }
 0xac1   :  { %15113 = vst.msk [vmem:[%s23985_s6 + $0x30] sm:$0xff] %vm4781_vm0, %v23837_v21  ;;  %v15115_v3 = vsel %vm4781_vm0, %v23837_v21, 0 }
 0xac2   :  { %v23846_v9 = vand.u32 4294901760, %v15115_v3 }
 0xac4   :  { %v23849_v12 = vsub.f32 %v15115_v3, %v23846_v9 }
 0xac6   :  { %v23852_v52 = vand.u32 4294901760, %v23849_v12 }
 0xac8   :  { %v15189_v30 = vsub.f32 %v23849_v12, %v23852_v52 }
 0xaca   :  { %v23856_v46 = vand.u32 4294901760, %v15189_v30 }
 0xacc   :  { %19803 = vmatmul.mubr.f32.vlgmr.msra.gmra.mrb[32].mxu1 %v23856_v46  ;;  %19869 = vmatmul.mubr.f32.vlgmr.msra.gmra.mrb[34].mxu0 %v23856_v46 }
 0xacd   :  { %20900 = vmatpush3.bf16.msra.mxu1 %v22402_v28  ;;  %20936 = vmatpush3.bf16.msra.mxu0 %v22547_v4 }
 0xace   :  { %20901 = vmatprep.subr.bf16.mxu1 %v24047_v53  ;;  %20937 = vmatprep.subr.bf16.mxu0 %v24047_v53 }
 0xacf   :  { %19813 = vmatprep.mubr.msk.f32.mxu1 %vm21600_vm2, %v24048_v32  ;;  %19879 = vmatprep.mubr.msk.f32.mxu0 %vm21600_vm2, %v24048_v32 }
 0xad1   :  { %20903 = vmatpush3.bf16.msra.mxu1 %v22410_v11  ;;  %20939 = vmatpush3.bf16.msra.mxu0 %v22554_v6  ;;  %v24079_v11 = vld [vmem:[#allocation11_spill] sm:$0xff] }
 0xad2   :  { %20904 = vmatprep.subr.bf16.mxu1 %v24047_v53  ;;  %20940 = vmatprep.subr.bf16.mxu0 %v24047_v53 }
 0xad4   :  { %19814 = vmatmul.mubr.f32.vlgmr.msra.gmra.mrb[32].mxu1 %v23846_v9  ;;  %19880 = vmatmul.mubr.f32.vlgmr.msra.gmra.mrb[34].mxu0 %v23846_v9 }
 0xad5   :  { %20906 = vmatpush3.bf16.msra.mxu1 %v22420_v27  ;;  %20942 = vmatpush3.bf16.msra.mxu0 %v22565_v22 }
 0xad6   :  { %20907 = vmatprep.subr.bf16.mxu1 %v24047_v53  ;;  %20943 = vmatprep.subr.bf16.mxu0 %v24047_v53 }
 0xad7   :  { %19824 = vmatprep.mubr.msk.f32.mxu1 %vm21600_vm2, %v24048_v32  ;;  %19890 = vmatprep.mubr.msk.f32.mxu0 %vm21600_vm2, %v24048_v32 }
 0xad9   :  { %20909 = vmatpush3.bf16.msra.mxu1 %v22429_v29  ;;  %20945 = vmatpush3.bf16.msra.mxu0 %v22580_v23 }
 0xada   :  { %20910 = vmatprep.subr.bf16.mxu1 %v24047_v53  ;;  %20946 = vmatprep.subr.bf16.mxu0 %v24047_v53 }
 0xadc   :  { %19825 = vmatmul.mubr.f32.vlgmr.msra.gmra.mrb[32].mxu1 %v23849_v12  ;;  %19891 = vmatmul.mubr.f32.vlgmr.msra.gmra.mrb[34].mxu0 %v23849_v12 }
 0xadd   :  { %20912 = vmatpush3.bf16.msra.mxu1 %v22342_v1  ;;  %20948 = vmatpush3.bf16.msra.mxu0 %v22516_v7 }
 0xade   :  { %20913 = vmatprep.subr.bf16.mxu1 %v24047_v53  ;;  %20949 = vmatprep.subr.bf16.mxu0 %v24047_v53 }
 0xadf   :  { %19835 = vmatprep.mubr.msk.f32.mxu1 %vm21600_vm2, %v24048_v32  ;;  %19901 = vmatprep.mubr.msk.f32.mxu0 %vm21600_vm2, %v24048_v32 }
 0xae1   :  { %20915 = vmatpush3.bf16.msra.mxu1 %v22360_v0  ;;  %20951 = vmatpush3.bf16.msra.mxu0 %v22531_v8 }
 0xae2   :  { %20916 = vmatprep.subr.bf16.mxu1 %v24047_v53  ;;  %20952 = vmatprep.subr.bf16.mxu0 %v24047_v53 }
 0xae4   :  { %19836 = vmatmul.mubr.f32.vlgmr.msra.gmra.mrb[32].mxu1 %v23852_v52  ;;  %19902 = vmatmul.mubr.f32.vlgmr.msra.gmra.mrb[34].mxu0 %v23852_v52 }
 0xae5   :  { %20918 = vmatpush3.bf16.msra.mxu1 %v22458_v14  ;;  %20954 = vmatpush3.bf16.msra.mxu0 %v22618_v44 }
 0xae6   :  { %20919 = vmatprep.subr.bf16.mxu1 %v24047_v53  ;;  %20955 = vmatprep.subr.bf16.mxu0 %v24047_v53 }
 0xae7   :  { %19846 = vmatprep.mubr.msk.f32.mxu1 %vm21600_vm2, %v24048_v32  ;;  %19912 = vmatprep.mubr.msk.f32.mxu0 %vm21600_vm2, %v24048_v32 }
 0xae9   :  { %20921 = vmatpush3.bf16.msra.mxu1 %v22477_v49  ;;  %20957 = vmatpush3.bf16.msra.mxu0 %v22643_v51  ;;  %v24080_v51 = vld [vmem:[#allocation5_spill] sm:$0xff] }
 0xaea   :  { %20922 = vmatprep.subr.bf16.mxu1 %v24047_v53  ;;  %20958 = vmatprep.subr.bf16.mxu0 %v24047_v53 }
 0xaec   :  { %19847 = vmatmul.mubr.f32.vlgmr.msra.gmra.mrb[32].mxu1 %v23846_v9  ;;  %19913 = vmatmul.mubr.f32.vlgmr.msra.gmra.mrb[34].mxu0 %v23846_v9 }
 0xaed   :  { %20924 = vmatpush3.bf16.msra.mxu1 %v22342_v1  ;;  %20960 = vmatpush3.bf16.msra.mxu0 %v22516_v7 }
 0xaee   :  { %20925 = vmatprep.subr.bf16.mxu1 %v24047_v53  ;;  %20961 = vmatprep.subr.bf16.mxu0 %v24047_v53 }
 0xaef   :  { %19857 = vmatprep.mubr.msk.f32.mxu1 %vm21600_vm2, %v24048_v32  ;;  %19923 = vmatprep.mubr.msk.f32.mxu0 %vm21600_vm2, %v24048_v32 }
 0xaf1   :  { %20927 = vmatpush3.bf16.msra.mxu1 %v22360_v0  ;;  %20963 = vmatpush3.bf16.msra.mxu0 %v22531_v8 }
 0xaf2   :  { %20964 = vmatprep.subr.bf16.mxu1 %v24047_v53 }
 0xaf4   :  { %19858 = vmatmul.mubr.f32.vlgmr.msra.gmra.mrb[32].mxu1 %v23846_v9  ;;  %19924 = vmatmul.mubr.f32.vlgmr.msra.gmra.mrb[34].mxu0 %v23846_v9 }
 0xaf5   :  { %20966 = vmatpush3.bf16.msra.mxu1 %v22682_v54  ;;  %19934 = vmatprep.mubr.msk.f32.mxu1 %vm21600_vm2, %v24048_v32 }
 0xaf6   :  { %20967 = vmatprep.subr.bf16.mxu1 %v24047_v53 }
 0xaf9   :  { %20969 = vmatpush3.bf16.msra.mxu1 %v22699_v62 }
 0xafa   :  { %20970 = vmatprep.subr.bf16.mxu1 %v24047_v53 }
 0xafc   :  { %19935 = vmatmul.mubr.f32.vlgmr.msra.gmra.mrb[34].mxu1 %v23856_v46 }
 0xafd   :  { %20972 = vmatpush3.bf16.msra.mxu1 %v22717_v26  ;;  %19945 = vmatprep.mubr.msk.f32.mxu1 %vm21600_vm2, %v24048_v32 }
 0xafe   :  { %20973 = vmatprep.subr.bf16.mxu1 %v24047_v53 }
 0xb01   :  { %20975 = vmatpush3.bf16.msra.mxu1 %v22726_v25 }
 0xb02   :  { %20976 = vmatprep.subr.bf16.mxu1 %v24047_v53 }
 0xb04   :  { %19946 = vmatmul.mubr.f32.vlgmr.msra.gmra.mrb[34].mxu1 %v23846_v9 }
 0xb05   :  { %20978 = vmatpush3.bf16.msra.mxu1 %v22736_v5  ;;  %19956 = vmatprep.mubr.msk.f32.mxu1 %vm21600_vm2, %v24048_v32 }
 0xb06   :  { %20979 = vmatprep.subr.bf16.mxu1 %v24047_v53 }
 0xb09   :  { %20981 = vmatpush3.bf16.msra.mxu1 %v22745_v2 }
 0xb0a   :  { %20982 = vmatprep.subr.bf16.mxu1 %v24047_v53 }
 0xb0c   :  { %19957 = vmatmul.mubr.f32.vlgmr.msra.gmra.mrb[34].mxu1 %v23849_v12 }
 0xb0d   :  { %20984 = vmatpush3.bf16.msra.mxu1 %v22682_v54  ;;  %19967 = vmatprep.mubr.msk.f32.mxu1 %vm21600_vm2, %v24048_v32 }
 0xb0e   :  { %20985 = vmatprep.subr.bf16.mxu1 %v24047_v53 }
 0xb11   :  { %20987 = vmatpush3.bf16.msra.mxu1 %v22699_v62 }
 0xb12   :  { %20988 = vmatprep.subr.bf16.mxu1 %v24047_v53 }
 0xb14   :  { %19968 = vmatmul.mubr.f32.vlgmr.msra.gmra.mrb[34].mxu1 %v23852_v52 }
 0xb15   :  { %20990 = vmatpush3.bf16.msra.mxu1 %v22774_v15  ;;  %19978 = vmatprep.mubr.msk.f32.mxu1 %vm21600_vm2, %v24048_v32 }
 0xb16   :  { %20991 = vmatprep.subr.bf16.mxu1 %v24047_v53 }
 0xb19   :  { %20993 = vmatpush3.bf16.msra.mxu1 %v22787_v13 }
 0xb1a   :  { %20994 = vmatprep.subr.bf16.mxu1 %v24047_v53 }
 0xb1c   :  { %19979 = vmatmul.mubr.f32.vlgmr.msra.gmra.mrb[34].mxu1 %v23846_v9 }
 0xb1d   :  { %20996 = vmatpush3.bf16.msra.mxu1 %v22682_v54  ;;  %19989 = vmatprep.mubr.msk.f32.mxu1 %vm21600_vm2, %v24048_v32 }
 0xb1e   :  { %20997 = vmatprep.subr.bf16.mxu1 %v24047_v53 }
 0xb21   :  { %20999 = vmatpush3.bf16.msra.mxu1 %v22699_v62 }
 0xb24   :  { %19990 = vmatmul.mubr.f32.vlgmr.msra.gmra.mrb[34].mxu1 %v23846_v9 }
 0xbc7   :  { %v15598_v1 = vpop.f32.mrb[32].mxu1  ;;  %v16083_v0 = vpop.f32.mrb[34].mxu0 }
 0xbc8   :  { %v16572_v28 = vadd.f32 %v22892_v57, %v15598_v1  ;;  %v16577_v27 = vadd.f32 %v24079_v11, %v16083_v0  ;;  %v19859_v29 = vpop.f32.mrb[33].mxu1  ;;  %v19925_v14 = vpop.f32.mrb[35].mxu0 }
 0xbca   :  { %v16573_v49 = vmul.f32 0.5, %v16572_v28  ;;  %v16578_v7 = vmul.f32 0.5, %v16577_v27 }
 0xbcc   :  { %21563 = vtanh.f32 %v16573_v49 }
 0xbcd   :  { %21565 = vtanh.f32 %v16578_v7 }
 0xbd6   :  { %v21564_v8 = vpop.eup %21563 }
 0xbd7   :  { %v16575_v32 = vmul.f32 0.5, %v21564_v8  ;;  %v21566_v44 = vpop.eup %21565 }
 0xbd8   :  { %v16580_v62 = vmul.f32 0.5, %v21566_v44 }
 0xbd9   :  { %v16576_v6 = vadd.f32 0.5, %v16575_v32 }
 0xbda   :  { %v16581_v26 = vadd.f32 0.5, %v16580_v62 }
 0xbdc   :  { %v16585_v25 = vsub.f32 1.0, %v16581_v26  ;;  %v16587_v2 = vmul.f32 %v16581_v26, %v23837_v21 }
 0xbf7   :  { %v16568_v4 = vpop.f32.mrb[34].mxu1 }
 0xbf8   :  { %v21007_v53 = vadd.f32 %v23528_v36, %v16568_v4  ;;  %v19991_v22 = vpop.f32.mrb[35].mxu1 }
 0xbfa   :  { %v16582_v23 = vmul.f32 %v21007_v53, %v16576_v6 }
 0xbfc   :  { %v16583_v54 = vadd.f32 %v24080_v51, %v16582_v23 }
 0xbfe   :  { %21567 = vtanh.f32 %v16583_v54 }
 0xc08   :  { %v21568_v5 = vpop.eup %21567 }
 0xc09   :  { %v16586_v15 = vmul.f32 %v21568_v5, %v16585_v25 }
 0xc0b   :  { %v16588_v13 = vadd.f32 %v16587_v2, %v16586_v15 }
 0xc0d   :  { %16589 = vst.msk [vmem:[%s23985_s6 + $0x38] sm:$0xff] %vm4781_vm0, %v16588_v13 }
 0xc0e   :  { %16594 = vsyncpa [#allocation3], 1 }

</bundles_post_ra>
